<compile_context>
chip_gen: v7x
topology: tpu7x:2x2x1
jax: 0.10.0
libtpu: 0.0.40
codegen_flags: <defaults>
</compile_context>

<pallas_src>
import functools

import jax
import jax.numpy as jnp
from jax import lax
from jax.experimental import pallas as pl
from jax.experimental.pallas import tpu as pltpu


_EPS = 1e-5
_VMEM_LIMIT = 48 * 1024 * 1024   # <= v7x scoped budget; raise on v5e/v6e for big tiles


def _conv_stats_kernel(xp_ref, w_ref, y_ref, stats_ref, *, Ho, Wo, K, Cpad):
    """Pass A (one batch element per grid step).

    xp_ref    : (1, Ho+2p, Wp_pad, Cpad) bf16  zero-padded NHWC input
    w_ref     : (K*K, Cpad, Cpad)        bf16  conv weight, one (cin,cout) slab per tap
    y_ref     : (Ho*Wo, Cpad)            bf16  conv output rows for this batch element
    stats_ref : (1, 2, Cpad)             f32   per-batch partial [sum; sum-of-squares]
    """
    # K*K accumulating matmuls instead of an im2col concat: contraction per dot
    # is Cpad (full MXU depth), accumulator stays f32, VMEM footprint is one
    # patch + one accumulator instead of a K*K-wide slab.
    acc = None
    for dy in range(K):
        for dx in range(K):
            patch = xp_ref[:, dy:dy + Ho, dx:dx + Wo, :].reshape(Ho * Wo, Cpad)
            part = jnp.dot(patch, w_ref[dy * K + dx],
                           preferred_element_type=jnp.float32)
            acc = part if acc is None else acc + part

    y_ref[...] = acc.astype(y_ref.dtype)
    # Two separate row writes (no concatenate); per-batch partials, reduced in
    # the wrapper, so the grid axis needs no cross-step accumulation.
    stats_ref[:, 0:1, :] = jnp.sum(acc, axis=0, keepdims=True).reshape(1, 1, Cpad)
    stats_ref[:, 1:2, :] = jnp.sum(acc * acc, axis=0, keepdims=True).reshape(1, 1, Cpad)


def _bn_relu_pad_kernel(y_ref, stats_ref, g_ref, b_ref, o_ref, *,
                        Ho, Wo, Cpad, pad, count):
    """Pass B: fused BatchNorm + ReLU, written into the next layer's halo-padded
    NHWC block.  Only the thin halo strips are zeroed; the W-alignment columns
    beyond pad+Wo+pad are never read by any later op and stay untouched.

    y_ref     : (Ho*Wo, Cpad) bf16   conv output rows for this batch element
    stats_ref : (2, Cpad)     f32    [sum; sum-of-squares] over all N*Ho*Wo rows
    g_ref     : (1, Cpad)     f32    BN gamma (zero in padded channels)
    b_ref     : (1, Cpad)     f32    BN beta  (zero in padded channels)
    o_ref     : (1, Ho+2p, Wp_pad, Cpad) bf16
    """
    inv_n = 1.0 / count
    mean = stats_ref[0:1, :] * inv_n
    # Single-pass E[x^2]-E[x]^2 variance; fine at these scales, consider a
    # mean-shifted/Welford pass for very large N*H*W.
    var = jnp.maximum(stats_ref[1:2, :] * inv_n - mean * mean, 0.0)
    scale = g_ref[...] * lax.rsqrt(var + _EPS)
    shift = b_ref[...] - mean * scale
    y = jnp.maximum(y_ref[...].astype(jnp.float32) * scale + shift, 0.0)

    Hp = Ho + 2 * pad
    Wp_pad = o_ref.shape[2]
    zdt = o_ref.dtype
    if pad > 0:                                   # zero only the 4 thin halo strips
        o_ref[:, 0:pad, :, :] = jnp.zeros((1, pad, Wp_pad, Cpad), zdt)
        o_ref[:, pad + Ho:Hp, :, :] = jnp.zeros((1, pad, Wp_pad, Cpad), zdt)
        o_ref[:, pad:pad + Ho, 0:pad, :] = jnp.zeros((1, Ho, pad, Cpad), zdt)
        o_ref[:, pad:pad + Ho, pad + Wo:pad + Wo + pad, :] = \
            jnp.zeros((1, Ho, pad, Cpad), zdt)
    o_ref[:, pad:pad + Ho, pad:pad + Wo, :] = (
        y.reshape(1, Ho, Wo, Cpad).astype(zdt))


def tfc_layer(xp, w3d, gamma_p, beta_p, *, k, Cpad, Ho, Wo):
    """One Conv+BN+ReLU block.

    xp : (N, Ho+2p, Wp_pad, Cpad) bf16 halo-padded, channel-padded activation.
    Returns the next layer's halo-padded activation, same layout, bf16.
    """
    N, Hp, Wp_pad, _ = xp.shape
    p = k // 2
    rows = Ho * Wo
    KK = k * k

    conv_kern = functools.partial(_conv_stats_kernel,
                                  Ho=Ho, Wo=Wo, K=k, Cpad=Cpad)
    y2d, stats_part = pl.pallas_call(
        conv_kern,
        out_shape=(jax.ShapeDtypeStruct((N * rows, Cpad), jnp.bfloat16),
                   jax.ShapeDtypeStruct((N, 2, Cpad), jnp.float32)),
        grid=(N,),
        in_specs=[pl.BlockSpec((1, Hp, Wp_pad, Cpad), lambda n: (n, 0, 0, 0)),
                  pl.BlockSpec((KK, Cpad, Cpad), lambda n: (0, 0, 0))],
        out_specs=(pl.BlockSpec((rows, Cpad), lambda n: (n, 0)),
                   pl.BlockSpec((1, 2, Cpad), lambda n: (n, 0, 0))),
        compiler_params=pltpu.CompilerParams(
            dimension_semantics=("parallel",),   # per-batch partial stats: no accum dep
            vmem_limit_bytes=_VMEM_LIMIT),
    )(xp, w3d)

    # Tiny cross-batch reduction of the per-batch stats partials (N, 2, Cpad).
    stats = jnp.sum(stats_part, axis=0)          # (2, Cpad) f32

    Hp_next = Ho + 2 * p
    Wp_next = Wo + 2 * p
    Wp_next_pad = ((Wp_next + 7) // 8) * 8       # sublane-align W

    bn_kern = functools.partial(_bn_relu_pad_kernel, Ho=Ho, Wo=Wo, Cpad=Cpad,
                                pad=p, count=float(N * rows))
    out = pl.pallas_call(
        bn_kern,
        out_shape=jax.ShapeDtypeStruct((N, Hp_next, Wp_next_pad, Cpad),
                                       jnp.bfloat16),
        grid=(N,),
        in_specs=[pl.BlockSpec((rows, Cpad), lambda n: (n, 0)),
                  pl.BlockSpec((2, Cpad), lambda n: (0, 0)),
                  pl.BlockSpec((1, Cpad), lambda n: (0, 0)),
                  pl.BlockSpec((1, Cpad), lambda n: (0, 0))],
        out_specs=pl.BlockSpec((1, Hp_next, Wp_next_pad, Cpad),
                               lambda n: (n, 0, 0, 0)),
        compiler_params=pltpu.CompilerParams(
            dimension_semantics=("parallel",),
            vmem_limit_bytes=_VMEM_LIMIT),
    )(y2d, stats, gamma_p, beta_p)
    return out


def tfc_forward(x_nchw, params, *, k):
    """Full TFC forward. x_nchw: (N, C, H, W); params: [(w_oihw, b, gamma, beta)]."""
    N, C, H, W = x_nchw.shape
    Cpad = ((C + 127) // 128) * 128
    p = k // 2

    # One-time relayout: NCHW -> NHWC, pad channels to lane width, pad halo,
    # pad W to a multiple of 8, cast to bf16 (all intermediates stay bf16).
    Wp_pad = ((W + 2 * p + 7) // 8) * 8
    x = jnp.transpose(x_nchw, (0, 2, 3, 1)).astype(jnp.float32)
    x = jnp.pad(x, ((0, 0), (p, p), (p, Wp_pad - W - p), (0, Cpad - C)))
    x = x.astype(jnp.bfloat16)

    Hc, Wc = H, W                                 # unpadded spatial dims entering layer
    for (w_oihw, _bias, g, be) in params:
        Ho = Hc + 2 * p - k + 1
        Wo = Wc + 2 * p - k + 1
        # Conv bias intentionally dropped: training-mode BN cancels it exactly.
        wk = jnp.transpose(w_oihw, (2, 3, 1, 0))  # OIHW -> (kh, kw, cin, cout)
        wk = jnp.pad(wk, ((0, 0), (0, 0), (0, Cpad - C), (0, Cpad - C)))
        w3d = wk.reshape(k * k, Cpad, Cpad).astype(jnp.bfloat16)
        g_p = jnp.pad(g, (0, Cpad - C)).reshape(1, Cpad)
        be_p = jnp.pad(be, (0, Cpad - C)).reshape(1, Cpad)
        x = tfc_layer(x, w3d, g_p, be_p, k=k, Cpad=Cpad, Ho=Ho, Wo=Wo)
        Hc, Wc = Ho, Wo

    # Crop the halo / channel / alignment padding and relayout back to NCHW.
    out = x[:, p:p + Hc, p:p + Wc, :C].astype(jnp.float32)
    return jnp.transpose(out, (0, 3, 1, 2))


def tfc_reference(x_nchw, params, *, k):
    """Pure-JAX f32 reference (matches PyTorch TFC in training mode, bias included)."""
    p = k // 2
    x = x_nchw
    for (w_oihw, b, g, be) in params:
        y = lax.conv_general_dilated(
            x, w_oihw, window_strides=(1, 1), padding=[(p, p), (p, p)],
            dimension_numbers=('NCHW', 'OIHW', 'NCHW'),
            precision=lax.Precision.HIGHEST)
        y = y + b[None, :, None, None]
        mean = jnp.mean(y, axis=(0, 2, 3), keepdims=True)
        var = jnp.mean((y - mean) ** 2, axis=(0, 2, 3), keepdims=True)
        y = (y - mean) * lax.rsqrt(var + _EPS) * g[None, :, None, None] \
            + be[None, :, None, None]
        x = jnp.maximum(y, 0.0)
    return x


def init_tfc_params(key, c, l, k):
    """Deterministic parameter init for l blocks of Conv2d(c->c,k) + BN(c)."""
    params = []
    for i in range(l):
        kw, kb, kg, kbe = jax.random.split(jax.random.fold_in(key, i), 4)
        fan_in = c * k * k
        bound = 1.0 / (fan_in ** 0.5)
        w = jax.random.uniform(kw, (c, c, k, k), jnp.float32, -bound, bound)
        b = jax.random.uniform(kb, (c,), jnp.float32, -bound, bound)
        gamma = 1.0 + 0.1 * jax.random.normal(kg, (c,), jnp.float32)
        beta = 0.1 * jax.random.normal(kbe, (c,), jnp.float32)
        params.append((w, b, gamma, beta))
    return params


if __name__ == "__main__":
    # Small shapes: TFC(c=4, l=2, k=3) applied to x of shape (N=2, C=4, H=16, W=16)
    N, C, H, W = 2, 4, 16, 16
    L, K = 2, 3

    key = jax.random.PRNGKey(0)
    kx, kp = jax.random.split(key)
    x = jax.random.normal(kx, (N, C, H, W), jnp.float32)
    params = init_tfc_params(kp, C, L, K)

    fwd = jax.jit(functools.partial(tfc_forward, k=K))
    out = jax.block_until_ready(fwd(x, params))

    ref = jax.block_until_ready(tfc_reference(x, params, k=K))
    assert out.shape == ref.shape == (N, C, H, W)
    # Tolerance reflects bf16 MXU operands / bf16 inter-layer intermediates
    # (per the perf review) vs the f32 HIGHEST-precision reference.
    assert jnp.allclose(out, ref, rtol=2e-2, atol=2e-2), \
        f"max abs err = {jnp.max(jnp.abs(out - ref))}"

    print("KERNEL_OK")
</pallas_src>

<mosaic_0001>
module attributes {stable_mosaic.version = 11 : i64} {
  func.func @_conv_stats_kernel(%arg0: i32, %arg1: memref<1x18x24x128xbf16, #tpu.memory_space<vmem>>, %arg2: memref<9x128x128xbf16, #tpu.memory_space<vmem>>, %arg3: memref<256x128xbf16, #tpu.memory_space<vmem>>, %arg4: memref<1x2x128xf32, #tpu.memory_space<vmem>>) attributes {dimension_semantics = [#tpu.dimension_semantics<parallel>], iteration_bounds = array<i64: 2>, scalar_prefetch = 0 : i64, scratch_operands = 0 : i64, tpu.core_type = #tpu.core_type<tc>, window_params = [{transform_indices = @transform_0, window_bounds = array<i64: 1, 18, 24, 128>}, {pipeline_mode = #tpu.pipeline_mode<synchronous>, transform_indices = @transform_1, window_bounds = array<i64: 9, 128, 128>}, {transform_indices = @transform_2, window_bounds = array<i64: 256, 128>}, {transform_indices = @transform_3, window_bounds = array<i64: 1, 2, 128>}]} {
    %c0 = arith.constant 0 : index
    %c0_0 = arith.constant 0 : index
    %c0_1 = arith.constant 0 : index
    %c0_2 = arith.constant 0 : index
    %0 = vector.load %arg1[%c0, %c0_0, %c0_1, %c0_2] : memref<1x18x24x128xbf16, #tpu.memory_space<vmem>>, vector<1x16x16x128xbf16>
    %1 = vector.shape_cast %0 : vector<1x16x16x128xbf16> to vector<256x128xbf16>
    %c0_3 = arith.constant 0 : index
    %c0_4 = arith.constant 0 : index
    %c0_5 = arith.constant 0 : index
    %2 = vector.load %arg2[%c0_3, %c0_4, %c0_5] : memref<9x128x128xbf16, #tpu.memory_space<vmem>>, vector<1x128x128xbf16>
    %3 = vector.shape_cast %2 : vector<1x128x128xbf16> to vector<128x128xbf16>
    %cst = arith.constant dense<0.000000e+00> : vector<256x128xf32>
    %4 = tpu.matmul %1, %3, %cst {dimension_numbers = #tpu.dot_dimension_numbers<[1], [0], [0], [1], [0, 0, 1, 1], [], []>} : vector<256x128xbf16>, vector<128x128xbf16>, vector<256x128xf32> -> vector<256x128xf32>
    %c0_6 = arith.constant 0 : index
    %c0_7 = arith.constant 0 : index
    %c1 = arith.constant 1 : index
    %c0_8 = arith.constant 0 : index
    %5 = vector.load %arg1[%c0_6, %c0_7, %c1, %c0_8] : memref<1x18x24x128xbf16, #tpu.memory_space<vmem>>, vector<1x16x16x128xbf16>
    %6 = vector.shape_cast %5 : vector<1x16x16x128xbf16> to vector<256x128xbf16>
    %c1_9 = arith.constant 1 : index
    %c0_10 = arith.constant 0 : index
    %c0_11 = arith.constant 0 : index
    %7 = vector.load %arg2[%c1_9, %c0_10, %c0_11] : memref<9x128x128xbf16, #tpu.memory_space<vmem>>, vector<1x128x128xbf16>
    %8 = vector.shape_cast %7 : vector<1x128x128xbf16> to vector<128x128xbf16>
    %cst_12 = arith.constant dense<0.000000e+00> : vector<256x128xf32>
    %9 = tpu.matmul %6, %8, %cst_12 {dimension_numbers = #tpu.dot_dimension_numbers<[1], [0], [0], [1], [0, 0, 1, 1], [], []>} : vector<256x128xbf16>, vector<128x128xbf16>, vector<256x128xf32> -> vector<256x128xf32>
    %10 = arith.addf %4, %9 : vector<256x128xf32>
    %c0_13 = arith.constant 0 : index
    %c0_14 = arith.constant 0 : index
    %c2 = arith.constant 2 : index
    %c0_15 = arith.constant 0 : index
    %11 = vector.load %arg1[%c0_13, %c0_14, %c2, %c0_15] : memref<1x18x24x128xbf16, #tpu.memory_space<vmem>>, vector<1x16x16x128xbf16>
    %12 = vector.shape_cast %11 : vector<1x16x16x128xbf16> to vector<256x128xbf16>
    %c2_16 = arith.constant 2 : index
    %c0_17 = arith.constant 0 : index
    %c0_18 = arith.constant 0 : index
    %13 = vector.load %arg2[%c2_16, %c0_17, %c0_18] : memref<9x128x128xbf16, #tpu.memory_space<vmem>>, vector<1x128x128xbf16>
    %14 = vector.shape_cast %13 : vector<1x128x128xbf16> to vector<128x128xbf16>
    %cst_19 = arith.constant dense<0.000000e+00> : vector<256x128xf32>
    %15 = tpu.matmul %12, %14, %cst_19 {dimension_numbers = #tpu.dot_dimension_numbers<[1], [0], [0], [1], [0, 0, 1, 1], [], []>} : vector<256x128xbf16>, vector<128x128xbf16>, vector<256x128xf32> -> vector<256x128xf32>
    %16 = arith.addf %10, %15 : vector<256x128xf32>
    %c0_20 = arith.constant 0 : index
    %c1_21 = arith.constant 1 : index
    %c0_22 = arith.constant 0 : index
    %c0_23 = arith.constant 0 : index
    %17 = vector.load %arg1[%c0_20, %c1_21, %c0_22, %c0_23] : memref<1x18x24x128xbf16, #tpu.memory_space<vmem>>, vector<1x16x16x128xbf16>
    %18 = vector.shape_cast %17 : vector<1x16x16x128xbf16> to vector<256x128xbf16>
    %c3 = arith.constant 3 : index
    %c0_24 = arith.constant 0 : index
    %c0_25 = arith.constant 0 : index
    %19 = vector.load %arg2[%c3, %c0_24, %c0_25] : memref<9x128x128xbf16, #tpu.memory_space<vmem>>, vector<1x128x128xbf16>
    %20 = vector.shape_cast %19 : vector<1x128x128xbf16> to vector<128x128xbf16>
    %cst_26 = arith.constant dense<0.000000e+00> : vector<256x128xf32>
    %21 = tpu.matmul %18, %20, %cst_26 {dimension_numbers = #tpu.dot_dimension_numbers<[1], [0], [0], [1], [0, 0, 1, 1], [], []>} : vector<256x128xbf16>, vector<128x128xbf16>, vector<256x128xf32> -> vector<256x128xf32>
    %22 = arith.addf %16, %21 : vector<256x128xf32>
    %c0_27 = arith.constant 0 : index
    %c1_28 = arith.constant 1 : index
    %c1_29 = arith.constant 1 : index
    %c0_30 = arith.constant 0 : index
    %23 = vector.load %arg1[%c0_27, %c1_28, %c1_29, %c0_30] : memref<1x18x24x128xbf16, #tpu.memory_space<vmem>>, vector<1x16x16x128xbf16>
    %24 = vector.shape_cast %23 : vector<1x16x16x128xbf16> to vector<256x128xbf16>
    %c4 = arith.constant 4 : index
    %c0_31 = arith.constant 0 : index
    %c0_32 = arith.constant 0 : index
    %25 = vector.load %arg2[%c4, %c0_31, %c0_32] : memref<9x128x128xbf16, #tpu.memory_space<vmem>>, vector<1x128x128xbf16>
    %26 = vector.shape_cast %25 : vector<1x128x128xbf16> to vector<128x128xbf16>
    %cst_33 = arith.constant dense<0.000000e+00> : vector<256x128xf32>
    %27 = tpu.matmul %24, %26, %cst_33 {dimension_numbers = #tpu.dot_dimension_numbers<[1], [0], [0], [1], [0, 0, 1, 1], [], []>} : vector<256x128xbf16>, vector<128x128xbf16>, vector<256x128xf32> -> vector<256x128xf32>
    %28 = arith.addf %22, %27 : vector<256x128xf32>
    %c0_34 = arith.constant 0 : index
    %c1_35 = arith.constant 1 : index
    %c2_36 = arith.constant 2 : index
    %c0_37 = arith.constant 0 : index
    %29 = vector.load %arg1[%c0_34, %c1_35, %c2_36, %c0_37] : memref<1x18x24x128xbf16, #tpu.memory_space<vmem>>, vector<1x16x16x128xbf16>
    %30 = vector.shape_cast %29 : vector<1x16x16x128xbf16> to vector<256x128xbf16>
    %c5 = arith.constant 5 : index
    %c0_38 = arith.constant 0 : index
    %c0_39 = arith.constant 0 : index
    %31 = vector.load %arg2[%c5, %c0_38, %c0_39] : memref<9x128x128xbf16, #tpu.memory_space<vmem>>, vector<1x128x128xbf16>
    %32 = vector.shape_cast %31 : vector<1x128x128xbf16> to vector<128x128xbf16>
    %cst_40 = arith.constant dense<0.000000e+00> : vector<256x128xf32>
    %33 = tpu.matmul %30, %32, %cst_40 {dimension_numbers = #tpu.dot_dimension_numbers<[1], [0], [0], [1], [0, 0, 1, 1], [], []>} : vector<256x128xbf16>, vector<128x128xbf16>, vector<256x128xf32> -> vector<256x128xf32>
    %34 = arith.addf %28, %33 : vector<256x128xf32>
    %c0_41 = arith.constant 0 : index
    %c2_42 = arith.constant 2 : index
    %c0_43 = arith.constant 0 : index
    %c0_44 = arith.constant 0 : index
    %35 = vector.load %arg1[%c0_41, %c2_42, %c0_43, %c0_44] : memref<1x18x24x128xbf16, #tpu.memory_space<vmem>>, vector<1x16x16x128xbf16>
    %36 = vector.shape_cast %35 : vector<1x16x16x128xbf16> to vector<256x128xbf16>
    %c6 = arith.constant 6 : index
    %c0_45 = arith.constant 0 : index
    %c0_46 = arith.constant 0 : index
    %37 = vector.load %arg2[%c6, %c0_45, %c0_46] : memref<9x128x128xbf16, #tpu.memory_space<vmem>>, vector<1x128x128xbf16>
    %38 = vector.shape_cast %37 : vector<1x128x128xbf16> to vector<128x128xbf16>
    %cst_47 = arith.constant dense<0.000000e+00> : vector<256x128xf32>
    %39 = tpu.matmul %36, %38, %cst_47 {dimension_numbers = #tpu.dot_dimension_numbers<[1], [0], [0], [1], [0, 0, 1, 1], [], []>} : vector<256x128xbf16>, vector<128x128xbf16>, vector<256x128xf32> -> vector<256x128xf32>
    %40 = arith.addf %34, %39 : vector<256x128xf32>
    %c0_48 = arith.constant 0 : index
    %c2_49 = arith.constant 2 : index
    %c1_50 = arith.constant 1 : index
    %c0_51 = arith.constant 0 : index
    %41 = vector.load %arg1[%c0_48, %c2_49, %c1_50, %c0_51] : memref<1x18x24x128xbf16, #tpu.memory_space<vmem>>, vector<1x16x16x128xbf16>
    %42 = vector.shape_cast %41 : vector<1x16x16x128xbf16> to vector<256x128xbf16>
    %c7 = arith.constant 7 : index
    %c0_52 = arith.constant 0 : index
    %c0_53 = arith.constant 0 : index
    %43 = vector.load %arg2[%c7, %c0_52, %c0_53] : memref<9x128x128xbf16, #tpu.memory_space<vmem>>, vector<1x128x128xbf16>
    %44 = vector.shape_cast %43 : vector<1x128x128xbf16> to vector<128x128xbf16>
    %cst_54 = arith.constant dense<0.000000e+00> : vector<256x128xf32>
    %45 = tpu.matmul %42, %44, %cst_54 {dimension_numbers = #tpu.dot_dimension_numbers<[1], [0], [0], [1], [0, 0, 1, 1], [], []>} : vector<256x128xbf16>, vector<128x128xbf16>, vector<256x128xf32> -> vector<256x128xf32>
    %46 = arith.addf %40, %45 : vector<256x128xf32>
    %c0_55 = arith.constant 0 : index
    %c2_56 = arith.constant 2 : index
    %c2_57 = arith.constant 2 : index
    %c0_58 = arith.constant 0 : index
    %47 = vector.load %arg1[%c0_55, %c2_56, %c2_57, %c0_58] : memref<1x18x24x128xbf16, #tpu.memory_space<vmem>>, vector<1x16x16x128xbf16>
    %48 = vector.shape_cast %47 : vector<1x16x16x128xbf16> to vector<256x128xbf16>
    %c8 = arith.constant 8 : index
    %c0_59 = arith.constant 0 : index
    %c0_60 = arith.constant 0 : index
    %49 = vector.load %arg2[%c8, %c0_59, %c0_60] : memref<9x128x128xbf16, #tpu.memory_space<vmem>>, vector<1x128x128xbf16>
    %50 = vector.shape_cast %49 : vector<1x128x128xbf16> to vector<128x128xbf16>
    %cst_61 = arith.constant dense<0.000000e+00> : vector<256x128xf32>
    %51 = tpu.matmul %48, %50, %cst_61 {dimension_numbers = #tpu.dot_dimension_numbers<[1], [0], [0], [1], [0, 0, 1, 1], [], []>} : vector<256x128xbf16>, vector<128x128xbf16>, vector<256x128xf32> -> vector<256x128xf32>
    %52 = arith.addf %46, %51 : vector<256x128xf32>
    %53 = arith.truncf %52 : vector<256x128xf32> to vector<256x128xbf16>
    %c0_62 = arith.constant 0 : index
    %c0_63 = arith.constant 0 : index
    %54 = vector.load %arg3[%c0_62, %c0_63] : memref<256x128xbf16, #tpu.memory_space<vmem>>, vector<256x128xbf16>
    tpu.vector_store %arg3[%c0_62, %c0_63], %53 {strides = array<i32>} : memref<256x128xbf16, #tpu.memory_space<vmem>>, vector<256x128xbf16>,
    %cst_64 = arith.constant dense<0.000000e+00> : vector<128xf32>
    %55 = vector.multi_reduction <add>, %52, %cst_64 [0] : vector<256x128xf32> to vector<128xf32>
    %56 = vector.shape_cast %55 : vector<128xf32> to vector<1x128xf32>
    %57 = vector.shape_cast %56 : vector<1x128xf32> to vector<1x1x128xf32>
    %c0_65 = arith.constant 0 : index
    %c0_66 = arith.constant 0 : index
    %c0_67 = arith.constant 0 : index
    %58 = vector.load %arg4[%c0_65, %c0_66, %c0_67] : memref<1x2x128xf32, #tpu.memory_space<vmem>>, vector<1x1x128xf32>
    tpu.vector_store %arg4[%c0_65, %c0_66, %c0_67], %57 {strides = array<i32>} : memref<1x2x128xf32, #tpu.memory_space<vmem>>, vector<1x1x128xf32>,
    %59 = arith.mulf %52, %52 : vector<256x128xf32>
    %cst_68 = arith.constant dense<0.000000e+00> : vector<128xf32>
    %60 = vector.multi_reduction <add>, %59, %cst_68 [0] : vector<256x128xf32> to vector<128xf32>
    %61 = vector.shape_cast %60 : vector<128xf32> to vector<1x128xf32>
    %62 = vector.shape_cast %61 : vector<1x128xf32> to vector<1x1x128xf32>
    %c0_69 = arith.constant 0 : index
    %c1_70 = arith.constant 1 : index
    %c0_71 = arith.constant 0 : index
    %63 = vector.load %arg4[%c0_69, %c1_70, %c0_71] : memref<1x2x128xf32, #tpu.memory_space<vmem>>, vector<1x1x128xf32>
    tpu.vector_store %arg4[%c0_69, %c1_70, %c0_71], %62 {strides = array<i32>} : memref<1x2x128xf32, #tpu.memory_space<vmem>>, vector<1x1x128xf32>,
    return
  }
  func.func @transform_0(%arg0: i32) -> (i32, i32, i32, i32) {
    %c0_i32 = arith.constant 0 : i32
    %c0_i32_0 = arith.constant 0 : i32
    %c0_i32_1 = arith.constant 0 : i32
    %c0_i32_2 = arith.constant 0 : i32
    return %arg0, %c0_i32, %c0_i32_0, %c0_i32_1 : i32, i32, i32, i32
  }
  func.func @transform_1(%arg0: i32) -> (i32, i32, i32) {
    %c0_i32 = arith.constant 0 : i32
    %c0_i32_0 = arith.constant 0 : i32
    %c0_i32_1 = arith.constant 0 : i32
    %c0_i32_2 = arith.constant 0 : i32
    return %c0_i32, %c0_i32_0, %c0_i32_1 : i32, i32, i32
  }
  func.func @transform_2(%arg0: i32) -> (i32, i32) {
    %c0_i32 = arith.constant 0 : i32
    %c0_i32_0 = arith.constant 0 : i32
    return %arg0, %c0_i32 : i32, i32
  }
  func.func @transform_3(%arg0: i32) -> (i32, i32, i32) {
    %c0_i32 = arith.constant 0 : i32
    %c0_i32_0 = arith.constant 0 : i32
    %c0_i32_1 = arith.constant 0 : i32
    return %arg0, %c0_i32, %c0_i32_0 : i32, i32, i32
  }
}

module attributes {stable_mosaic.version = 11 : i64} {
  func.func @_bn_relu_pad_kernel(%arg0: i32, %arg1: memref<256x128xbf16, #tpu.memory_space<vmem>>, %arg2: memref<2x128xf32, #tpu.memory_space<vmem>>, %arg3: memref<1x128xf32, #tpu.memory_space<vmem>>, %arg4: memref<1x128xf32, #tpu.memory_space<vmem>>, %arg5: memref<1x18x24x128xbf16, #tpu.memory_space<vmem>>) attributes {dimension_semantics = [#tpu.dimension_semantics<parallel>], iteration_bounds = array<i64: 2>, scalar_prefetch = 0 : i64, scratch_operands = 0 : i64, tpu.core_type = #tpu.core_type<tc>, window_params = [{transform_indices = @transform_0, window_bounds = array<i64: 256, 128>}, {pipeline_mode = #tpu.pipeline_mode<synchronous>, transform_indices = @transform_1, window_bounds = array<i64: 2, 128>}, {pipeline_mode = #tpu.pipeline_mode<synchronous>, transform_indices = @transform_2, window_bounds = array<i64: 1, 128>}, {pipeline_mode = #tpu.pipeline_mode<synchronous>, transform_indices = @transform_3, window_bounds = array<i64: 1, 128>}, {transform_indices = @transform_4, window_bounds = array<i64: 1, 18, 24, 128>}]} {
    %c0 = arith.constant 0 : index
    %c0_0 = arith.constant 0 : index
    %0 = vector.load %arg2[%c0, %c0_0] : memref<2x128xf32, #tpu.memory_space<vmem>>, vector<1x128xf32>
    %cst = arith.constant 0.001953125 : f32
    %1 = vector.broadcast %cst : f32 to vector<1x128xf32>
    %2 = arith.mulf %0, %1 : vector<1x128xf32>
    %c1 = arith.constant 1 : index
    %c0_1 = arith.constant 0 : index
    %3 = vector.load %arg2[%c1, %c0_1] : memref<2x128xf32, #tpu.memory_space<vmem>>, vector<1x128xf32>
    %cst_2 = arith.constant 0.001953125 : f32
    %4 = vector.broadcast %cst_2 : f32 to vector<1x128xf32>
    %5 = arith.mulf %3, %4 : vector<1x128xf32>
    %6 = arith.mulf %2, %2 : vector<1x128xf32>
    %7 = arith.subf %5, %6 : vector<1x128xf32>
    %cst_3 = arith.constant 0.000000e+00 : f32
    %8 = vector.broadcast %cst_3 : f32 to vector<1x128xf32>
    %9 = arith.maximumf %7, %8 : vector<1x128xf32>
    %c0_4 = arith.constant 0 : index
    %c0_5 = arith.constant 0 : index
    %10 = vector.load %arg3[%c0_4, %c0_5] : memref<1x128xf32, #tpu.memory_space<vmem>>, vector<1x128xf32>
    %cst_6 = arith.constant 9.99999974E-6 : f32
    %11 = vector.broadcast %cst_6 : f32 to vector<1x128xf32>
    %12 = arith.addf %9, %11 : vector<1x128xf32>
    %13 = math.rsqrt %12 : vector<1x128xf32>
    %14 = arith.mulf %10, %13 : vector<1x128xf32>
    %c0_7 = arith.constant 0 : index
    %c0_8 = arith.constant 0 : index
    %15 = vector.load %arg4[%c0_7, %c0_8] : memref<1x128xf32, #tpu.memory_space<vmem>>, vector<1x128xf32>
    %16 = arith.mulf %2, %14 : vector<1x128xf32>
    %17 = arith.subf %15, %16 : vector<1x128xf32>
    %c0_9 = arith.constant 0 : index
    %c0_10 = arith.constant 0 : index
    %18 = vector.load %arg1[%c0_9, %c0_10] : memref<256x128xbf16, #tpu.memory_space<vmem>>, vector<256x128xbf16>
    %19 = arith.extf %18 : vector<256x128xbf16> to vector<256x128xf32>
    %20 = vector.broadcast %14 : vector<1x128xf32> to vector<256x128xf32>
    %21 = arith.mulf %19, %20 : vector<256x128xf32>
    %22 = vector.broadcast %17 : vector<1x128xf32> to vector<256x128xf32>
    %23 = arith.addf %21, %22 : vector<256x128xf32>
    %cst_11 = arith.constant 0.000000e+00 : f32
    %24 = vector.broadcast %cst_11 : f32 to vector<256x128xf32>
    %25 = arith.maximumf %23, %24 : vector<256x128xf32>
    %cst_12 = arith.constant 0.000000e+00 : bf16
    %26 = vector.broadcast %cst_12 : bf16 to vector<1x1x24x128xbf16>
    %c0_13 = arith.constant 0 : index
    %c0_14 = arith.constant 0 : index
    %c0_15 = arith.constant 0 : index
    %c0_16 = arith.constant 0 : index
    %27 = vector.load %arg5[%c0_13, %c0_14, %c0_15, %c0_16] : memref<1x18x24x128xbf16, #tpu.memory_space<vmem>>, vector<1x1x24x128xbf16>
    tpu.vector_store %arg5[%c0_13, %c0_14, %c0_15, %c0_16], %26 {strides = array<i32>} : memref<1x18x24x128xbf16, #tpu.memory_space<vmem>>, vector<1x1x24x128xbf16>,
    %cst_17 = arith.constant 0.000000e+00 : bf16
    %28 = vector.broadcast %cst_17 : bf16 to vector<1x1x24x128xbf16>
    %c0_18 = arith.constant 0 : index
    %c17 = arith.constant 17 : index
    %c0_19 = arith.constant 0 : index
    %c0_20 = arith.constant 0 : index
    %29 = vector.load %arg5[%c0_18, %c17, %c0_19, %c0_20] : memref<1x18x24x128xbf16, #tpu.memory_space<vmem>>, vector<1x1x24x128xbf16>
    tpu.vector_store %arg5[%c0_18, %c17, %c0_19, %c0_20], %28 {strides = array<i32>} : memref<1x18x24x128xbf16, #tpu.memory_space<vmem>>, vector<1x1x24x128xbf16>,
    %cst_21 = arith.constant 0.000000e+00 : bf16
    %30 = vector.broadcast %cst_21 : bf16 to vector<1x16x1x128xbf16>
    %c0_22 = arith.constant 0 : index
    %c1_23 = arith.constant 1 : index
    %c0_24 = arith.constant 0 : index
    %c0_25 = arith.constant 0 : index
    %31 = vector.load %arg5[%c0_22, %c1_23, %c0_24, %c0_25] : memref<1x18x24x128xbf16, #tpu.memory_space<vmem>>, vector<1x16x1x128xbf16>
    tpu.vector_store %arg5[%c0_22, %c1_23, %c0_24, %c0_25], %30 {strides = array<i32>} : memref<1x18x24x128xbf16, #tpu.memory_space<vmem>>, vector<1x16x1x128xbf16>,
    %cst_26 = arith.constant 0.000000e+00 : bf16
    %32 = vector.broadcast %cst_26 : bf16 to vector<1x16x1x128xbf16>
    %c0_27 = arith.constant 0 : index
    %c1_28 = arith.constant 1 : index
    %c17_29 = arith.constant 17 : index
    %c0_30 = arith.constant 0 : index
    %33 = vector.load %arg5[%c0_27, %c1_28, %c17_29, %c0_30] : memref<1x18x24x128xbf16, #tpu.memory_space<vmem>>, vector<1x16x1x128xbf16>
    tpu.vector_store %arg5[%c0_27, %c1_28, %c17_29, %c0_30], %32 {strides = array<i32>} : memref<1x18x24x128xbf16, #tpu.memory_space<vmem>>, vector<1x16x1x128xbf16>,
    %34 = vector.shape_cast %25 : vector<256x128xf32> to vector<1x16x16x128xf32>
    %35 = arith.truncf %34 : vector<1x16x16x128xf32> to vector<1x16x16x128xbf16>
    %c0_31 = arith.constant 0 : index
    %c1_32 = arith.constant 1 : index
    %c1_33 = arith.constant 1 : index
    %c0_34 = arith.constant 0 : index
    %36 = vector.load %arg5[%c0_31, %c1_32, %c1_33, %c0_34] : memref<1x18x24x128xbf16, #tpu.memory_space<vmem>>, vector<1x16x16x128xbf16>
    tpu.vector_store %arg5[%c0_31, %c1_32, %c1_33, %c0_34], %35 {strides = array<i32>} : memref<1x18x24x128xbf16, #tpu.memory_space<vmem>>, vector<1x16x16x128xbf16>,
    return
  }
  func.func @transform_0(%arg0: i32) -> (i32, i32) {
    %c0_i32 = arith.constant 0 : i32
    %c0_i32_0 = arith.constant 0 : i32
    return %arg0, %c0_i32 : i32, i32
  }
  func.func @transform_1(%arg0: i32) -> (i32, i32) {
    %c0_i32 = arith.constant 0 : i32
    %c0_i32_0 = arith.constant 0 : i32
    %c0_i32_1 = arith.constant 0 : i32
    return %c0_i32, %c0_i32_0 : i32, i32
  }
  func.func @transform_2(%arg0: i32) -> (i32, i32) {
    %c0_i32 = arith.constant 0 : i32
    %c0_i32_0 = arith.constant 0 : i32
    %c0_i32_1 = arith.constant 0 : i32
    return %c0_i32, %c0_i32_0 : i32, i32
  }
  func.func @transform_3(%arg0: i32) -> (i32, i32) {
    %c0_i32 = arith.constant 0 : i32
    %c0_i32_0 = arith.constant 0 : i32
    %c0_i32_1 = arith.constant 0 : i32
    return %c0_i32, %c0_i32_0 : i32, i32
  }
  func.func @transform_4(%arg0: i32) -> (i32, i32, i32, i32) {
    %c0_i32 = arith.constant 0 : i32
    %c0_i32_0 = arith.constant 0 : i32
    %c0_i32_1 = arith.constant 0 : i32
    %c0_i32_2 = arith.constant 0 : i32
    return %arg0, %c0_i32, %c0_i32_0, %c0_i32_1 : i32, i32, i32, i32
  }
}

</mosaic_0001>

<bundles_post_ra>
// kernel: tfc_forward.5
= control target key start
LH: loop header
LB: loop body
LE: loop exit
PB: predicated region body
PF: predicated region fallthrough
CT: control target
= control target key end

     0   :  { %s1429_s15 = smov 0   ;;  %s2010_s0 = inlined_call_operand.vmem [shape: bf16[512,128], index: 0, kind: input, shape index: {}]   ;;  %s2011_s1 = inlined_call_operand.vmem [shape: f32[2,128], index: 1, kind: input, shape index: {}]   ;;  %s2012_s2 = inlined_call_operand.vmem [shape: f32[1,128], index: 2, kind: input, shape index: {}]   ;;  %s2013_s3 = inlined_call_operand.vmem [shape: f32[1,128], index: 3, kind: input, shape index: {}]   ;;  %s2014_s4 = inlined_call_operand.vmem [shape: bf16[2,18,24,128], index: 4, kind: output, shape index: {}]  }
   0x1 LB: > { %s1083_s16 = sadd.s32 4294967295, %s1401_s15   ;;  %p1087_p0 = scmp.ge.s32.totalorder %s1401_s15, 1  ;;  %s1401_s15 = sphi %s1429_s15, %s14_s15  }
   0x2   : > { %p163_p1 = scmp.lt.s32.totalorder %s1401_s15, 3 }
   0x4   : > { %p164_p2 = pnand %p1087_p0, %p163_p1 }
   0x5   : > { %p195_p3 = scmp.lt.s32.totalorder (!%p164_p2), %s1083_s16, 1  ;;  %vm395_vm0 = vcmask (!%p164_p2), 1040384   ;;  %s1088_s17 = sshll.u32 (!%p164_p2), %s1083_s16, 5  ;;  %v201_v0 = vld [vmem:[%s2011_s1] sm:$0x1] (!%p164_p2)  ;;  %v1403_v10 = vmov (!%p164_p2), 0  }
   0x6   : > { %167 = sbr.rel (%p164_p2) target bundleno = 155 (0x9b), region = 36  ;;  %vm396_vm1 = vsmask.f32 (!%p164_p2), 256  ;;  %v1440_v1 = vmul.f32 (!%p164_p2), 0.001953125, %v201_v0  ;;  %v203_v2 = vld [vmem:[%s2011_s1 + $0x1] sm:$0x1] (!%p164_p2) }
   0x7   : > { %p190_p4 = scmp.lt.s32.totalorder (!%p164_p2), %s1088_s17, 63  ;;  %v204_v3 = vmul.f32 (!%p164_p2), 0.001953125, %v203_v2  ;;  %vm1449_vm2 = vmand (!%p164_p2), %vm395_vm0, %vm396_vm1  ;;  %vm446_vm3 = vsmask.f32 (!%p164_p2), 7938  ;;  %vm914_vm5 = vcmask (!%p164_p2), 1043456  }
   0x8   : > { %v205_v4 = vmul.f32 (!%p164_p2), %v1440_v1, %v1440_v1  ;;  %vm1519_vm4 = vmand (!%p164_p2), %vm395_vm0, %vm446_vm3  ;;  %vm592_vm6 = vsmask.f32 (!%p164_p2), 4368 }
   0x9   : > { %vm1733_vm7 = vmand (!%p164_p2), %vm914_vm5, %vm446_vm3 }
   0xa   : > { %v206_v6 = vsub.f32 (!%p164_p2), %v204_v3, %v205_v4  ;;  %vm1740_vm8 = vmor (!%p164_p2), %vm396_vm1, %vm592_vm6 }
   0xc   : > { %v1484_v18 = vmax.f32 (!%p164_p2), %v206_v6, 0.0 }
   0xd   : > { %s2026_s16 = smov (!%p195_p3, %s1083_s16), 1  ;;  %s2028_s17 = smov (!%p190_p4, %s1088_s17), 63 }
   0xe   : > { %s1383_s22 = smul.u32 216, %s2026_s16  ;;  %s1089_s26 = sshll.u32 %s2028_s17, 2 }
   0xf   : > { %s1609_s29 = scalar_lea.vmem %s2010_s0, %s1089_s26 }
  0x10   : > { %s1458_s25 = scalar_lea.vmem %s2014_s4, %s1383_s22 }
  0x11   : > { %v1094_v7 = vld [vmem:[%s1458_s25 + $0xc] sm:$0x1]  ;;  %v1096_v8 = vld [vmem:[%s1458_s25 + $0x18] sm:$0x1]  ;;  %v1098_v9 = vld [vmem:[%s1458_s25 + $0x24] sm:$0x1] }
  0x12   : > { %387 = vst [vmem:[%s1458_s25] sm:$0xf] %v1403_v10  ;;  %388 = vst [vmem:[%s1458_s25 + $0x4] sm:$0xf] %v1403_v10  ;;  %v399_v11 = vsel %vm1449_vm2, 0, %v1094_v7  ;;  %v402_v12 = vsel %vm1449_vm2, 0, %v1096_v8  ;;  %v405_v13 = vsel %vm1449_vm2, 0, %v1098_v9 }
  0x13   : > { %389 = vst [vmem:[%s1458_s25 + $0x8] sm:$0xf] %v1403_v10  ;;  %1091 = vst [vmem:[%s1458_s25 + $0xcc] sm:$0xf] %v1403_v10  ;;  %v1100_v14 = vld [vmem:[%s1458_s25 + $0x30] sm:$0x1] }
  0x14   : > { %1092 = vst [vmem:[%s1458_s25 + $0xd0] sm:$0xf] %v1403_v10  ;;  %1093 = vst [vmem:[%s1458_s25 + $0xd4] sm:$0xf] %v1403_v10  ;;  %v408_v15 = vsel %vm1449_vm2, 0, %v1100_v14 }
  0x15   : > { %1095 = vst [vmem:[%s1458_s25 + $0xc] sm:$0x1] %v399_v11  ;;  %1097 = vst [vmem:[%s1458_s25 + $0x18] sm:$0x1] %v402_v12  ;;  %v1102_v16 = vld [vmem:[%s1458_s25 + $0x3c] sm:$0x1] }
  0x16   : > { %1099 = vst [vmem:[%s1458_s25 + $0x24] sm:$0x1] %v405_v13  ;;  %v1104_v17 = vld [vmem:[%s1458_s25 + $0x48] sm:$0x1]  ;;  %1101 = vst [vmem:[%s1458_s25 + $0x30] sm:$0x1] %v408_v15  ;;  %v280_v13 = vlaneseq }
  0x17   : > { %v411_v19 = vsel %vm1449_vm2, 0, %v1102_v16  ;;  %v414_v20 = vsel %vm1449_vm2, 0, %v1104_v17  ;;  %v1106_v21 = vld [vmem:[%s1458_s25 + $0x54] sm:$0x1]  ;;  %v1108_v22 = vld [vmem:[%s1458_s25 + $0x60] sm:$0x1] }
  0x18   : > { %1103 = vst [vmem:[%s1458_s25 + $0x3c] sm:$0x1] %v411_v19  ;;  %1105 = vst [vmem:[%s1458_s25 + $0x48] sm:$0x1] %v414_v20  ;;  %v417_v23 = vsel %vm1449_vm2, 0, %v1106_v21  ;;  %v420_v24 = vsel %vm1449_vm2, 0, %v1108_v22 }
  0x19   : > { %v1110_v25 = vld [vmem:[%s1458_s25 + $0x6c] sm:$0x1]  ;;  %v1112_v26 = vld [vmem:[%s1458_s25 + $0x78] sm:$0x1]  ;;  %1107 = vst [vmem:[%s1458_s25 + $0x54] sm:$0x1] %v417_v23 }
  0x1a   : > { %1109 = vst [vmem:[%s1458_s25 + $0x60] sm:$0x1] %v420_v24  ;;  %v423_v27 = vsel %vm1449_vm2, 0, %v1110_v25  ;;  %v426_v28 = vsel %vm1449_vm2, 0, %v1112_v26  ;;  %v1114_v29 = vld [vmem:[%s1458_s25 + $0x84] sm:$0x1] }
  0x1b   : > { %v1116_v30 = vld [vmem:[%s1458_s25 + $0x90] sm:$0x1]  ;;  %1111 = vst [vmem:[%s1458_s25 + $0x6c] sm:$0x1] %v423_v27  ;;  %1113 = vst [vmem:[%s1458_s25 + $0x78] sm:$0x1] %v426_v28 }
  0x1c   : > { %v429_v31 = vsel %vm1449_vm2, 0, %v1114_v29  ;;  %v432_v32 = vsel %vm1449_vm2, 0, %v1116_v30  ;;  %v1118_v33 = vld [vmem:[%s1458_s25 + $0x9c] sm:$0x1]  ;;  %v1120_v34 = vld [vmem:[%s1458_s25 + $0xa8] sm:$0x1] }
  0x1d   : > { %1115 = vst [vmem:[%s1458_s25 + $0x84] sm:$0x1] %v429_v31  ;;  %1117 = vst [vmem:[%s1458_s25 + $0x90] sm:$0x1] %v432_v32  ;;  %v435_v36 = vsel %vm1449_vm2, 0, %v1118_v33  ;;  %v438_v37 = vsel %vm1449_vm2, 0, %v1120_v34 }
  0x1e   : > { %v1122_v38 = vld [vmem:[%s1458_s25 + $0xb4] sm:$0x1]  ;;  %v1124_v39 = vld [vmem:[%s1458_s25 + $0xc0] sm:$0x1]  ;;  %1119 = vst [vmem:[%s1458_s25 + $0x9c] sm:$0x1] %v435_v36 }
  0x1f   : > { %1121 = vst [vmem:[%s1458_s25 + $0xa8] sm:$0x1] %v438_v37  ;;  %v441_v40 = vsel %vm1449_vm2, 0, %v1122_v38  ;;  %v444_v41 = vsel %vm1449_vm2, 0, %v1124_v39  ;;  %v1126_v42 = vld [vmem:[%s1458_s25 + $0x14] sm:$0x1] }
  0x20   : > { %v1128_v43 = vld [vmem:[%s1458_s25 + $0x20] sm:$0x1]  ;;  %1123 = vst [vmem:[%s1458_s25 + $0xb4] sm:$0x1] %v441_v40  ;;  %1125 = vst [vmem:[%s1458_s25 + $0xc0] sm:$0x1] %v444_v41 }
  0x21   : > { %v449_v44 = vsel %vm1519_vm4, 0, %v1126_v42  ;;  %v452_v45 = vsel %vm1519_vm4, 0, %v1128_v43  ;;  %v1130_v46 = vld [vmem:[%s1458_s25 + $0x2c] sm:$0x1]  ;;  %v1132_v47 = vld [vmem:[%s1458_s25 + $0x38] sm:$0x1] }
  0x22   : > { %1127 = vst [vmem:[%s1458_s25 + $0x14] sm:$0x1] %v449_v44  ;;  %1129 = vst [vmem:[%s1458_s25 + $0x20] sm:$0x1] %v452_v45  ;;  %v455_v48 = vsel %vm1519_vm4, 0, %v1130_v46  ;;  %v458_v49 = vsel %vm1519_vm4, 0, %v1132_v47 }
  0x23   : > { %v1134_v50 = vld [vmem:[%s1458_s25 + $0x44] sm:$0x1]  ;;  %v1136_v51 = vld [vmem:[%s1458_s25 + $0x50] sm:$0x1]  ;;  %1131 = vst [vmem:[%s1458_s25 + $0x2c] sm:$0x1] %v455_v48 }
  0x24   : > { %1133 = vst [vmem:[%s1458_s25 + $0x38] sm:$0x1] %v458_v49  ;;  %v461_v52 = vsel %vm1519_vm4, 0, %v1134_v50  ;;  %v464_v53 = vsel %vm1519_vm4, 0, %v1136_v51  ;;  %v1138_v54 = vld [vmem:[%s1458_s25 + $0x5c] sm:$0x1] }
  0x25   : > { %v1140_v55 = vld [vmem:[%s1458_s25 + $0x68] sm:$0x1]  ;;  %1135 = vst [vmem:[%s1458_s25 + $0x44] sm:$0x1] %v461_v52  ;;  %1137 = vst [vmem:[%s1458_s25 + $0x50] sm:$0x1] %v464_v53 }
  0x26   : > { %v467_v56 = vsel %vm1519_vm4, 0, %v1138_v54  ;;  %v470_v57 = vsel %vm1519_vm4, 0, %v1140_v55  ;;  %v1142_v58 = vld [vmem:[%s1458_s25 + $0x74] sm:$0x1]  ;;  %v1144_v59 = vld [vmem:[%s1458_s25 + $0x80] sm:$0x1] }
  0x27   : > { %1139 = vst [vmem:[%s1458_s25 + $0x5c] sm:$0x1] %v467_v56  ;;  %1141 = vst [vmem:[%s1458_s25 + $0x68] sm:$0x1] %v470_v57  ;;  %v473_v60 = vsel %vm1519_vm4, 0, %v1142_v58  ;;  %v476_v61 = vsel %vm1519_vm4, 0, %v1144_v59 }
  0x28   : > { %v1146_v62 = vld [vmem:[%s1458_s25 + $0x8c] sm:$0x1]  ;;  %v1148_v63 = vld [vmem:[%s1458_s25 + $0x98] sm:$0x1]  ;;  %1143 = vst [vmem:[%s1458_s25 + $0x74] sm:$0x1] %v473_v60 }
  0x29   : > { %1145 = vst [vmem:[%s1458_s25 + $0x80] sm:$0x1] %v476_v61  ;;  %v479_v0 = vsel %vm1519_vm4, 0, %v1146_v62  ;;  %v482_v2 = vsel %vm1519_vm4, 0, %v1148_v63  ;;  %v1150_v3 = vld [vmem:[%s1458_s25 + $0xa4] sm:$0x1] }
  0x2a   : > { %v1152_v4 = vld [vmem:[%s1458_s25 + $0xb0] sm:$0x1]  ;;  %1147 = vst [vmem:[%s1458_s25 + $0x8c] sm:$0x1] %v479_v0  ;;  %1149 = vst [vmem:[%s1458_s25 + $0x98] sm:$0x1] %v482_v2 }
  0x2b   : > { %v485_v6 = vsel %vm1519_vm4, 0, %v1150_v3  ;;  %v488_v7 = vsel %vm1519_vm4, 0, %v1152_v4  ;;  %v1154_v8 = vld [vmem:[%s1458_s25 + $0xbc] sm:$0x1]  ;;  %v1156_v9 = vld [vmem:[%s1458_s25 + $0xc8] sm:$0x1] }
  0x2c   : > { %1151 = vst [vmem:[%s1458_s25 + $0xa4] sm:$0x1] %v485_v6  ;;  %1153 = vst [vmem:[%s1458_s25 + $0xb0] sm:$0x1] %v488_v7  ;;  %v491_v10 = vsel %vm1519_vm4, 0, %v1154_v8  ;;  %v494_v11 = vsel %vm1519_vm4, 0, %v1156_v9 }
  0x2d   : > { %v209_v12 = vadd.f32 1e-05, %v1484_v18  ;;  %1155 = vst [vmem:[%s1458_s25 + $0xbc] sm:$0x1] %v491_v10  ;;  %1157 = vst [vmem:[%s1458_s25 + $0xc8] sm:$0x1] %v494_v11 }
  0x2e   : > { %v1611_v14 = vshrl.u32 %v280_v13, 7  ;;  %v1305_v15 = vld [vmem:[%s1609_s29] sm:$0xff]   ;;  %v1368_v16 = vld [vmem:[%s1609_s29 + $0x8] sm:$0xff]   ;;  %v1369_v17 = vld [vmem:[%s1609_s29 + $0x10] sm:$0xff]  }
  0x2f   : > { %1393 = vrsqrt.f32 %v209_v12  ;;  %v1617_v18 = vld [vmem:[%s1609_s29 + $0x18] sm:$0xff]   ;;  %v1620_v19 = vld [vmem:[%s1609_s29 + $0x20] sm:$0xff]   ;;  %v1623_v20 = vld [vmem:[%s1609_s29 + $0x28] sm:$0xff]   ;;  %v1306_v21 = vunpack.c.l.bf16 %v1305_v15  ;;  %v1307_v23 = vunpack.c.h.bf16 %v1305_v15  ;;  %v1310_v24 = vunpack.c.l.bf16 %v1368_v16 }
  0x30   : > { %v282_v22 = vsub.s32 0, %v1611_v14  ;;  %v1627_v25 = vld [vmem:[%s1609_s29 + $0x30] sm:$0xff]   ;;  %v1630_v26 = vld [vmem:[%s1609_s29 + $0x38] sm:$0xff]   ;;  %v1311_v27 = vunpack.c.h.bf16 %v1368_v16  ;;  %v1314_v28 = vunpack.c.l.bf16 %v1369_v17  ;;  %v1315_v29 = vunpack.c.h.bf16 %v1369_v17  ;;  %v1634_v31 = vld [vmem:[%s1609_s29 + $0x40] sm:$0xff]  }
  0x31   : > { %v1318_v30 = vunpack.c.l.bf16 %v1617_v18  ;;  %v1637_v32 = vld [vmem:[%s1609_s29 + $0x48] sm:$0xff]   ;;  %v208_v33 = vld [vmem:[%s2012_s2] sm:$0x1]  ;;  %v1319_v34 = vunpack.c.h.bf16 %v1617_v18  ;;  %v1322_v35 = vunpack.c.l.bf16 %v1620_v19  ;;  %v1323_v36 = vunpack.c.h.bf16 %v1620_v19  ;;  %v1647_v38 = vld [vmem:[%s1609_s29 + $0x50] sm:$0xff]  }
  0x32   : > { %v1326_v37 = vunpack.c.l.bf16 %v1623_v20  ;;  %v1327_v39 = vunpack.c.h.bf16 %v1623_v20  ;;  %v1330_v40 = vunpack.c.l.bf16 %v1627_v25  ;;  %v1331_v41 = vunpack.c.h.bf16 %v1627_v25  ;;  %v1654_v43 = vld [vmem:[%s1609_s29 + $0x58] sm:$0xff]   ;;  %v1661_v49 = vld [vmem:[%s1609_s29 + $0x60] sm:$0xff]   ;;  %v1667_v54 = vld [vmem:[%s1609_s29 + $0x68] sm:$0xff]  }
  0x33   : > { %v1334_v42 = vunpack.c.l.bf16 %v1630_v26  ;;  %v1335_v45 = vunpack.c.h.bf16 %v1630_v26  ;;  %v1338_v46 = vunpack.c.l.bf16 %v1634_v31  ;;  %v1339_v47 = vunpack.c.h.bf16 %v1634_v31  ;;  %v212_v55 = vld [vmem:[%s2013_s3] sm:$0x1]  ;;  %v1677_v60 = vld [vmem:[%s1609_s29 + $0x70] sm:$0xff]   ;;  %v1685_v2 = vld [vmem:[%s1609_s29 + $0x78] sm:$0xff]  }
  0x34   : > { %v1342_v48 = vunpack.c.l.bf16 %v1637_v32  ;;  %v1343_v51 = vunpack.c.h.bf16 %v1637_v32  ;;  %v1346_v52 = vunpack.c.l.bf16 %v1647_v38  ;;  %v1347_v53 = vunpack.c.h.bf16 %v1647_v38 }
  0x35   : > { %v1350_v56 = vunpack.c.l.bf16 %v1654_v43  ;;  %v1351_v57 = vunpack.c.h.bf16 %v1654_v43  ;;  %v1354_v58 = vunpack.c.l.bf16 %v1661_v49  ;;  %v1355_v59 = vunpack.c.h.bf16 %v1661_v49  ;;  %v1240_v49 = vld [vmem:[%s1458_s25 + $0x84] sm:$0xf] }
  0x36   : > { %v1358_v63 = vunpack.c.l.bf16 %v1667_v54  ;;  %v1359_v0 = vunpack.c.h.bf16 %v1667_v54  ;;  %v1362_v3 = vunpack.c.l.bf16 %v1677_v60  ;;  %v1363_v4 = vunpack.c.h.bf16 %v1677_v60  ;;  %v1253_v60 = vld [vmem:[%s1458_s25 + $0xa4] sm:$0x1] }
  0x39   : > { %v1394_v44 = vpop.eup %1393 }
  0x3a   : > { %v211_v50 = vmul.f32 %v1394_v44, %v208_v33 }
  0x3c   : > { %v213_v61 = vmul.f32 %v211_v50, %v1440_v1  ;;  %v1680_v62 = vrot.slane %v211_v50, %v282_v22 }
  0x3e   : > { %v214_v8 = vsub.f32 %v212_v55, %v213_v61  ;;  %v285_v9 = vmul.f32 %v1306_v21, %v1680_v62  ;;  %v286_v1 = vmul.f32 %v1307_v23, %v1680_v62  ;;  %v287_v10 = vmul.f32 %v1310_v24, %v1680_v62 }
  0x3f   : > { %v288_v11 = vmul.f32 %v1311_v27, %v1680_v62  ;;  %v289_v12 = vmul.f32 %v1314_v28, %v1680_v62  ;;  %v290_v13 = vmul.f32 %v1315_v29, %v1680_v62  ;;  %v291_v14 = vmul.f32 %v1318_v30, %v1680_v62 }
  0x40   : > { %v1698_v15 = vrot.slane %v214_v8, %v282_v22  ;;  %v292_v16 = vmul.f32 %v1319_v34, %v1680_v62  ;;  %v1702_v17 = vmul.f32 %v1322_v35, %v1680_v62  ;;  %v1705_v18 = vmul.f32 %v1323_v36, %v1680_v62 }
  0x41   : > { %v1708_v19 = vmul.f32 %v1326_v37, %v1680_v62  ;;  %v1711_v20 = vmul.f32 %v1327_v39, %v1680_v62  ;;  %v1714_v21 = vmul.f32 %v1330_v40, %v1680_v62  ;;  %v1717_v22 = vmul.f32 %v1331_v41, %v1680_v62 }
  0x42   : > { %v323_v23 = vadd.f32 %v1698_v15, %v285_v9  ;;  %v324_v24 = vadd.f32 %v1698_v15, %v286_v1  ;;  %v325_v25 = vadd.f32 %v1698_v15, %v287_v10  ;;  %v326_v27 = vadd.f32 %v1698_v15, %v288_v11 }
  0x43   : > { %v327_v28 = vadd.f32 %v1698_v15, %v289_v12  ;;  %v328_v29 = vadd.f32 %v1698_v15, %v290_v13  ;;  %v329_v30 = vadd.f32 %v1698_v15, %v291_v14  ;;  %v330_v33 = vadd.f32 %v1698_v15, %v292_v16 }
  0x44   : > { %v355_v34 = vmax.f32 %v323_v23, 0.0  ;;  %v356_v35 = vmax.f32 %v324_v24, 0.0  ;;  %v357_v36 = vmax.f32 %v325_v25, 0.0  ;;  %v358_v37 = vmax.f32 %v326_v27, 0.0 }
  0x45   : > { %v359_v39 = vmax.f32 %v327_v28, 0.0  ;;  %v360_v40 = vmax.f32 %v328_v29, 0.0  ;;  %v361_v41 = vmax.f32 %v329_v30, 0.0  ;;  %v362_v44 = vmax.f32 %v330_v33, 0.0  ;;  %v1190_v30 = vld [vmem:[%s1458_s25 + $0xc] sm:$0xf] }
  0x46   : > { %v1272_v50 = vpack.c.bf16 %v355_v34, %v355_v34  ;;  %v1273_v55 = vpack.c.bf16 %v356_v35, %v356_v35  ;;  %v1274_v61 = vpack.c.bf16 %v357_v36, %v357_v36  ;;  %v1275_v8 = vpack.c.bf16 %v358_v37, %v358_v37  ;;  %v1193_v37 = vld [vmem:[%s1458_s25 + $0x14] sm:$0x1] }
  0x47   : > { %v1276_v9 = vpack.c.bf16 %v359_v39, %v359_v39  ;;  %v1277_v1 = vpack.c.bf16 %v360_v40, %v360_v40  ;;  %v1727_v10 = vpack.c.bf16 %v361_v41, %v361_v41  ;;  %v1729_v11 = vpack.c.bf16 %v362_v44, %v362_v44 }
  0x48   : > { %v595_v12 = vshrl.u32 %v1272_v50, 16  ;;  %v598_v13 = vshll.u32 %v1272_v50, 16  ;;  %v603_v14 = vshrl.u32 %v1273_v55, 16  ;;  %v606_v16 = vshll.u32 %v1273_v55, 16 }
  0x49   : > { %v612_v23 = vshrl.u32 %v1274_v61, 16  ;;  %v615_v24 = vshll.u32 %v1274_v61, 16  ;;  %v620_v25 = vshrl.u32 %v1275_v8, 16  ;;  %v623_v27 = vshll.u32 %v1275_v8, 16 }
  0x4a   : > { %v597_v29 = vrot.slane %v595_v12, 7  ;;  %v605_v33 = vrot.slane %v603_v14, 7  ;;  %v629_v34 = vshrl.u32 %v1276_v9, 16  ;;  %v632_v35 = vshll.u32 %v1276_v9, 16  ;;  %v1195_v12 = vld [vmem:[%s1458_s25 + $0x18] sm:$0xf] }
  0x4b   : > { %v614_v39 = vrot.slane %v612_v23, 7  ;;  %v622_v40 = vrot.slane %v620_v25, 7  ;;  %v637_v41 = vshrl.u32 %v1277_v1, 16  ;;  %v640_v44 = vshll.u32 %v1277_v1, 16  ;;  %v1198_v9 = vld [vmem:[%s1458_s25 + $0x20] sm:$0x1] }
  0x4c   : > { %v600_v50 = vor.u32 %v598_v13, %v597_v29  ;;  %v601_v55 = vrot.slane %v597_v29, 4  ;;  %v608_v61 = vor.u32 %v606_v16, %v605_v33  ;;  %v610_v8 = vrot.slane %v605_v33, 4 }
  0x4d   : > { %v617_v14 = vor.u32 %v615_v24, %v614_v39  ;;  %v618_v7 = vrot.slane %v614_v39, 4  ;;  %v625_v6 = vor.u32 %v623_v27, %v622_v40  ;;  %v627_v23 = vrot.slane %v622_v40, 4  ;;  %v1203_v39 = vld [vmem:[%s1458_s25 + $0x2c] sm:$0x1] }
  0x4e   : > { %v917_v25 = vsel %vm1733_vm7, %v600_v50, %v1190_v30  ;;  %v609_v1 = vsel %vm1740_vm8, %v601_v55, %v608_v61  ;;  %v921_v13 = vsel %vm1449_vm2, %v610_v8, %v1193_v37  ;;  %v631_v16 = vrot.slane %v629_v34, 7  ;;  %v1200_v30 = vld [vmem:[%s1458_s25 + $0x24] sm:$0xf] }
  0x4f   : > { %1191 = vst [vmem:[%s1458_s25 + $0xc] sm:$0xf] %v917_v25  ;;  %1192 = vst [vmem:[%s1458_s25 + $0x10] sm:$0xf] %v609_v1  ;;  %v924_v24 = vsel %vm1733_vm7, %v617_v14, %v1195_v12  ;;  %v626_v27 = vsel %vm1740_vm8, %v618_v7, %v625_v6  ;;  %v928_v29 = vsel %vm1449_vm2, %v627_v23, %v1198_v9  ;;  %v639_v33 = vrot.slane %v637_v41, 7 }
  0x50   : > { %1194 = vst [vmem:[%s1458_s25 + $0x14] sm:$0x1] %v921_v13  ;;  %1196 = vst [vmem:[%s1458_s25 + $0x18] sm:$0xf] %v924_v24  ;;  %v634_v37 = vor.u32 %v632_v35, %v631_v16  ;;  %v635_v34 = vrot.slane %v631_v16, 4  ;;  %v646_v40 = vshrl.u32 %v1727_v10, 16  ;;  %v331_v8 = vadd.f32 %v1698_v15, %v1702_v17 }
  0x51   : > { %1197 = vst [vmem:[%s1458_s25 + $0x1c] sm:$0xf] %v626_v27  ;;  %1199 = vst [vmem:[%s1458_s25 + $0x20] sm:$0x1] %v928_v29  ;;  %v649_v50 = vshll.u32 %v1727_v10, 16  ;;  %v642_v6 = vor.u32 %v640_v44, %v639_v33  ;;  %v644_v7 = vrot.slane %v639_v33, 4  ;;  %v332_v12 = vadd.f32 %v1698_v15, %v1705_v18 }
  0x52   : > { %v654_v55 = vshrl.u32 %v1729_v11, 16  ;;  %v657_v41 = vshll.u32 %v1729_v11, 16  ;;  %v931_v61 = vsel %vm1733_vm7, %v634_v37, %v1200_v30  ;;  %v648_v35 = vrot.slane %v646_v40, 7  ;;  %v1205_v9 = vld [vmem:[%s1458_s25 + $0x30] sm:$0xf] }
  0x53   : > { %1201 = vst [vmem:[%s1458_s25 + $0x24] sm:$0xf] %v931_v61  ;;  %v643_v10 = vsel %vm1740_vm8, %v635_v34, %v642_v6  ;;  %v935_v44 = vsel %vm1449_vm2, %v644_v7, %v1203_v39  ;;  %v333_v11 = vadd.f32 %v1698_v15, %v1708_v19  ;;  %v1208_v25 = vld [vmem:[%s1458_s25 + $0x38] sm:$0x1]  ;;  %v363_v18 = vmax.f32 %v331_v8, 0.0 }
  0x54   : > { %v656_v14 = vrot.slane %v654_v55, 7  ;;  %1202 = vst [vmem:[%s1458_s25 + $0x28] sm:$0xf] %v643_v10  ;;  %1204 = vst [vmem:[%s1458_s25 + $0x2c] sm:$0x1] %v935_v44  ;;  %v651_v23 = vor.u32 %v649_v50, %v648_v35  ;;  %v652_v17 = vrot.slane %v648_v35, 4  ;;  %v334_v27 = vadd.f32 %v1698_v15, %v1711_v20 }
  0x55   : > { %v364_v1 = vmax.f32 %v332_v12, 0.0  ;;  %v365_v24 = vmax.f32 %v333_v11, 0.0  ;;  %v1280_v19 = vpack.c.bf16 %v363_v18, %v363_v18  ;;  %v335_v33 = vadd.f32 %v1698_v15, %v1714_v21  ;;  %v1210_v8 = vld [vmem:[%s1458_s25 + $0x3c] sm:$0xf] }
  0x56   : > { %v659_v13 = vor.u32 %v657_v41, %v656_v14  ;;  %v661_v16 = vrot.slane %v656_v14, 4  ;;  %v938_v29 = vsel %vm1733_vm7, %v651_v23, %v1205_v9  ;;  %v366_v40 = vmax.f32 %v334_v27, 0.0  ;;  %v1213_v9 = vld [vmem:[%s1458_s25 + $0x44] sm:$0x1] }
  0x57   : > { %v1281_v30 = vpack.c.bf16 %v364_v1, %v364_v1  ;;  %1206 = vst [vmem:[%s1458_s25 + $0x30] sm:$0xf] %v938_v29  ;;  %v1282_v39 = vpack.c.bf16 %v365_v24, %v365_v24  ;;  %v663_v20 = vshrl.u32 %v1280_v19, 16  ;;  %v666_v50 = vshll.u32 %v1280_v19, 16 }
  0x58   : > { %v660_v37 = vsel %vm1740_vm8, %v652_v17, %v659_v13  ;;  %v942_v34 = vsel %vm1449_vm2, %v661_v16, %v1208_v25  ;;  %v1283_v21 = vpack.c.bf16 %v366_v40, %v366_v40  ;;  %v367_v61 = vmax.f32 %v335_v33, 0.0  ;;  %v1215_v16 = vld [vmem:[%s1458_s25 + $0x48] sm:$0xf]  ;;  %v1218_v33 = vld [vmem:[%s1458_s25 + $0x50] sm:$0x1] }
  0x59   : > { %1207 = vst [vmem:[%s1458_s25 + $0x34] sm:$0xf] %v660_v37  ;;  %1209 = vst [vmem:[%s1458_s25 + $0x38] sm:$0x1] %v942_v34  ;;  %v671_v6 = vshrl.u32 %v1281_v30, 16  ;;  %v674_v7 = vshll.u32 %v1281_v30, 16  ;;  %v336_v10 = vadd.f32 %v1698_v15, %v1717_v22  ;;  %v299_v44 = vmul.f32 %v1334_v42, %v1680_v62 }
  0x5a   : > { %v680_v55 = vshrl.u32 %v1282_v39, 16  ;;  %v683_v41 = vshll.u32 %v1282_v39, 16  ;;  %v665_v35 = vrot.slane %v663_v20, 7  ;;  %v688_v11 = vshrl.u32 %v1283_v21, 16 }
  0x5b   : > { %v673_v12 = vrot.slane %v671_v6, 7  ;;  %v691_v23 = vshll.u32 %v1283_v21, 16  ;;  %v1284_v17 = vpack.c.bf16 %v367_v61, %v367_v61  ;;  %v368_v6 = vmax.f32 %v336_v10, 0.0 }
  0x5c   : > { %v682_v14 = vrot.slane %v680_v55, 7  ;;  %v668_v25 = vor.u32 %v666_v50, %v665_v35  ;;  %v669_v18 = vrot.slane %v665_v35, 4  ;;  %v690_v27 = vrot.slane %v688_v11, 7  ;;  %v1220_v50 = vld [vmem:[%s1458_s25 + $0x54] sm:$0xf] }
  0x5d   : > { %v676_v1 = vor.u32 %v674_v7, %v673_v12  ;;  %v678_v13 = vrot.slane %v673_v12, 4  ;;  %v697_v42 = vshrl.u32 %v1284_v17, 16  ;;  %v700_v37 = vshll.u32 %v1284_v17, 16 }
  0x5e   : > { %v685_v24 = vor.u32 %v683_v41, %v682_v14  ;;  %v686_v22 = vrot.slane %v682_v14, 4  ;;  %v945_v29 = vsel %vm1733_vm7, %v668_v25, %v1210_v8  ;;  %v693_v39 = vor.u32 %v691_v23, %v690_v27 }
  0x5f   : > { %v677_v19 = vsel %vm1740_vm8, %v669_v18, %v676_v1  ;;  %v949_v30 = vsel %vm1449_vm2, %v678_v13, %v1213_v9  ;;  %1211 = vst [vmem:[%s1458_s25 + $0x3c] sm:$0xf] %v945_v29  ;;  %v695_v40 = vrot.slane %v690_v27, 4  ;;  %v699_v20 = vrot.slane %v697_v42, 7 }
  0x60   : > { %1212 = vst [vmem:[%s1458_s25 + $0x40] sm:$0xf] %v677_v19  ;;  %1214 = vst [vmem:[%s1458_s25 + $0x44] sm:$0x1] %v949_v30  ;;  %v952_v34 = vsel %vm1733_vm7, %v685_v24, %v1215_v16  ;;  %v337_v7 = vadd.f32 %v1698_v15, %v299_v44  ;;  %v300_v55 = vmul.f32 %v1335_v45, %v1680_v62 }
  0x61   : > { %1216 = vst [vmem:[%s1458_s25 + $0x48] sm:$0xf] %v952_v34  ;;  %v301_v41 = vmul.f32 %v1338_v46, %v1680_v62  ;;  %v694_v21 = vsel %vm1740_vm8, %v686_v22, %v693_v39  ;;  %v956_v61 = vsel %vm1449_vm2, %v695_v40, %v1218_v33  ;;  %v702_v35 = vor.u32 %v700_v37, %v699_v20  ;;  %v1223_v22 = vld [vmem:[%s1458_s25 + $0x5c] sm:$0x1]  ;;  %v1225_v37 = vld [vmem:[%s1458_s25 + $0x60] sm:$0xf] }
  0x62   : > { %v703_v8 = vrot.slane %v699_v20, 4  ;;  %1217 = vst [vmem:[%s1458_s25 + $0x4c] sm:$0xf] %v694_v21  ;;  %1219 = vst [vmem:[%s1458_s25 + $0x50] sm:$0x1] %v956_v61  ;;  %v1285_v12 = vpack.c.bf16 %v368_v6, %v368_v6  ;;  %v369_v10 = vmax.f32 %v337_v7, 0.0  ;;  %v338_v26 = vadd.f32 %v1698_v15, %v300_v55 }
  0x63   : > { %v339_v45 = vadd.f32 %v1698_v15, %v301_v41  ;;  %v959_v44 = vsel %vm1733_vm7, %v702_v35, %v1220_v50  ;;  %v302_v46 = vmul.f32 %v1339_v47, %v1680_v62  ;;  %v303_v9 = vmul.f32 %v1342_v48, %v1680_v62 }
  0x64   : > { %v304_v14 = vmul.f32 %v1343_v51, %v1680_v62  ;;  %1221 = vst [vmem:[%s1458_s25 + $0x54] sm:$0xf] %v959_v44  ;;  %v705_v11 = vshrl.u32 %v1285_v12, 16  ;;  %v708_v23 = vshll.u32 %v1285_v12, 16  ;;  %v1286_v17 = vpack.c.bf16 %v369_v10, %v369_v10  ;;  %v1228_v10 = vld [vmem:[%s1458_s25 + $0x68] sm:$0x1] }
  0x65   : > { %v370_v25 = vmax.f32 %v338_v26, 0.0  ;;  %v371_v18 = vmax.f32 %v339_v45, 0.0  ;;  %v340_v1 = vadd.f32 %v1698_v15, %v302_v46  ;;  %v341_v31 = vadd.f32 %v1698_v15, %v303_v9  ;;  %v1230_v26 = vld [vmem:[%s1458_s25 + $0x6c] sm:$0xf] }
  0x66   : > { %v342_v47 = vadd.f32 %v1698_v15, %v304_v14  ;;  %v707_v13 = vrot.slane %v705_v11, 7  ;;  %v714_v16 = vshrl.u32 %v1286_v17, 16  ;;  %v717_v48 = vshll.u32 %v1286_v17, 16 }
  0x67   : > { %v1287_v24 = vpack.c.bf16 %v370_v25, %v370_v25  ;;  %v1288_v32 = vpack.c.bf16 %v371_v18, %v371_v18  ;;  %v372_v51 = vmax.f32 %v340_v1, 0.0  ;;  %v373_v27 = vmax.f32 %v341_v31, 0.0 }
  0x68   : > { %v374_v42 = vmax.f32 %v342_v47, 0.0  ;;  %v710_v29 = vor.u32 %v708_v23, %v707_v13  ;;  %v712_v19 = vrot.slane %v707_v13, 4  ;;  %v716_v30 = vrot.slane %v714_v16, 7  ;;  %v1233_v47 = vld [vmem:[%s1458_s25 + $0x74] sm:$0x1] }
  0x69   : > { %v722_v33 = vshrl.u32 %v1287_v24, 16  ;;  %v725_v34 = vshll.u32 %v1287_v24, 16  ;;  %v731_v39 = vshrl.u32 %v1288_v32, 16  ;;  %v734_v40 = vshll.u32 %v1288_v32, 16  ;;  %v1235_v32 = vld [vmem:[%s1458_s25 + $0x78] sm:$0xf] }
  0x6a   : > { %v1289_v20 = vpack.c.bf16 %v372_v51, %v372_v51  ;;  %v711_v50 = vsel %vm1740_vm8, %v703_v8, %v710_v29  ;;  %v963_v6 = vsel %vm1449_vm2, %v712_v19, %v1223_v22  ;;  %v719_v7 = vor.u32 %v717_v48, %v716_v30 }
  0x6b   : > { %v720_v55 = vrot.slane %v716_v30, 4  ;;  %1222 = vst [vmem:[%s1458_s25 + $0x58] sm:$0xf] %v711_v50  ;;  %1224 = vst [vmem:[%s1458_s25 + $0x5c] sm:$0x1] %v963_v6  ;;  %v724_v41 = vrot.slane %v722_v33, 7  ;;  %v1290_v45 = vpack.c.bf16 %v373_v27, %v373_v27  ;;  %v1291_v8 = vpack.c.bf16 %v374_v42, %v374_v42 }
  0x6c   : > { %v733_v21 = vrot.slane %v731_v39, 7  ;;  %v739_v61 = vshrl.u32 %v1289_v20, 16  ;;  %v742_v35 = vshll.u32 %v1289_v20, 16  ;;  %v966_v12 = vsel %vm1733_vm7, %v719_v7, %v1225_v37 }
  0x6d   : > { %v305_v44 = vmul.f32 %v1346_v52, %v1680_v62  ;;  %1226 = vst [vmem:[%s1458_s25 + $0x60] sm:$0xf] %v966_v12  ;;  %v727_v46 = vor.u32 %v725_v34, %v724_v41  ;;  %v729_v9 = vrot.slane %v724_v41, 4  ;;  %v748_v17 = vshrl.u32 %v1290_v45, 16  ;;  %v1238_v34 = vld [vmem:[%s1458_s25 + $0x80] sm:$0x1] }
  0x6e   : > { %v736_v14 = vor.u32 %v734_v40, %v733_v21  ;;  %v737_v11 = vrot.slane %v733_v21, 4  ;;  %v741_v23 = vrot.slane %v739_v61, 7  ;;  %v751_v25 = vshll.u32 %v1290_v45, 16 }
  0x6f   : > { %v756_v18 = vshrl.u32 %v1291_v8, 16  ;;  %v728_v1 = vsel %vm1740_vm8, %v720_v55, %v727_v46  ;;  %v970_v31 = vsel %vm1449_vm2, %v729_v9, %v1228_v10  ;;  %v759_v13 = vshll.u32 %v1291_v8, 16 }
  0x70   : > { %v973_v52 = vsel %vm1733_vm7, %v736_v14, %v1230_v26  ;;  %1227 = vst [vmem:[%s1458_s25 + $0x64] sm:$0xf] %v728_v1  ;;  %1229 = vst [vmem:[%s1458_s25 + $0x68] sm:$0x1] %v970_v31  ;;  %v744_v16 = vor.u32 %v742_v35, %v741_v23  ;;  %v746_v48 = vrot.slane %v741_v23, 4  ;;  %v750_v24 = vrot.slane %v748_v17, 7 }
  0x71   : > { %1231 = vst [vmem:[%s1458_s25 + $0x6c] sm:$0xf] %v973_v52  ;;  %v758_v22 = vrot.slane %v756_v18, 7  ;;  %v343_v51 = vadd.f32 %v1698_v15, %v305_v44  ;;  %v306_v27 = vmul.f32 %v1347_v53, %v1680_v62  ;;  %v307_v42 = vmul.f32 %v1350_v56, %v1680_v62 }
  0x72   : > { %v308_v29 = vmul.f32 %v1351_v57, %v1680_v62  ;;  %v745_v19 = vsel %vm1740_vm8, %v737_v11, %v744_v16  ;;  %v977_v30 = vsel %vm1449_vm2, %v746_v48, %v1233_v47  ;;  %v753_v33 = vor.u32 %v751_v25, %v750_v24  ;;  %v1243_v47 = vld [vmem:[%s1458_s25 + $0x8c] sm:$0x1] }
  0x73   : > { %v754_v37 = vrot.slane %v750_v24, 4  ;;  %1232 = vst [vmem:[%s1458_s25 + $0x70] sm:$0xf] %v745_v19  ;;  %1234 = vst [vmem:[%s1458_s25 + $0x74] sm:$0x1] %v977_v30  ;;  %v761_v38 = vor.u32 %v759_v13, %v758_v22  ;;  %v763_v53 = vrot.slane %v758_v22, 4  ;;  %v344_v43 = vadd.f32 %v1698_v15, %v306_v27 }
  0x74   : > { %v375_v56 = vmax.f32 %v343_v51, 0.0  ;;  %v980_v57 = vsel %vm1733_vm7, %v753_v33, %v1235_v32  ;;  %v345_v39 = vadd.f32 %v1698_v15, %v307_v42  ;;  %v346_v40 = vadd.f32 %v1698_v15, %v308_v29  ;;  %v1245_v27 = vld [vmem:[%s1458_s25 + $0x90] sm:$0xf]  ;;  %v1248_v42 = vld [vmem:[%s1458_s25 + $0x98] sm:$0x1] }
  0x75   : > { %v309_v20 = vmul.f32 %v1354_v58, %v1680_v62  ;;  %1236 = vst [vmem:[%s1458_s25 + $0x78] sm:$0xf] %v980_v57  ;;  %v762_v50 = vsel %vm1740_vm8, %v754_v37, %v761_v38  ;;  %v984_v6 = vsel %vm1449_vm2, %v763_v53, %v1238_v34  ;;  %v376_v55 = vmax.f32 %v344_v43, 0.0 }
  0x76   : > { %v1292_v7 = vpack.c.bf16 %v375_v56, %v375_v56  ;;  %1237 = vst [vmem:[%s1458_s25 + $0x7c] sm:$0xf] %v762_v50  ;;  %1239 = vst [vmem:[%s1458_s25 + $0x80] sm:$0x1] %v984_v6  ;;  %v377_v41 = vmax.f32 %v345_v39, 0.0  ;;  %v378_v21 = vmax.f32 %v346_v40, 0.0  ;;  %v310_v58 = vmul.f32 %v1355_v59, %v1680_v62 }
  0x77   : > { %v347_v61 = vadd.f32 %v1698_v15, %v309_v20  ;;  %v1293_v10 = vpack.c.bf16 %v376_v55, %v376_v55  ;;  %v311_v26 = vmul.f32 %v1358_v63, %v1680_v62  ;;  %v1250_v40 = vld [vmem:[%s1458_s25 + $0x9c] sm:$0xf]  ;;  %v312_v55 = vmul.f32 %v1359_v0, %v1680_v62 }
  0x78   : > { %v765_v35 = vshrl.u32 %v1292_v7, 16  ;;  %v768_v12 = vshll.u32 %v1292_v7, 16  ;;  %v1294_v45 = vpack.c.bf16 %v377_v41, %v377_v41  ;;  %v1295_v8 = vpack.c.bf16 %v378_v21, %v378_v21 }
  0x79   : > { %v379_v44 = vmax.f32 %v347_v61, 0.0  ;;  %v348_v46 = vadd.f32 %v1698_v15, %v310_v58  ;;  %v773_v14 = vshrl.u32 %v1293_v10, 16  ;;  %v776_v11 = vshll.u32 %v1293_v10, 16 }
  0x7a   : > { %v767_v9 = vrot.slane %v765_v35, 7  ;;  %v349_v23 = vadd.f32 %v1698_v15, %v311_v26  ;;  %v782_v59 = vshrl.u32 %v1294_v45, 16  ;;  %v785_v17 = vshll.u32 %v1294_v45, 16 }
  0x7b   : > { %v790_v25 = vshrl.u32 %v1295_v8, 16  ;;  %v793_v18 = vshll.u32 %v1295_v8, 16  ;;  %v775_v31 = vrot.slane %v773_v14, 7  ;;  %v1296_v52 = vpack.c.bf16 %v379_v44, %v379_v44  ;;  %v1255_v14 = vld [vmem:[%s1458_s25 + $0xa8] sm:$0xf] }
  0x7c   : > { %v770_v63 = vor.u32 %v768_v12, %v767_v9  ;;  %v771_v1 = vrot.slane %v767_v9, 4  ;;  %v784_v13 = vrot.slane %v782_v59, 7  ;;  %v380_v48 = vmax.f32 %v348_v46, 0.0 }
  0x7d   : > { %v792_v16 = vrot.slane %v790_v25, 7  ;;  %v381_v24 = vmax.f32 %v349_v23, 0.0  ;;  %v778_v32 = vor.u32 %v776_v11, %v775_v31  ;;  %v780_v51 = vrot.slane %v775_v31, 4 }
  0x7e   : > { %v987_v22 = vsel %vm1733_vm7, %v770_v63, %v1240_v49  ;;  %v799_v29 = vshrl.u32 %v1296_v52, 16  ;;  %v787_v19 = vor.u32 %v785_v17, %v784_v13  ;;  %v788_v30 = vrot.slane %v784_v13, 4 }
  0x7f   : > { %1241 = vst [vmem:[%s1458_s25 + $0x84] sm:$0xf] %v987_v22  ;;  %v795_v33 = vor.u32 %v793_v18, %v792_v16  ;;  %v797_v37 = vrot.slane %v792_v16, 4  ;;  %v779_v34 = vsel %vm1740_vm8, %v771_v1, %v778_v32  ;;  %v991_v38 = vsel %vm1449_vm2, %v780_v51, %v1243_v47 }
  0x80   : > { %v801_v53 = vrot.slane %v799_v29, 7  ;;  %v802_v56 = vshll.u32 %v1296_v52, 16  ;;  %1242 = vst [vmem:[%s1458_s25 + $0x88] sm:$0xf] %v779_v34  ;;  %1244 = vst [vmem:[%s1458_s25 + $0x8c] sm:$0x1] %v991_v38  ;;  %v994_v43 = vsel %vm1733_vm7, %v787_v19, %v1245_v27  ;;  %v1297_v20 = vpack.c.bf16 %v380_v48, %v380_v48 }
  0x81   : > { %v796_v57 = vsel %vm1740_vm8, %v788_v30, %v795_v33  ;;  %v998_v39 = vsel %vm1449_vm2, %v797_v37, %v1248_v42  ;;  %1246 = vst [vmem:[%s1458_s25 + $0x90] sm:$0xf] %v994_v43  ;;  %v1298_v7 = vpack.c.bf16 %v381_v24, %v381_v24  ;;  %v313_v61 = vmul.f32 %v1362_v3, %v1680_v62  ;;  %v1258_v29 = vld [vmem:[%s1458_s25 + $0xb0] sm:$0x1]  ;;  %v1260_v30 = vld [vmem:[%s1458_s25 + $0xb4] sm:$0xf] }
  0x82   : > { %1247 = vst [vmem:[%s1458_s25 + $0x94] sm:$0xf] %v796_v57  ;;  %1249 = vst [vmem:[%s1458_s25 + $0x98] sm:$0x1] %v998_v39  ;;  %v804_v50 = vor.u32 %v802_v56, %v801_v53  ;;  %v805_v6 = vrot.slane %v801_v53, 4  ;;  %v807_v41 = vshrl.u32 %v1297_v20, 16  ;;  %v314_v58 = vmul.f32 %v1363_v4, %v1680_v62 }
  0x83   : > { %v810_v21 = vshll.u32 %v1297_v20, 16  ;;  %v816_v12 = vshrl.u32 %v1298_v7, 16  ;;  %v819_v10 = vshll.u32 %v1298_v7, 16  ;;  %v350_v26 = vadd.f32 %v1698_v15, %v312_v55  ;;  %v1263_v38 = vld [vmem:[%s1458_s25 + $0xbc] sm:$0x1] }
  0x84   : > { %v1001_v35 = vsel %vm1733_vm7, %v804_v50, %v1250_v40  ;;  %v809_v54 = vrot.slane %v807_v41, 7  ;;  %v351_v0 = vadd.f32 %v1698_v15, %v313_v61  ;;  %v352_v45 = vadd.f32 %v1698_v15, %v314_v58 }
  0x85   : > { %1251 = vst [vmem:[%s1458_s25 + $0x9c] sm:$0xf] %v1001_v35  ;;  %v2023_v3 = vunpack.c.l.bf16 %v1685_v2  ;;  %v818_v4 = vrot.slane %v816_v12, 7  ;;  %v382_v44 = vmax.f32 %v350_v26, 0.0  ;;  %v2024_v25 = vunpack.c.h.bf16 %v1685_v2 }
  0x86   : > { %v812_v46 = vor.u32 %v810_v21, %v809_v54  ;;  %v814_v9 = vrot.slane %v809_v54, 4  ;;  %v383_v11 = vmax.f32 %v351_v0, 0.0  ;;  %v384_v23 = vmax.f32 %v352_v45, 0.0  ;;  %v1265_v21 = vld [vmem:[%s1458_s25 + $0xc0] sm:$0xf] }
  0x87   : > { %v315_v8 = vmul.f32 %v2023_v3, %v1680_v62  ;;  %v821_v49 = vor.u32 %v819_v10, %v818_v4  ;;  %v1299_v59 = vpack.c.bf16 %v382_v44, %v382_v44  ;;  %v316_v18 = vmul.f32 %v2024_v25, %v1680_v62  ;;  %v1268_v0 = vld [vmem:[%s1458_s25 + $0xc8] sm:$0x1] }
  0x88   : > { %v813_v63 = vsel %vm1740_vm8, %v805_v6, %v812_v46  ;;  %v1005_v1 = vsel %vm1449_vm2, %v814_v9, %v1253_v60  ;;  %v1300_v31 = vpack.c.bf16 %v383_v11, %v383_v11  ;;  %v1301_v52 = vpack.c.bf16 %v384_v23, %v384_v23 }
  0x89   : > { %v353_v17 = vadd.f32 %v1698_v15, %v315_v8  ;;  %1252 = vst [vmem:[%s1458_s25 + $0xa0] sm:$0xf] %v813_v63  ;;  %1254 = vst [vmem:[%s1458_s25 + $0xa4] sm:$0x1] %v1005_v1  ;;  %v1008_v47 = vsel %vm1733_vm7, %v821_v49, %v1255_v14  ;;  %v824_v13 = vshrl.u32 %v1299_v59, 16  ;;  %v827_v16 = vshll.u32 %v1299_v59, 16 }
  0x8a   : > { %1256 = vst [vmem:[%s1458_s25 + $0xa8] sm:$0xf] %v1008_v47  ;;  %v833_v62 = vshrl.u32 %v1300_v31, 16  ;;  %v836_v2 = vshll.u32 %v1300_v31, 16  ;;  %v841_v24 = vshrl.u32 %v1301_v52, 16  ;;  %v844_v22 = vshll.u32 %v1301_v52, 16 }
  0x8b   : > { %v385_v48 = vmax.f32 %v353_v17, 0.0  ;;  %v822_v32 = vrot.slane %v818_v4, 4  ;;  %v826_v51 = vrot.slane %v824_v13, 7  ;;  %v354_v42 = vadd.f32 %v1698_v15, %v316_v18 }
  0x8c   : > { %v835_v19 = vrot.slane %v833_v62, 7  ;;  %v843_v33 = vrot.slane %v841_v24, 7 }
  0x8d   : > { %v1302_v27 = vpack.c.bf16 %v385_v48, %v385_v48  ;;  %v829_v37 = vor.u32 %v827_v16, %v826_v51  ;;  %v831_v34 = vrot.slane %v826_v51, 4  ;;  %v386_v6 = vmax.f32 %v354_v42, 0.0 }
  0x8e   : > { %v838_v43 = vor.u32 %v836_v2, %v835_v19  ;;  %v839_v57 = vrot.slane %v835_v19, 4  ;;  %v846_v39 = vor.u32 %v844_v22, %v843_v33  ;;  %v848_v40 = vrot.slane %v843_v33, 4 }
  0x8f   : > { %v850_v53 = vshrl.u32 %v1302_v27, 16  ;;  %v853_v56 = vshll.u32 %v1302_v27, 16  ;;  %v830_v15 = vsel %vm1740_vm8, %v822_v32, %v829_v37  ;;  %v1012_v20 = vsel %vm1449_vm2, %v831_v34, %v1258_v29 }
  0x90   : > { %1257 = vst [vmem:[%s1458_s25 + $0xac] sm:$0xf] %v830_v15  ;;  %1259 = vst [vmem:[%s1458_s25 + $0xb0] sm:$0x1] %v1012_v20  ;;  %v1015_v7 = vsel %vm1733_vm7, %v838_v43, %v1260_v30  ;;  %v847_v55 = vsel %vm1740_vm8, %v839_v57, %v846_v39  ;;  %v1019_v41 = vsel %vm1449_vm2, %v848_v40, %v1263_v38 }
  0x91   : > { %v852_v50 = vrot.slane %v850_v53, 7  ;;  %1261 = vst [vmem:[%s1458_s25 + $0xb4] sm:$0xf] %v1015_v7  ;;  %1262 = vst [vmem:[%s1458_s25 + $0xb8] sm:$0xf] %v847_v55  ;;  %v1303_v58 = vpack.c.bf16 %v386_v6, %v386_v6 }
  0x92   : > { %1264 = vst [vmem:[%s1458_s25 + $0xbc] sm:$0x1] %v1019_v41 }
  0x93   : > { %v855_v61 = vor.u32 %v853_v56, %v852_v50  ;;  %v858_v12 = vshrl.u32 %v1303_v58, 16  ;;  %v861_v10 = vshll.u32 %v1303_v58, 16  ;;  %v856_v26 = vrot.slane %v852_v50, 4 }
  0x95   : > { %v1022_v35 = vsel %vm1733_vm7, %v855_v61, %v1265_v21  ;;  %v860_v54 = vrot.slane %v858_v12, 7 }
  0x96   : > { %1266 = vst [vmem:[%s1458_s25 + $0xc0] sm:$0xf] %v1022_v35 }
  0x97   : > { %v863_v45 = vor.u32 %v861_v10, %v860_v54  ;;  %v865_v3 = vrot.slane %v860_v54, 4 }
  0x99   : > { %v864_v8 = vsel %vm1740_vm8, %v856_v26, %v863_v45  ;;  %v1026_v60 = vsel %vm1449_vm2, %v865_v3, %v1268_v0 }
  0x9a   : > { %1267 = vst [vmem:[%s1458_s25 + $0xc4] sm:$0xf] %v864_v8  ;;  %1269 = vst [vmem:[%s1458_s25 + $0xc8] sm:$0x1] %v1026_v60 }
  0x9b PF: > { %s14_s15 = sadd.s32 1, %s1401_s15  }
  0x9c   : > { %p11_p5 = scmp.ge.s32.totalorder %s14_s15, 4  }
  0x9e   :  { %13 = sbr.rel (!%p11_p5) target bundleno = 1 (0x1), region = 68 }

// kernel: tfc_forward.4
= control target key start
LH: loop header
LB: loop body
LE: loop exit
PB: predicated region body
PF: predicated region fallthrough
CT: control target
= control target key end

     0   :  { %s7249_s12 = smov 0   ;;  %s9069_s0 = inlined_call_operand.vmem [shape: bf16[2,18,24,128], index: 0, kind: input, shape index: {}]   ;;  %s9070_s1 = inlined_call_operand.vmem [shape: bf16[9,128,128], index: 1, kind: input, shape index: {}]   ;;  %s9071_s2 = inlined_call_operand.vmem [shape: bf16[512,128], index: 2, kind: output, shape index: {0}]   ;;  %s9072_s3 = inlined_call_operand.vmem [shape: f32[2,2,128], index: 3, kind: output, shape index: {1}]  }
   0x1 LB: > { %s7255_s13 = sadd.s32 4294967295, %s7227_s12   ;;  %p5352_p0 = scmp.ge.s32.totalorder %s7227_s12, 1  ;;  %s7227_s12 = sphi %s7249_s12, %s14_s12  }
   0x2   : > { %p140_p1 = scmp.lt.s32.totalorder %s7227_s12, 3 }
   0x4   : > { %p141_p2 = pnand %p5352_p0, %p140_p1 }
   0x6   : > { %144 = sbr.rel (%p141_p2) target bundleno = 604 (0x25c), region = 28 }
   0xd   : > { %v7031_v0 = vld [vmem:[%s9070_s1 + $0x40] sm:$0xff]   ;;  %p168_p3 = scmp.lt.s32.totalorder %s7255_s13, 1  ;;  %v7033_v2 = vld [vmem:[%s9070_s1 + $0x48] sm:$0xff]   ;;  %v7035_v4 = vld [vmem:[%s9070_s1 + $0x50] sm:$0xff]   ;;  %vm248_vm0 = vsmask.f32 3328 }
   0xe   : > { %v7032_v1 = vld [vmem:[%s9070_s1 + $0x100] sm:$0xff]   ;;  %6318 = vmatprep.subr.bf16.mxu1 %v7031_v0  ;;  %v7034_v3 = vld [vmem:[%s9070_s1 + $0x108] sm:$0xff]   ;;  %v7036_v5 = vld [vmem:[%s9070_s1 + $0x110] sm:$0xff]   ;;  %vm249_vm1 = vsmask.f32 7440  ;;  %vm1278_vm3 = vcmask 1042432  }
   0xf   : > { %6510 = vmatprep.subr.bf16.mxu0 %v7032_v1  ;;  %6319 = vmatpush3.bf16.msra.mxu1 %v7031_v0  ;;  %s7279_s26 = scalar_select %p168_p3, %s7255_s13, 1  ;;  %v7037_v6 = vld [vmem:[%s9070_s1 + $0x58] sm:$0xff]   ;;  %v7039_v8 = vld [vmem:[%s9070_s1 + $0x60] sm:$0xff]   ;;  %v7041_v10 = vld [vmem:[%s9070_s1 + $0x68] sm:$0xff]   ;;  %vm1279_vm4 = vcmask 1046532  }
  0x10   : > { %6511 = vmatpush3.bf16.msra.mxu0 %v7032_v1  ;;  %6320 = vmatprep.subr.bf16.mxu1 %v7033_v2  ;;  %v7038_v7 = vld [vmem:[%s9070_s1 + $0x118] sm:$0xff]   ;;  %v7040_v9 = vld [vmem:[%s9070_s1 + $0x120] sm:$0xff]   ;;  %v7042_v11 = vld [vmem:[%s9070_s1 + $0x128] sm:$0xff]  }
  0x11   : > { %6512 = vmatprep.subr.bf16.mxu0 %v7034_v3  ;;  %s7022_s4 = smul.u32 216, %s7279_s26  ;;  %v7043_v25 = vld [vmem:[%s9070_s1 + $0x70] sm:$0xff]   ;;  %v7045_v36 = vld [vmem:[%s9070_s1 + $0x78] sm:$0xff]   ;;  %vm7329_vm2 = vmor %vm248_vm0, %vm249_vm1  ;;  %s5356_s19 = sshll.u32 %s7279_s26, 1 }
  0x12   : > { %v7044_v30 = vld [vmem:[%s9070_s1 + $0x130] sm:$0xff]   ;;  %v7046_v51 = vld [vmem:[%s9070_s1 + $0x138] sm:$0xff]   ;;  %vm7575_vm5 = vmor %vm1278_vm3, %vm1279_vm4  ;;  %s182_s22 = scalar_lea.vmem %s9072_s3, %s5356_s19 }
  0x13   : > { %6321 = vmatpush3.bf16.msra.mxu1 %v7033_v2  ;;  %s7297_s11 = scalar_lea.vmem %s9069_s0, %s7022_s4 }
  0x14   : > { %6513 = vmatpush3.bf16.msra.mxu0 %v7034_v3  ;;  %6322 = vmatprep.subr.bf16.mxu1 %v7035_v4  ;;  %v184_v12 = vld [vmem:[%s7297_s11] sm:$0xf]  ;;  %v185_v13 = vld [vmem:[%s7297_s11 + $0x4] sm:$0xf]  ;;  %v232_v14 = vld [vmem:[%s7297_s11 + $0x8] sm:$0x1] }
  0x15   : > { %6514 = vmatprep.subr.bf16.mxu0 %v7036_v5  ;;  %v252_v15 = vshrl.u32 %v184_v12, 16  ;;  %v255_v16 = vshll.u32 %v184_v12, 16  ;;  %v261_v17 = vshll.u32 %v185_v13, 16  ;;  %v265_v18 = vshrl.u32 %v185_v13, 16  ;;  %v5549_v20 = vld [vmem:[%s7297_s11 + $0xc] sm:$0xf] }
  0x16   : > { %v271_v19 = vshll.u32 %v232_v14, 16  ;;  %v7310_v23 = vld [vmem:[%s7297_s11 + $0x10] sm:$0xf]  ;;  %v7313_v24 = vld [vmem:[%s7297_s11 + $0x14] sm:$0x1]  ;;  %v2151_v29 = vshrl.u32 %v5549_v20, 16 }
  0x17   : > { %6323 = vmatpush3.bf16.msra.mxu1 %v7035_v4  ;;  %v254_v21 = vrot.slane %v252_v15, 4  ;;  %v257_v22 = vrot.slane %v255_v16, 5  ;;  %v263_v26 = vrot.slane %v261_v17, 5  ;;  %v267_v27 = vrot.slane %v265_v18, 4  ;;  %v186_v35 = vld [vmem:[%s7297_s11 + $0xc] sm:$0xf] }
  0x18   : > { %6515 = vmatpush3.bf16.msra.mxu0 %v7036_v5  ;;  %6324 = vmatprep.subr.bf16.mxu1 %v7037_v6  ;;  %v273_v28 = vrot.slane %v271_v19, 5  ;;  %v2154_v32 = vshll.u32 %v5549_v20, 16  ;;  %v2160_v33 = vshll.u32 %v7310_v23, 16  ;;  %v2164_v34 = vshrl.u32 %v7310_v23, 16  ;;  %v187_v42 = vld [vmem:[%s7297_s11 + $0x10] sm:$0xf] }
  0x19   : > { %6516 = vmatprep.subr.bf16.mxu0 %v7038_v7  ;;  %v258_v31 = vor.u32 %v257_v22, %v254_v21  ;;  %v268_v38 = vor.u32 %v267_v27, %v263_v26  ;;  %v2153_v39 = vrot.slane %v2151_v29, 4  ;;  %v2170_v40 = vshll.u32 %v7313_v24, 16  ;;  %v233_v55 = vld [vmem:[%s7297_s11 + $0x14] sm:$0x1]  ;;  %v5552_v57 = vld [vmem:[%s7297_s11 + $0x18] sm:$0xf] }
  0x1a   : > { %v2925_v41 = vrot.slane %v7313_v24, 5  ;;  %v2156_v44 = vrot.slane %v2154_v32, 5  ;;  %v2162_v45 = vrot.slane %v2160_v33, 5  ;;  %v2166_v46 = vrot.slane %v2164_v34, 4  ;;  %v7346_v62 = vld [vmem:[%s7297_s11 + $0x1c] sm:$0xf] }
  0x1b   : > { %6325 = vmatpush3.bf16.msra.mxu1 %v7037_v6  ;;  %v259_v43 = vrot.slane %v258_v31, 4  ;;  %v269_v47 = vrot.slane %v268_v38, 4  ;;  %v2172_v48 = vrot.slane %v2170_v40, 5  ;;  %v276_v49 = vshrl.u32 %v186_v35, 16  ;;  %v7047_v3 = vld [vmem:[%s9070_s1] sm:$0xff]  }
  0x1c   : > { %6517 = vmatpush3.bf16.msra.mxu0 %v7038_v7  ;;  %6326 = vmatprep.subr.bf16.mxu1 %v7039_v8  ;;  %v279_v50 = vshll.u32 %v186_v35, 16  ;;  %v2157_v53 = vor.u32 %v2156_v44, %v2153_v39  ;;  %v2167_v54 = vor.u32 %v2166_v46, %v2162_v45  ;;  %v285_v56 = vshll.u32 %v187_v42, 16  ;;  %v7354_v4 = vld [vmem:[%s9070_s1 + $0x140] sm:$0xff]   ;;  %v188_v21 = vld [vmem:[%s7297_s11 + $0x18] sm:$0xf]  ;;  %v7050_v46 = vld [vmem:[%s9070_s1 + $0x8] sm:$0xff]  }
  0x1d   : > { %6518 = vmatprep.subr.bf16.mxu0 %v7040_v9  ;;  %v264_v52 = vsel %vm7329_vm2, %v259_v43, %v263_v26  ;;  %v274_v58 = vsel %vm7329_vm2, %v269_v47, %v273_v28  ;;  %v278_v59 = vrot.slane %v276_v49, 4  ;;  %v289_v61 = vshrl.u32 %v187_v42, 16  ;;  %v189_v28 = vld [vmem:[%s7297_s11 + $0x1c] sm:$0xf]  ;;  %v234_v33 = vld [vmem:[%s7297_s11 + $0x20] sm:$0x1] }
  0x1e   : > { %v281_v60 = vrot.slane %v279_v50, 5  ;;  %v5373_v63 = vcombine.low %v264_v52, %v274_v58  ;;  %v2158_v0 = vrot.slane %v2157_v53, 4  ;;  %v2168_v1 = vrot.slane %v2167_v54, 4  ;;  %v5555_v39 = vld [vmem:[%s7297_s11 + $0x24] sm:$0xf] }
  0x1f   : > { %6327 = vmatpush3.bf16.msra.mxu1 %v7039_v8  ;;  %v287_v2 = vrot.slane %v285_v56, 5  ;;  %v291_v6 = vrot.slane %v289_v61, 4  ;;  %v295_v7 = vshll.u32 %v233_v55, 16  ;;  %v7357_v8 = vld [vmem:[%s7297_s11 + $0x20] sm:$0x1]  ;;  %v2178_v12 = vshll.u32 %v5552_v57, 16 }
  0x20   : > { %6519 = vmatpush3.bf16.msra.mxu0 %v7040_v9  ;;  %6328 = vmatprep.subr.bf16.mxu1 %v7041_v10  ;;  %v282_v5 = vor.u32 %v281_v60, %v278_v59  ;;  %v2163_v9 = vsel %vm7329_vm2, %v2158_v0, %v2162_v45  ;;  %v2184_v19 = vshll.u32 %v7346_v62, 16  ;;  %v2188_v20 = vshrl.u32 %v7346_v62, 16  ;;  %v7382_v45 = vld [vmem:[%s7297_s11 + $0x28] sm:$0xf]  ;;  %v190_v52 = vld [vmem:[%s7297_s11 + $0x24] sm:$0xf] }
  0x21   : > { %6520 = vmatprep.subr.bf16.mxu0 %v7042_v11  ;;  %6334 = vmatprep.mubr.bf16.mxu1 %v5373_v63  ;;  %v292_v15 = vor.u32 %v291_v6, %v287_v2  ;;  %v297_v16 = vrot.slane %v295_v7, 5  ;;  %v2180_v18 = vrot.slane %v2178_v12, 5  ;;  %v2194_v26 = vshll.u32 %v7357_v8, 16  ;;  %v7049_v63 = vld [vmem:[%s9070_s1 + $0x148] sm:$0xff]  }
  0x22   : > { %v283_v14 = vrot.slane %v282_v5, 4  ;;  %v2929_v27 = vrot.slane %v7346_v62, 5  ;;  %v2190_v31 = vrot.slane %v2188_v20, 4  ;;  %v2932_v32 = vrot.slane %v7357_v8, 5  ;;  %v191_v5 = vld [vmem:[%s7297_s11 + $0x28] sm:$0xf] }
  0x23   : > { %6329 = vmatpush3.bf16.msra.mxu1 %v7041_v10  ;;  %v2173_v10 = vsel %vm7329_vm2, %v2168_v1, %v2172_v48  ;;  %v2196_v35 = vrot.slane %v2194_v26, 5  ;;  %v300_v38 = vshrl.u32 %v188_v21, 16  ;;  %v303_v44 = vshll.u32 %v188_v21, 16 }
  0x24   : > { %6521 = vmatpush3.bf16.msra.mxu0 %v7042_v11  ;;  %6330 = vmatprep.subr.bf16.mxu1 %v7043_v25  ;;  %v2175_v11 = vshrl.u32 %v5552_v57, 16  ;;  %v5613_v13 = vcombine.low %v2163_v9, %v2173_v10  ;;  %v288_v22 = vsel %vm7329_vm2, %v283_v14, %v287_v2  ;;  %v309_v48 = vshll.u32 %v189_v28, 16 }
  0x25   : > { %6522 = vmatprep.subr.bf16.mxu0 %v7044_v30  ;;  %v302_v47 = vrot.slane %v300_v38, 4  ;;  %v313_v49 = vshrl.u32 %v189_v28, 16  ;;  %v319_v50 = vshll.u32 %v234_v33, 16  ;;  %v305_v55 = vrot.slane %v303_v44, 5  ;;  %v7413_v33 = vld [vmem:[%s7297_s11 + $0x34] sm:$0xf] }
  0x26   : > { %v2177_v17 = vrot.slane %v2175_v11, 4  ;;  %6526 = vmatprep.mubr.bf16.mxu0 %v5613_v13  ;;  %v2199_v56 = vshrl.u32 %v5555_v39, 16  ;;  %v311_v57 = vrot.slane %v309_v48, 5  ;;  %v2202_v60 = vshll.u32 %v5555_v39, 16  ;;  %v235_v11 = vld [vmem:[%s7297_s11 + $0x2c] sm:$0x1] }
  0x27   : > { %6331 = vmatpush3.bf16.msra.mxu1 %v7043_v25  ;;  %v293_v25 = vrot.slane %v292_v15, 4  ;;  %v315_v58 = vrot.slane %v313_v49, 4  ;;  %v321_v59 = vrot.slane %v319_v50, 5  ;;  %v306_v0 = vor.u32 %v305_v55, %v302_v47  ;;  %v7052_v48 = vld [vmem:[%s9070_s1 + $0x158] sm:$0xff]  }
  0x28   : > { %6523 = vmatpush3.bf16.msra.mxu0 %v7044_v30  ;;  %6332 = vmatprep.subr.bf16.mxu1 %v7045_v36  ;;  %v2181_v29 = vor.u32 %v2180_v18, %v2177_v17  ;;  %v2186_v30 = vrot.slane %v2184_v19, 5  ;;  %v2201_v1 = vrot.slane %v2199_v56, 4  ;;  %v2208_v2 = vshll.u32 %v7382_v45, 16 }
  0x29   : > { %6524 = vmatprep.subr.bf16.mxu0 %v7046_v51  ;;  %v298_v34 = vsel %vm7329_vm2, %v293_v25, %v297_v16  ;;  %v316_v7 = vor.u32 %v315_v58, %v311_v57  ;;  %v2204_v9 = vrot.slane %v2202_v60, 5  ;;  %v2212_v10 = vshrl.u32 %v7382_v45, 16  ;;  %v5558_v16 = vld [vmem:[%s7297_s11 + $0x30] sm:$0xf]  ;;  %v7059_v60 = vld [vmem:[%s9070_s1 + $0x20] sm:$0xff]  }
  0x2a   : > { %v5374_v40 = vcombine.low %v288_v22, %v298_v34  ;;  %v2182_v42 = vrot.slane %v2181_v29, 4  ;;  %v2191_v43 = vor.u32 %v2190_v31, %v2186_v30  ;;  %v307_v12 = vrot.slane %v306_v0, 4  ;;  %v7056_v34 = vld [vmem:[%s9070_s1 + $0x18] sm:$0xff]  }
  0x2b   : > { %6333 = vmatpush3.bf16.msra.mxu1 %v7045_v36  ;;  %v7378_v36 = vrot.slane %v2929_v27, 4  ;;  %v2210_v13 = vrot.slane %v2208_v2, 5  ;;  %v324_v15 = vshrl.u32 %v190_v52, 16  ;;  %v317_v17 = vrot.slane %v316_v7, 4  ;;  %v236_v2 = vld [vmem:[%s7297_s11 + $0x38] sm:$0x1] }
  0x2c   : > { %6525 = vmatpush3.bf16.msra.mxu0 %v7046_v51  ;;  %6366 = vmatprep.subr.bf16.mxu1 %v7047_v3  ;;  %v7388_v51 = vld [vmem:[%s7297_s11 + $0x2c] sm:$0x1]  ;;  %v2187_v53 = vsel %vm7329_vm2, %v2182_v42, %v2186_v30  ;;  %v2192_v54 = vrot.slane %v2191_v43, 4  ;;  %v2205_v18 = vor.u32 %v2204_v9, %v2201_v1  ;;  %v2214_v19 = vrot.slane %v2212_v10, 4  ;;  %v5561_v9 = vld [vmem:[%s7297_s11 + $0x3c] sm:$0xf] }
  0x2d   : > { %6558 = vmatprep.subr.bf16.mxu0 %v7354_v4  ;;  %v2218_v14 = vshll.u32 %v7388_v51, 16  ;;  %v327_v20 = vshll.u32 %v190_v52, 16  ;;  %v312_v21 = vsel %vm7329_vm2, %v307_v12, %v311_v57  ;;  %v326_v25 = vrot.slane %v324_v15, 4 }
  0x2e   : > { %6335 = vmatmul.mubr.bf16.vlgmr.msra.gmra.mrb[0].mxu1 %v5374_v40  ;;  %v2197_v61 = vsel %vm7329_vm2, %v2192_v54, %v2196_v35  ;;  %v333_v26 = vshll.u32 %v191_v5, 16  ;;  %v322_v28 = vsel %vm7329_vm2, %v317_v17, %v321_v59  ;;  %v2206_v29 = vrot.slane %v2205_v18, 4  ;;  %v192_v54 = vld [vmem:[%s7297_s11 + $0x30] sm:$0xf]  ;;  %v193_v59 = vld [vmem:[%s7297_s11 + $0x34] sm:$0xf] }
  0x2f   : > { %6367 = vmatpush3.bf16.msra.mxu1 %v7047_v3  ;;  %v7053_v3 = vld [vmem:[%s9070_s1 + $0x10] sm:$0xff]   ;;  %v5614_v6 = vcombine.low %v2187_v53, %v2197_v61  ;;  %v2220_v22 = vrot.slane %v2218_v14, 5  ;;  %v2215_v30 = vor.u32 %v2214_v19, %v2210_v13  ;;  %v329_v31 = vrot.slane %v327_v20, 5  ;;  %v7061_v14 = vld [vmem:[%s9070_s1 + $0x28] sm:$0xff]   ;;  %v7447_v19 = vld [vmem:[%s7297_s11 + $0x40] sm:$0xf] }
  0x30   : > { %6368 = vmatprep.subr.bf16.mxu1 %v7050_v46  ;;  %v5375_v35 = vcombine.low %v312_v21, %v322_v28  ;;  %v335_v38 = vrot.slane %v333_v26, 5  ;;  %v337_v39 = vshrl.u32 %v191_v5, 16  ;;  %v343_v40 = vshll.u32 %v235_v11, 16  ;;  %v7054_v20 = vld [vmem:[%s9070_s1 + $0x160] sm:$0xff]  }
  0x31   : > { %6527 = vmatmul.mubr.bf16.vlgmr.msra.gmra.mrb[0].mxu0 %v5614_v6  ;;  %v2211_v42 = vsel %vm7329_vm2, %v2206_v29, %v2210_v13  ;;  %v2216_v43 = vrot.slane %v2215_v30, 4  ;;  %v330_v44 = vor.u32 %v329_v31, %v326_v25  ;;  %v2223_v47 = vshrl.u32 %v5558_v16, 16  ;;  %v7455_v28 = vld [vmem:[%s7297_s11 + $0x44] sm:$0x1] }
  0x32   : > { %6559 = vmatpush3.bf16.msra.mxu0 %v7354_v4  ;;  %v7051_v4 = vld [vmem:[%s9070_s1 + $0x150] sm:$0xff]   ;;  %6338 = vmatprep.mubr.bf16.mxu1 %v5375_v35  ;;  %v339_v49 = vrot.slane %v337_v39, 4  ;;  %v345_v50 = vrot.slane %v343_v40, 5  ;;  %v2226_v52 = vshll.u32 %v5558_v16, 16  ;;  %v2232_v53 = vshll.u32 %v7413_v33, 16 }
  0x33   : > { %6369 = vmatpush3.bf16.msra.mxu1 %v7050_v46  ;;  %6560 = vmatprep.subr.bf16.mxu0 %v7049_v63  ;;  %v7424_v46 = vld [vmem:[%s7297_s11 + $0x38] sm:$0x1]  ;;  %v2221_v55 = vsel %vm7329_vm2, %v2216_v43, %v2220_v22  ;;  %v331_v56 = vrot.slane %v330_v44, 4  ;;  %v2225_v57 = vrot.slane %v2223_v47, 4  ;;  %v2236_v58 = vshrl.u32 %v7413_v33, 16  ;;  %v7063_v35 = vld [vmem:[%s9070_s1 + $0x30] sm:$0xff]  }
  0x34   : > { %6370 = vmatprep.subr.bf16.mxu1 %v7053_v3  ;;  %v5615_v61 = vcombine.low %v2211_v42, %v2221_v55  ;;  %v2228_v0 = vrot.slane %v2226_v52, 5  ;;  %v2234_v1 = vrot.slane %v2232_v53, 5  ;;  %v2242_v6 = vshll.u32 %v7424_v46, 16  ;;  %v195_v55 = vld [vmem:[%s7297_s11 + $0x40] sm:$0xf] }
  0x35   : > { %v336_v5 = vsel %vm7329_vm2, %v331_v56, %v335_v38  ;;  %v348_v7 = vshrl.u32 %v192_v54, 16  ;;  %v351_v12 = vshll.u32 %v192_v54, 16  ;;  %v357_v13 = vshll.u32 %v193_v59, 16 }
  0x36   : > { %6561 = vmatpush3.bf16.msra.mxu0 %v7049_v63  ;;  %v340_v63 = vor.u32 %v339_v49, %v335_v38  ;;  %6530 = vmatprep.mubr.bf16.mxu0 %v5615_v61  ;;  %v2229_v11 = vor.u32 %v2228_v0, %v2225_v57  ;;  %v2244_v16 = vrot.slane %v2242_v6, 5  ;;  %v361_v18 = vshrl.u32 %v193_v59, 16 }
  0x37   : > { %6371 = vmatpush3.bf16.msra.mxu1 %v7053_v3  ;;  %6562 = vmatprep.subr.bf16.mxu0 %v7051_v4  ;;  %v2238_v3 = vrot.slane %v2236_v58, 4  ;;  %v350_v17 = vrot.slane %v348_v7, 4  ;;  %v353_v25 = vrot.slane %v351_v12, 5  ;;  %v359_v26 = vrot.slane %v357_v13, 5 }
  0x38   : > { %6372 = vmatprep.subr.bf16.mxu1 %v7056_v34  ;;  %v341_v10 = vrot.slane %v340_v63, 4  ;;  %v2230_v22 = vrot.slane %v2229_v11, 4  ;;  %v363_v31 = vrot.slane %v361_v18, 4  ;;  %v2247_v40 = vshrl.u32 %v5561_v9, 16  ;;  %v237_v63 = vld [vmem:[%s7297_s11 + $0x44] sm:$0x1] }
  0x39   : > { %v2239_v15 = vor.u32 %v2238_v3, %v2234_v1  ;;  %v354_v39 = vor.u32 %v353_v25, %v350_v17  ;;  %v2250_v42 = vshll.u32 %v5561_v9, 16  ;;  %v2256_v49 = vshll.u32 %v7447_v19, 16  ;;  %v5564_v9 = vld [vmem:[%s7297_s11 + $0x48] sm:$0xf] }
  0x3a   : > { %6563 = vmatpush3.bf16.msra.mxu0 %v7051_v4  ;;  %v346_v21 = vsel %vm7329_vm2, %v341_v10, %v345_v50  ;;  %v367_v4 = vshll.u32 %v236_v2, 16  ;;  %v2235_v38 = vsel %vm7329_vm2, %v2230_v22, %v2234_v1  ;;  %v364_v44 = vor.u32 %v363_v31, %v359_v26  ;;  %v7065_v2 = vld [vmem:[%s9070_s1 + $0x38] sm:$0xff]   ;;  %v7488_v22 = vld [vmem:[%s7297_s11 + $0x50] sm:$0x1] }
  0x3b   : > { %6373 = vmatpush3.bf16.msra.mxu1 %v7056_v34  ;;  %6564 = vmatprep.subr.bf16.mxu0 %v7052_v48  ;;  %v5376_v29 = vcombine.low %v336_v5, %v346_v21  ;;  %v2240_v30 = vrot.slane %v2239_v15, 4  ;;  %v194_v34 = vld [vmem:[%s7297_s11 + $0x3c] sm:$0xf]  ;;  %v355_v52 = vrot.slane %v354_v39, 4  ;;  %v2249_v53 = vrot.slane %v2247_v40, 4  ;;  %v7057_v15 = vld [vmem:[%s9070_s1 + $0x170] sm:$0xff]  }
  0x3c   : > { %6374 = vmatprep.subr.bf16.mxu1 %v7059_v60  ;;  %v369_v47 = vrot.slane %v367_v4, 5  ;;  %v2252_v54 = vrot.slane %v2250_v42, 5  ;;  %v365_v56 = vrot.slane %v364_v44, 4  ;;  %v2258_v57 = vrot.slane %v2256_v49, 5  ;;  %v7058_v31 = vld [vmem:[%s9070_s1 + $0x178] sm:$0xff]   ;;  %v7499_v4 = vld [vmem:[%s9070_s1 + $0x80] sm:$0xff]  }
  0x3d   : > { %6339 = vmatmul.mubr.bf16.gmra.mrb[4].mxu1 %v5376_v29  ;;  %v2245_v43 = vsel %vm7329_vm2, %v2240_v30, %v2244_v16  ;;  %v2260_v58 = vshrl.u32 %v7447_v19, 16  ;;  %v2266_v59 = vshll.u32 %v7455_v28, 16  ;;  %v372_v0 = vshrl.u32 %v194_v34, 16  ;;  %v196_v30 = vld [vmem:[%s7297_s11 + $0x48] sm:$0xf] }
  0x3e   : > { %6565 = vmatpush3.bf16.msra.mxu0 %v7052_v48  ;;  %v5616_v50 = vcombine.low %v2235_v38, %v2245_v43  ;;  %v7055_v48 = vld [vmem:[%s9070_s1 + $0x168] sm:$0xff]   ;;  %v2253_v61 = vor.u32 %v2252_v54, %v2249_v53  ;;  %v375_v1 = vshll.u32 %v194_v34, 16  ;;  %v370_v5 = vsel %vm7329_vm2, %v365_v56, %v369_v47  ;;  %v238_v54 = vld [vmem:[%s7297_s11 + $0x50] sm:$0x1] }
  0x3f   : > { %6375 = vmatpush3.bf16.msra.mxu1 %v7059_v60  ;;  %6566 = vmatprep.subr.bf16.mxu0 %v7054_v20  ;;  %v360_v60 = vsel %vm7329_vm2, %v355_v52, %v359_v26  ;;  %v2262_v3 = vrot.slane %v2260_v58, 4  ;;  %v2268_v6 = vrot.slane %v2266_v59, 5  ;;  %v381_v7 = vshll.u32 %v195_v55, 16  ;;  %v197_v53 = vld [vmem:[%s7297_s11 + $0x4c] sm:$0xf] }
  0x40   : > { %6376 = vmatprep.subr.bf16.mxu1 %v7061_v14  ;;  %6531 = vmatmul.mubr.bf16.gmra.mrb[4].mxu0 %v5616_v50  ;;  %v5377_v10 = vcombine.low %v360_v60, %v370_v5  ;;  %v2254_v11 = vrot.slane %v2253_v61, 4  ;;  %v374_v12 = vrot.slane %v372_v0, 4  ;;  %v377_v13 = vrot.slane %v375_v1, 5  ;;  %v5567_v58 = vld [vmem:[%s7297_s11 + $0x54] sm:$0xf] }
  0x41   : > { %v2263_v16 = vor.u32 %v2262_v3, %v2258_v57  ;;  %v383_v17 = vrot.slane %v381_v7, 5  ;;  %v385_v18 = vshrl.u32 %v195_v55, 16  ;;  %v391_v21 = vshll.u32 %v237_v63, 16  ;;  %v7513_v0 = vld [vmem:[%s7297_s11 + $0x58] sm:$0xf] }
  0x42   : > { %6567 = vmatpush3.bf16.msra.mxu0 %v7054_v20  ;;  %6342 = vmatprep.mubr.bf16.mxu1 %v5377_v10  ;;  %v2259_v20 = vsel %vm7329_vm2, %v2254_v11, %v2258_v57  ;;  %v378_v25 = vor.u32 %v377_v13, %v374_v12  ;;  %v2271_v26 = vshrl.u32 %v5564_v9, 16  ;;  %v2274_v29 = vshll.u32 %v5564_v9, 16 }
  0x43   : > { %6377 = vmatpush3.bf16.msra.mxu1 %v7061_v14  ;;  %v7482_v14 = vld [vmem:[%s7297_s11 + $0x4c] sm:$0xf]  ;;  %6568 = vmatprep.subr.bf16.mxu0 %v7055_v48  ;;  %v2264_v34 = vrot.slane %v2263_v16, 4  ;;  %v393_v38 = vrot.slane %v391_v21, 5  ;;  %v2290_v52 = vshll.u32 %v7488_v22, 16  ;;  %v396_v61 = vshrl.u32 %v196_v30, 16 }
  0x44   : > { %6378 = vmatprep.subr.bf16.mxu1 %v7063_v35  ;;  %v2280_v39 = vshll.u32 %v7482_v14, 16  ;;  %v379_v40 = vrot.slane %v378_v25, 4  ;;  %v2273_v42 = vrot.slane %v2271_v26, 4  ;;  %v2276_v43 = vrot.slane %v2274_v29, 5 }
  0x45   : > { %v2284_v44 = vshrl.u32 %v7482_v14, 16  ;;  %v2269_v47 = vsel %vm7329_vm2, %v2264_v34, %v2268_v6  ;;  %v2292_v60 = vrot.slane %v2290_v52, 5  ;;  %v399_v63 = vshll.u32 %v196_v30, 16  ;;  %v7518_v6 = vld [vmem:[%s9070_s1 + $0x180] sm:$0xff]  }
  0x46   : > { %6569 = vmatpush3.bf16.msra.mxu0 %v7055_v48  ;;  %v2282_v50 = vrot.slane %v2280_v39, 5  ;;  %v5617_v55 = vcombine.low %v2259_v20, %v2269_v47  ;;  %v384_v48 = vsel %vm7329_vm2, %v379_v40, %v383_v17  ;;  %v2277_v56 = vor.u32 %v2276_v43, %v2273_v42  ;;  %v7525_v20 = vld [vmem:[%s7297_s11 + $0x5c] sm:$0x1]  ;;  %v199_v43 = vld [vmem:[%s7297_s11 + $0x58] sm:$0xf] }
  0x47   : > { %6379 = vmatpush3.bf16.msra.mxu1 %v7063_v35  ;;  %v387_v35 = vrot.slane %v385_v18, 4  ;;  %6570 = vmatprep.subr.bf16.mxu0 %v7057_v15  ;;  %v2286_v57 = vrot.slane %v2284_v44, 4  ;;  %v409_v3 = vshrl.u32 %v197_v53, 16  ;;  %v398_v9 = vrot.slane %v396_v61, 4  ;;  %v5570_v52 = vld [vmem:[%s7297_s11 + $0x60] sm:$0xf] }
  0x48   : > { %6380 = vmatprep.subr.bf16.mxu1 %v7065_v2  ;;  %6534 = vmatprep.mubr.bf16.mxu0 %v5617_v55  ;;  %v2278_v1 = vrot.slane %v2277_v56, 4  ;;  %v401_v10 = vrot.slane %v399_v63, 5  ;;  %v415_v11 = vshll.u32 %v238_v54, 16  ;;  %v2295_v25 = vshrl.u32 %v5567_v58, 16 }
  0x49   : > { %v388_v49 = vor.u32 %v387_v35, %v383_v17  ;;  %v2287_v5 = vor.u32 %v2286_v57, %v2282_v50  ;;  %v411_v18 = vrot.slane %v409_v3, 4  ;;  %v2298_v29 = vshll.u32 %v5567_v58, 16  ;;  %v198_v35 = vld [vmem:[%s7297_s11 + $0x54] sm:$0xf] }
  0x4a   : > { %6571 = vmatpush3.bf16.msra.mxu0 %v7057_v15  ;;  %v2283_v13 = vsel %vm7329_vm2, %v2278_v1, %v2282_v50  ;;  %v402_v17 = vor.u32 %v401_v10, %v398_v9  ;;  %v417_v21 = vrot.slane %v415_v11, 5  ;;  %v2304_v30 = vshll.u32 %v7513_v0, 16  ;;  %v239_v50 = vld [vmem:[%s7297_s11 + $0x5c] sm:$0x1] }
  0x4b   : > { %6381 = vmatpush3.bf16.msra.mxu1 %v7065_v2  ;;  %v389_v59 = vrot.slane %v388_v49, 4  ;;  %v405_v2 = vshll.u32 %v197_v53, 16  ;;  %6572 = vmatprep.subr.bf16.mxu0 %v7058_v31  ;;  %v2288_v15 = vrot.slane %v2287_v5, 4  ;;  %v2308_v34 = vshrl.u32 %v7513_v0, 16 }
  0x4c   : > { %6414 = vmatprep.subr.bf16.mxu1 %v7499_v4  ;;  %v403_v39 = vrot.slane %v402_v17, 4  ;;  %v2297_v42 = vrot.slane %v2295_v25, 4  ;;  %v2306_v44 = vrot.slane %v2304_v30, 5  ;;  %v2314_v49 = vshll.u32 %v7525_v20, 16  ;;  %v7549_v17 = vld [vmem:[%s7297_s11 + $0x68] sm:$0x1] }
  0x4d   : > { %v394_v7 = vsel %vm7329_vm2, %v389_v59, %v393_v38  ;;  %v407_v16 = vrot.slane %v405_v2, 5  ;;  %v2293_v26 = vsel %vm7329_vm2, %v2288_v15, %v2292_v60  ;;  %v2310_v47 = vrot.slane %v2308_v34, 4  ;;  %v7540_v60 = vld [vmem:[%s7297_s11 + $0x64] sm:$0xf]  ;;  %v7553_v25 = vld [vmem:[%s7297_s11 + $0x60] sm:$0xf] }
  0x4e   : > { %v5378_v12 = vcombine.low %v384_v48, %v394_v7  ;;  %6573 = vmatpush3.bf16.msra.mxu0 %v7058_v31  ;;  %v5618_v38 = vcombine.low %v2283_v13, %v2293_v26  ;;  %v2300_v31 = vrot.slane %v2298_v29, 5  ;;  %v420_v55 = vshrl.u32 %v198_v35, 16 }
  0x4f   : > { %6606 = vmatprep.subr.bf16.mxu0 %v7518_v6  ;;  %v412_v40 = vor.u32 %v411_v18, %v407_v16  ;;  %v408_v53 = vsel %vm7329_vm2, %v403_v39, %v407_v16  ;;  %v423_v48 = vshll.u32 %v198_v35, 16  ;;  %v2311_v57 = vor.u32 %v2310_v47, %v2306_v44  ;;  %v7556_v35 = vld [vmem:[%s7297_s11 + $0x64] sm:$0xf] }
  0x50   : > { %6343 = vmatmul.mubr.bf16.gmra.mrb[8].mxu1 %v5378_v12  ;;  %6535 = vmatmul.mubr.bf16.gmra.mrb[8].mxu0 %v5618_v38  ;;  %v2301_v56 = vor.u32 %v2300_v31, %v2297_v42  ;;  %v2316_v58 = vrot.slane %v2314_v49, 5  ;;  %v429_v59 = vshll.u32 %v199_v43, 16  ;;  %v422_v63 = vrot.slane %v420_v55, 4 }
  0x51   : > { %v413_v54 = vrot.slane %v412_v40, 4  ;;  %v425_v1 = vrot.slane %v423_v48, 5  ;;  %v433_v5 = vshrl.u32 %v199_v43, 16  ;;  %v2312_v7 = vrot.slane %v2311_v57, 4  ;;  %v240_v43 = vld [vmem:[%s7297_s11 + $0x68] sm:$0x1] }
  0x52   : > { %v2302_v3 = vrot.slane %v2301_v56, 4  ;;  %v431_v9 = vrot.slane %v429_v59, 5  ;;  %v439_v12 = vshll.u32 %v239_v50, 16  ;;  %v2319_v13 = vshrl.u32 %v5570_v52, 16  ;;  %v5637_v50 = vld [vmem:[%s7297_s11 + $0xc] sm:$0xe] }
  0x53   : > { %v418_v61 = vsel %vm7329_vm2, %v413_v54, %v417_v21  ;;  %v426_v10 = vor.u32 %v425_v1, %v422_v63  ;;  %v435_v11 = vrot.slane %v433_v5, 4  ;;  %v2317_v16 = vsel %vm7329_vm2, %v2312_v7, %v2316_v58  ;;  %v7571_v5 = vld [vmem:[%s7297_s11 + $0x6c] sm:$0xf] }
  0x54   : > { %v5379_v2 = vcombine.low %v408_v53, %v418_v61  ;;  %v2307_v15 = vsel %vm7329_vm2, %v2302_v3, %v2306_v44  ;;  %v2322_v18 = vshll.u32 %v5570_v52, 16  ;;  %v2328_v21 = vshll.u32 %v7540_v60, 16 }
  0x55   : > { %v5619_v26 = vcombine.low %v2307_v15, %v2317_v16  ;;  %v427_v29 = vrot.slane %v426_v10, 4  ;;  %v436_v30 = vor.u32 %v435_v11, %v431_v9  ;;  %v441_v34 = vrot.slane %v439_v12, 5 }
  0x56   : > { %6346 = vmatprep.mubr.bf16.mxu1 %v5379_v2  ;;  %v2321_v38 = vrot.slane %v2319_v13, 4  ;;  %v2324_v39 = vrot.slane %v2322_v18, 5  ;;  %v2330_v40 = vrot.slane %v2328_v21, 5  ;;  %v2332_v42 = vshrl.u32 %v7540_v60, 16  ;;  %v7583_v21 = vld [vmem:[%s7297_s11 + $0x70] sm:$0xf] }
  0x57   : > { %6538 = vmatprep.mubr.bf16.mxu0 %v5619_v26  ;;  %v432_v31 = vsel %vm7329_vm2, %v427_v29, %v431_v9  ;;  %v437_v44 = vrot.slane %v436_v30, 4  ;;  %v2338_v47 = vshll.u32 %v7549_v17, 16  ;;  %v444_v49 = vshrl.u32 %v7553_v25, 16  ;;  %v7149_v9 = vld [vmem:[%s7297_s11 + $0xb4] sm:$0xff]  }
  0x58   : > { %v2325_v52 = vor.u32 %v2324_v39, %v2321_v38  ;;  %v2334_v53 = vrot.slane %v2332_v42, 4  ;;  %v447_v54 = vshll.u32 %v7553_v25, 16  ;;  %v453_v55 = vshll.u32 %v7556_v35, 16 }
  0x59   : > { %v442_v48 = vsel %vm7329_vm2, %v437_v44, %v441_v34  ;;  %v2340_v56 = vrot.slane %v2338_v47, 5  ;;  %v446_v57 = vrot.slane %v444_v49, 4  ;;  %v457_v58 = vshrl.u32 %v7556_v35, 16  ;;  %v7594_v47 = vld [vmem:[%s7297_s11 + $0x78] sm:$0xf] }
  0x5a   : > { %v5380_v59 = vcombine.low %v432_v31, %v442_v48  ;;  %v2326_v61 = vrot.slane %v2325_v52, 4  ;;  %v2335_v63 = vor.u32 %v2334_v53, %v2330_v40  ;;  %v449_v1 = vrot.slane %v447_v54, 5  ;;  %v7605_v54 = vld [vmem:[%s7297_s11 + $0x7c] sm:$0xf] }
  0x5b   : > { %v455_v2 = vrot.slane %v453_v55, 5  ;;  %v459_v3 = vrot.slane %v457_v58, 4  ;;  %v463_v7 = vshll.u32 %v240_v43, 16  ;;  %v5653_v10 = vrot.slane %v5637_v50, 9  ;;  %v242_v58 = vld [vmem:[%s7297_s11 + $0x80] sm:$0x1] }
  0x5c   : > { %6347 = vmatmul.mubr.bf16.gmra.mrb[12].mxu1 %v5380_v59  ;;  %v2331_v11 = vsel %vm7329_vm2, %v2326_v61, %v2330_v40  ;;  %v2336_v12 = vrot.slane %v2335_v63, 4  ;;  %v450_v13 = vor.u32 %v449_v1, %v446_v57  ;;  %v2922_v15 = vrot.slane %v7310_v23, 5  ;;  %v241_v40 = vld [vmem:[%s7297_s11 + $0x74] sm:$0x1]  ;;  %v5638_v23 = vld [vmem:[%s7297_s11 + $0x18] sm:$0xe] }
  0x5d   : > { %v460_v16 = vor.u32 %v459_v3, %v455_v2  ;;  %v465_v18 = vrot.slane %v463_v7, 5  ;;  %v468_v26 = vshrl.u32 %v7571_v5, 16  ;;  %v471_v29 = vshll.u32 %v7571_v5, 16 }
  0x5e   : > { %v2341_v30 = vsel %vm7329_vm2, %v2336_v12, %v2340_v56  ;;  %v451_v34 = vrot.slane %v450_v13, 4  ;;  %v2923_v38 = vsel %vm7575_vm5, %v5653_v10, %v2922_v15  ;;  %v2924_v39 = vrot.slane %v2922_v15, 4  ;;  %v5639_v13 = vld [vmem:[%s7297_s11 + $0x24] sm:$0xe] }
  0x5f   : > { %v5620_v42 = vcombine.low %v2331_v11, %v2341_v30  ;;  %v461_v43 = vrot.slane %v460_v16, 4  ;;  %v470_v31 = vrot.slane %v468_v26, 4  ;;  %v473_v44 = vrot.slane %v471_v29, 5  ;;  %v7627_v16 = vld [vmem:[%s7297_s11 + $0x84] sm:$0xf]  ;;  %v7062_v29 = vld [vmem:[%s9070_s1 + $0x188] sm:$0xff]  }
  0x60   : > { %v456_v49 = vsel %vm7329_vm2, %v451_v34, %v455_v2  ;;  %v2926_v50 = vsel %vm7575_vm5, %v2924_v39, %v2925_v41  ;;  %v477_v52 = vshll.u32 %v7583_v21, 16  ;;  %v481_v53 = vshrl.u32 %v7583_v21, 16 }
  0x61   : > { %6539 = vmatmul.mubr.bf16.gmra.mrb[12].mxu0 %v5620_v42  ;;  %v466_v55 = vsel %vm7329_vm2, %v461_v43, %v465_v18  ;;  %v5685_v48 = vcombine.low %v2923_v38, %v2926_v50  ;;  %v474_v56 = vor.u32 %v473_v44, %v470_v31  ;;  %v487_v57 = vshll.u32 %v241_v40, 16  ;;  %v7635_v40 = vld [vmem:[%s7297_s11 + $0x88] sm:$0xf]  ;;  %v243_v31 = vld [vmem:[%s7297_s11 + $0x8c] sm:$0x1] }
  0x62   : > { %v5381_v59 = vcombine.low %v456_v49, %v466_v55  ;;  %v479_v24 = vrot.slane %v477_v52, 5  ;;  %v483_v61 = vrot.slane %v481_v53, 4  ;;  %v5654_v63 = vrot.slane %v5638_v23, 9 }
  0x63   : > { %6574 = vmatprep.mubr.bf16.mxu0 %v5685_v48  ;;  %v475_v41 = vrot.slane %v474_v56, 4  ;;  %v489_v1 = vrot.slane %v487_v57, 5  ;;  %v2933_v2 = vsel %vm7575_vm5, %v7378_v36, %v2932_v32  ;;  %v492_v3 = vshrl.u32 %v7594_v47, 16 }
  0x64   : > { %6350 = vmatprep.mubr.bf16.mxu1 %v5381_v59  ;;  %v484_v7 = vor.u32 %v483_v61, %v479_v24  ;;  %v2930_v10 = vsel %vm7575_vm5, %v5654_v63, %v2929_v27  ;;  %v495_v11 = vshll.u32 %v7594_v47, 16  ;;  %v501_v12 = vshll.u32 %v7605_v54, 16 }
  0x65   : > { %v480_v8 = vsel %vm7329_vm2, %v475_v41, %v479_v24  ;;  %v5686_v15 = vcombine.low %v2930_v10, %v2933_v2  ;;  %v494_v32 = vrot.slane %v492_v3, 4  ;;  %v505_v36 = vshrl.u32 %v7605_v54, 16  ;;  %v7656_v2 = vld [vmem:[%s7297_s11 + $0x90] sm:$0xf]  ;;  %v7659_v3 = vld [vmem:[%s7297_s11 + $0x94] sm:$0xf] }
  0x66   : > { %v485_v62 = vrot.slane %v484_v7, 4  ;;  %v497_v18 = vrot.slane %v495_v11, 5  ;;  %v503_v26 = vrot.slane %v501_v12, 5  ;;  %v511_v27 = vshll.u32 %v242_v58, 16 }
  0x67   : > { %v507_v30 = vrot.slane %v505_v36, 4  ;;  %v5655_v34 = vrot.slane %v5639_v13, 9  ;;  %v2936_v38 = vrot.slane %v7382_v45, 5  ;;  %v2939_v39 = vrot.slane %v7388_v51, 5  ;;  %v5640_v45 = vld [vmem:[%s7297_s11 + $0x30] sm:$0xe] }
  0x68   : > { %v490_v23 = vsel %vm7329_vm2, %v485_v62, %v489_v1  ;;  %v498_v42 = vor.u32 %v497_v18, %v494_v32  ;;  %v513_v43 = vrot.slane %v511_v27, 5  ;;  %v516_v44 = vshrl.u32 %v7627_v16, 16  ;;  %v244_v62 = vld [vmem:[%s7297_s11 + $0x98] sm:$0x1] }
  0x69   : > { %v5382_v49 = vcombine.low %v480_v8, %v490_v23  ;;  %6575 = vmatmul.mubr.bf16.vlgmr.msra.gmra.mrb[0].mxu0 %v5686_v15  ;;  %v508_v50 = vor.u32 %v507_v30, %v503_v26  ;;  %v2937_v52 = vsel %vm7575_vm5, %v5655_v34, %v2936_v38  ;;  %v2938_v53 = vrot.slane %v2936_v38, 4  ;;  %v7066_v30 = vld [vmem:[%s9070_s1 + $0x198] sm:$0xff]  }
  0x6a   : > { %6607 = vmatpush3.bf16.msra.mxu0 %v7518_v6  ;;  %v499_v51 = vrot.slane %v498_v42, 4  ;;  %v518_v55 = vrot.slane %v516_v44, 4  ;;  %v519_v48 = vshll.u32 %v7627_v16, 16  ;;  %v525_v56 = vshll.u32 %v7635_v40, 16  ;;  %v7064_v6 = vld [vmem:[%s9070_s1 + $0x190] sm:$0xff]  }
  0x6b   : > { %6351 = vmatmul.mubr.bf16.gmra.mrb[16].mxu1 %v5382_v49  ;;  %v509_v57 = vrot.slane %v508_v50, 4  ;;  %v2940_v58 = vsel %vm7575_vm5, %v2938_v53, %v2939_v39  ;;  %v529_v59 = vshrl.u32 %v7635_v40, 16  ;;  %v535_v24 = vshll.u32 %v243_v31, 16  ;;  %6608 = vmatprep.subr.bf16.mxu0 %v7062_v29  ;;  %v5641_v38 = vld [vmem:[%s7297_s11 + $0x3c] sm:$0xe] }
  0x6c   : > { %v504_v61 = vsel %vm7329_vm2, %v499_v51, %v503_v26  ;;  %v5687_v63 = vcombine.low %v2937_v52, %v2940_v58  ;;  %v521_v41 = vrot.slane %v519_v48, 5  ;;  %v527_v1 = vrot.slane %v525_v56, 5  ;;  %v7677_v31 = vld [vmem:[%s7297_s11 + $0x9c] sm:$0xf]  ;;  %v7686_v48 = vld [vmem:[%s7297_s11 + $0xa0] sm:$0xf] }
  0x6d   : > { %v514_v7 = vsel %vm7329_vm2, %v509_v57, %v513_v43  ;;  %v531_v10 = vrot.slane %v529_v59, 4  ;;  %v537_v11 = vrot.slane %v535_v24, 5  ;;  %v5656_v12 = vrot.slane %v5640_v45, 9  ;;  %v7070_v56 = vld [vmem:[%s9070_s1 + $0x1a0] sm:$0xff]  }
  0x6e   : > { %v5383_v13 = vcombine.low %v504_v61, %v514_v7  ;;  %6578 = vmatprep.mubr.bf16.mxu0 %v5687_v63  ;;  %v522_v8 = vor.u32 %v521_v41, %v518_v55  ;;  %v2943_v15 = vrot.slane %v7413_v33, 5  ;;  %v2946_v32 = vrot.slane %v7424_v46, 5  ;;  %6609 = vmatpush3.bf16.msra.mxu0 %v7062_v29  ;;  %v245_v61 = vld [vmem:[%s7297_s11 + $0xa4] sm:$0x1] }
  0x6f   : > { %v532_v36 = vor.u32 %v531_v10, %v527_v1  ;;  %v540_v18 = vshrl.u32 %v7656_v2, 16  ;;  %v543_v26 = vshll.u32 %v7656_v2, 16  ;;  %v549_v27 = vshll.u32 %v7659_v3, 16  ;;  %6610 = vmatprep.subr.bf16.mxu0 %v7064_v6 }
  0x70   : > { %6354 = vmatprep.mubr.bf16.mxu1 %v5383_v13  ;;  %v523_v34 = vrot.slane %v522_v8, 4  ;;  %v2944_v33 = vsel %vm7575_vm5, %v5656_v12, %v2943_v15  ;;  %v2945_v46 = vrot.slane %v2943_v15, 4  ;;  %v553_v29 = vshrl.u32 %v7659_v3, 16  ;;  %v5642_v15 = vld [vmem:[%s7297_s11 + $0x48] sm:$0xe] }
  0x71   : > { %v533_v39 = vrot.slane %v532_v36, 4  ;;  %v542_v23 = vrot.slane %v540_v18, 4  ;;  %v545_v42 = vrot.slane %v543_v26, 5  ;;  %v551_v43 = vrot.slane %v549_v27, 5  ;;  %v7711_v27 = vld [vmem:[%s7297_s11 + $0xa8] sm:$0xf] }
  0x72   : > { %v528_v44 = vsel %vm7329_vm2, %v523_v34, %v527_v1  ;;  %v2947_v49 = vsel %vm7575_vm5, %v2945_v46, %v2946_v32  ;;  %v555_v50 = vrot.slane %v553_v29, 4  ;;  %v559_v52 = vshll.u32 %v244_v62, 16  ;;  %6611 = vmatpush3.bf16.msra.mxu0 %v7064_v6  ;;  %v7074_v32 = vld [vmem:[%s9070_s1 + $0x1a8] sm:$0xff]  }
  0x73   : > { %v538_v53 = vsel %vm7329_vm2, %v533_v39, %v537_v11  ;;  %v5688_v45 = vcombine.low %v2944_v33, %v2947_v49  ;;  %v546_v51 = vor.u32 %v545_v42, %v542_v23  ;;  %v5657_v55 = vrot.slane %v5641_v38, 9  ;;  %6612 = vmatprep.subr.bf16.mxu0 %v7066_v30  ;;  %v7714_v29 = vld [vmem:[%s7297_s11 + $0xac] sm:$0xf] }
  0x74   : > { %v5384_v57 = vcombine.low %v528_v44, %v538_v53  ;;  %v556_v58 = vor.u32 %v555_v50, %v551_v43  ;;  %v561_v59 = vrot.slane %v559_v52, 5  ;;  %v2950_v24 = vrot.slane %v7447_v19, 5  ;;  %v5643_v53 = vld [vmem:[%s7297_s11 + $0x54] sm:$0xe] }
  0x75   : > { %6579 = vmatmul.mubr.bf16.gmra.mrb[4].mxu0 %v5688_v45  ;;  %v547_v6 = vrot.slane %v546_v51, 4  ;;  %v2953_v63 = vrot.slane %v7455_v28, 5  ;;  %v564_v41 = vshrl.u32 %v7677_v31, 16  ;;  %v567_v1 = vshll.u32 %v7677_v31, 16  ;;  %v7078_v45 = vld [vmem:[%s9070_s1 + $0x1b0] sm:$0xff]  }
  0x76   : > { %6355 = vmatmul.mubr.bf16.gmra.mrb[20].mxu1 %v5384_v57  ;;  %v557_v7 = vrot.slane %v556_v58, 4  ;;  %v2951_v10 = vsel %vm7575_vm5, %v5657_v55, %v2950_v24  ;;  %v2952_v11 = vrot.slane %v2950_v24, 4  ;;  %v573_v12 = vshll.u32 %v7686_v48, 16  ;;  %6613 = vmatpush3.bf16.msra.mxu0 %v7066_v30 }
  0x77   : > { %v552_v19 = vsel %vm7329_vm2, %v547_v6, %v551_v43  ;;  %v566_v13 = vrot.slane %v564_v41, 4  ;;  %v569_v28 = vrot.slane %v567_v1, 5  ;;  %v577_v8 = vshrl.u32 %v7686_v48, 16  ;;  %6614 = vmatprep.subr.bf16.mxu0 %v7070_v56  ;;  %v246_v43 = vld [vmem:[%s7297_s11 + $0xb0] sm:$0x1] }
  0x78   : > { %v562_v36 = vsel %vm7329_vm2, %v557_v7, %v561_v59  ;;  %v2954_v62 = vsel %vm7575_vm5, %v2952_v11, %v2953_v63  ;;  %v575_v18 = vrot.slane %v573_v12, 5  ;;  %v583_v26 = vshll.u32 %v245_v61, 16  ;;  %v7734_v41 = vld [vmem:[%s7297_s11 + $0xb4] sm:$0xf]  ;;  %v7739_v12 = vld [vmem:[%s7297_s11 + $0xb8] sm:$0xf] }
  0x79   : > { %v5385_v30 = vcombine.low %v552_v19, %v562_v36  ;;  %v5689_v34 = vcombine.low %v2951_v10, %v2954_v62  ;;  %v570_v33 = vor.u32 %v569_v28, %v566_v13  ;;  %v579_v46 = vrot.slane %v577_v8, 4  ;;  %v247_v19 = vld [vmem:[%s7297_s11 + $0xbc] sm:$0x1] }
  0x7a   : > { %v585_v38 = vrot.slane %v583_v26, 5  ;;  %v5658_v39 = vrot.slane %v5642_v15, 9  ;;  %v2957_v23 = vrot.slane %v7482_v14, 5  ;;  %v2960_v42 = vrot.slane %v7488_v22, 5  ;;  %6615 = vmatpush3.bf16.msra.mxu0 %v7070_v56  ;;  %v7082_v13 = vld [vmem:[%s9070_s1 + $0x1b8] sm:$0xff]  }
  0x7b   : > { %6358 = vmatprep.mubr.bf16.mxu1 %v5385_v30  ;;  %6582 = vmatprep.mubr.bf16.mxu0 %v5689_v34  ;;  %v571_v44 = vrot.slane %v570_v33, 4  ;;  %v580_v49 = vor.u32 %v579_v46, %v575_v18  ;;  %v588_v50 = vshrl.u32 %v7711_v27, 16  ;;  %v591_v52 = vshll.u32 %v7711_v27, 16  ;;  %v5644_v30 = vld [vmem:[%s7297_s11 + $0x60] sm:$0xe] }
  0x7c   : > { %v2958_v14 = vsel %vm7575_vm5, %v5658_v39, %v2957_v23  ;;  %v2959_v22 = vrot.slane %v2957_v23, 4  ;;  %v597_v51 = vshll.u32 %v7714_v29, 16  ;;  %v601_v55 = vshrl.u32 %v7714_v29, 16  ;;  %6616 = vmatprep.subr.bf16.mxu0 %v7074_v32  ;;  %v5574_v39 = vld [vmem:[%s7297_s11 + $0x70] sm:$0xf] }
  0x7d   : > { %v576_v56 = vsel %vm7329_vm2, %v571_v44, %v575_v18  ;;  %v581_v57 = vrot.slane %v580_v49, 4  ;;  %v590_v58 = vrot.slane %v588_v50, 4  ;;  %v593_v59 = vrot.slane %v591_v52, 5  ;;  %v7761_v44 = vld [vmem:[%s9070_s1 + $0x1c0] sm:$0xff]  }
  0x7e   : > { %v2961_v24 = vsel %vm7575_vm5, %v2959_v22, %v2960_v42  ;;  %v599_v61 = vrot.slane %v597_v51, 5  ;;  %v603_v6 = vrot.slane %v601_v55, 4  ;;  %v607_v63 = vshll.u32 %v246_v43, 16  ;;  %6617 = vmatpush3.bf16.msra.mxu0 %v7074_v32  ;;  %v5645_v43 = vld [vmem:[%s7297_s11 + $0x6c] sm:$0xe] }
  0x7f   : > { %v586_v1 = vsel %vm7329_vm2, %v581_v57, %v585_v38  ;;  %v5690_v7 = vcombine.low %v2958_v14, %v2961_v24  ;;  %v594_v10 = vor.u32 %v593_v59, %v590_v58  ;;  %v5659_v11 = vrot.slane %v5643_v53, 9  ;;  %6618 = vmatprep.subr.bf16.mxu0 %v7078_v45  ;;  %v5575_v55 = vld [vmem:[%s7297_s11 + $0x74] sm:$0x1]  ;;  %v5646_v24 = vld [vmem:[%s7297_s11 + $0x78] sm:$0xe] }
  0x80   : > { %v5386_v28 = vcombine.low %v576_v56, %v586_v1  ;;  %v604_v8 = vor.u32 %v603_v6, %v599_v61  ;;  %v609_v15 = vrot.slane %v607_v63, 5  ;;  %v2964_v32 = vrot.slane %v7513_v0, 5 }
  0x81   : > { %6583 = vmatmul.mubr.bf16.gmra.mrb[8].mxu0 %v5690_v7  ;;  %v595_v36 = vrot.slane %v594_v10, 4  ;;  %v2967_v62 = vrot.slane %v7525_v20, 5  ;;  %v612_v18 = vshrl.u32 %v7734_v41, 16  ;;  %v615_v26 = vshll.u32 %v7734_v41, 16 }
  0x82   : > { %6359 = vmatmul.mubr.bf16.gmra.mrb[24].mxu1 %v5386_v28  ;;  %v605_v34 = vrot.slane %v604_v8, 4  ;;  %v2965_v33 = vsel %vm7575_vm5, %v5659_v11, %v2964_v32  ;;  %v2966_v46 = vrot.slane %v2964_v32, 4  ;;  %v621_v38 = vshll.u32 %v7739_v12, 16  ;;  %6619 = vmatpush3.bf16.msra.mxu0 %v7078_v45  ;;  %v7774_v11 = vld [vmem:[%s7297_s11 + $0x7c] sm:$0xf] }
  0x83   : > { %v600_v0 = vsel %vm7329_vm2, %v595_v36, %v599_v61  ;;  %v614_v20 = vrot.slane %v612_v18, 4  ;;  %v617_v23 = vrot.slane %v615_v26, 5  ;;  %v625_v42 = vshrl.u32 %v7739_v12, 16  ;;  %6620 = vmatprep.subr.bf16.mxu0 %v7082_v13  ;;  %v7151_v36 = vld [vmem:[%s7297_s11] sm:$0xf] }
  0x84   : > { %v610_v49 = vsel %vm7329_vm2, %v605_v34, %v609_v15  ;;  %v2968_v50 = vsel %vm7575_vm5, %v2966_v46, %v2967_v62  ;;  %v623_v52 = vrot.slane %v621_v38, 5  ;;  %v631_v53 = vshll.u32 %v247_v19, 16  ;;  %v5580_v15 = vld [vmem:[%s7297_s11 + $0x88] sm:$0xf]  ;;  %v7789_v62 = vld [vmem:[%s7297_s11 + $0x4] sm:$0xf] }
  0x85   : > { %v5387_v45 = vcombine.low %v600_v0, %v610_v49  ;;  %v5691_v14 = vcombine.low %v2965_v33, %v2968_v50  ;;  %v618_v22 = vor.u32 %v617_v23, %v614_v20  ;;  %v627_v51 = vrot.slane %v625_v42, 4  ;;  %v5581_v26 = vld [vmem:[%s7297_s11 + $0x8c] sm:$0x1]  ;;  %v5584_v23 = vld [vmem:[%s7297_s11 + $0x98] sm:$0x1] }
  0x86   : > { %v633_v56 = vrot.slane %v631_v53, 5  ;;  %v5660_v57 = vrot.slane %v5644_v30, 9  ;;  %v2971_v58 = vrot.slane %v7540_v60, 5  ;;  %v2974_v59 = vrot.slane %v7549_v17, 5  ;;  %6621 = vmatpush3.bf16.msra.mxu0 %v7082_v13  ;;  %v7777_v17 = vld [vmem:[%s7297_s11 + $0x80] sm:$0x1] }
  0x87   : > { %6362 = vmatprep.mubr.bf16.mxu1 %v5387_v45  ;;  %6586 = vmatprep.mubr.bf16.mxu0 %v5691_v14  ;;  %v619_v61 = vrot.slane %v618_v22, 4  ;;  %v628_v6 = vor.u32 %v627_v51, %v623_v52  ;;  %v5661_v63 = vrot.slane %v5645_v43, 9  ;;  %v2978_v1 = vrot.slane %v5574_v39, 5  ;;  %v5647_v30 = vld [vmem:[%s7297_s11 + $0x84] sm:$0xe] }
  0x88   : > { %v2972_v7 = vsel %vm7575_vm5, %v5660_v57, %v2971_v58  ;;  %v2973_v10 = vrot.slane %v2971_v58, 4  ;;  %v2981_v60 = vrot.slane %v5575_v55, 5  ;;  %6654 = vmatprep.subr.bf16.mxu0 %v7761_v44  ;;  %v5397_v18 = vcombine.low %v7151_v36, %v7789_v62  ;;  %v5583_v39 = vld [vmem:[%s7297_s11 + $0x94] sm:$0xf]  ;;  %v5648_v42 = vld [vmem:[%s7297_s11 + $0x90] sm:$0xe] }
  0x89   : > { %v624_v19 = vsel %vm7329_vm2, %v619_v61, %v623_v52  ;;  %v629_v13 = vrot.slane %v628_v6, 4  ;;  %v2979_v28 = vsel %vm7575_vm5, %v5661_v63, %v2978_v1  ;;  %v2980_v8 = vrot.slane %v2978_v1, 4  ;;  %v5649_v50 = vld [vmem:[%s7297_s11 + $0x9c] sm:$0xe]  ;;  %v5586_v14 = vld [vmem:[%s7297_s11 + $0xa0] sm:$0xf] }
  0x8a   : > { %v2975_v32 = vsel %vm7575_vm5, %v2973_v10, %v2974_v59  ;;  %v5662_v38 = vrot.slane %v5646_v24, 9  ;;  %v2985_v43 = vrot.slane %v7774_v11, 5  ;;  %v2988_v49 = vrot.slane %v7777_v17, 5  ;;  %v5587_v22 = vld [vmem:[%s7297_s11 + $0xa4] sm:$0x1] }
  0x8b   : > { %v634_v34 = vsel %vm7329_vm2, %v629_v13, %v633_v56  ;;  %v5692_v33 = vcombine.low %v2972_v7, %v2975_v32  ;;  %v2982_v46 = vsel %vm7575_vm5, %v2980_v8, %v2981_v60  ;;  %v5663_v52 = vrot.slane %v5647_v30, 9  ;;  %v5589_v59 = vld [vmem:[%s7297_s11 + $0xac] sm:$0xf]  ;;  %v7813_v61 = vld [vmem:[%s7297_s11 + $0x10] sm:$0xf] }
  0x8c   : > { %v5388_v0 = vcombine.low %v624_v19, %v634_v34  ;;  %v5693_v20 = vcombine.low %v2979_v28, %v2982_v46  ;;  %v2992_v53 = vrot.slane %v5580_v15, 5  ;;  %v2995_v45 = vrot.slane %v5581_v26, 5  ;;  %v7153_v24 = vld [vmem:[%s7297_s11 + $0xc] sm:$0xf]  ;;  %v7155_v8 = vld [vmem:[%s7297_s11 + $0x18] sm:$0xf] }
  0x8d   : > { %6587 = vmatmul.mubr.bf16.gmra.mrb[12].mxu0 %v5692_v33  ;;  %v2986_v51 = vsel %vm7575_vm5, %v5662_v38, %v2985_v43  ;;  %v2987_v55 = vrot.slane %v2985_v43, 4  ;;  %v2999_v58 = vrot.slane %v5583_v39, 5  ;;  %v5398_v6 = vcombine.low %v7153_v24, %v7813_v61  ;;  %v7073_v19 = vld [vmem:[%s9070_s1 + $0x88] sm:$0xff]   ;;  %v7825_v15 = vld [vmem:[%s7297_s11 + $0x1c] sm:$0xf] }
  0x8e   : > { %6363 = vmatmul.mubr.bf16.gmra.mrb[28].mxu1 %v5388_v0  ;;  %6590 = vmatprep.mubr.bf16.mxu0 %v5693_v20  ;;  %v2993_v56 = vsel %vm7575_vm5, %v5663_v52, %v2992_v53  ;;  %v2994_v57 = vrot.slane %v2992_v53, 4  ;;  %v5664_v1 = vrot.slane %v5648_v42, 9  ;;  %v3002_v7 = vrot.slane %v5584_v23, 5  ;;  %v5590_v30 = vld [vmem:[%s7297_s11 + $0xb0] sm:$0x1] }
  0x8f   : > { %6382 = vmatprep.mubr.bf16.mxu1 %v5397_v18  ;;  %v2989_v63 = vsel %vm7575_vm5, %v2987_v55, %v2988_v49  ;;  %v3001_v13 = vrot.slane %v2999_v58, 4  ;;  %v5665_v28 = vrot.slane %v5649_v50, 9  ;;  %v5399_v32 = vcombine.low %v7155_v8, %v7825_v15  ;;  %v5650_v34 = vld [vmem:[%s7297_s11 + $0xa8] sm:$0xe]  ;;  %v5592_v33 = vld [vmem:[%s7297_s11 + $0xb8] sm:$0xf] }
  0x90   : > { %v5694_v10 = vcombine.low %v2986_v51, %v2989_v63  ;;  %v2996_v60 = vsel %vm7575_vm5, %v2994_v57, %v2995_v45  ;;  %v3006_v18 = vrot.slane %v5586_v14, 5  ;;  %v3009_v26 = vrot.slane %v5587_v22, 5  ;;  %v5593_v20 = vld [vmem:[%s7297_s11 + $0xbc] sm:$0x1]  ;;  %v5651_v23 = vld [vmem:[%s7297_s11 + $0xb4] sm:$0xe] }
  0x91   : > { %v5695_v36 = vcombine.low %v2993_v56, %v2996_v60  ;;  %v3013_v38 = vrot.slane %v5589_v59, 5  ;;  %v3000_v39 = vsel %vm7575_vm5, %v5664_v1, %v2999_v58  ;;  %v3003_v0 = vsel %vm7575_vm5, %v3001_v13, %v3002_v7  ;;  %v7077_v50 = vld [vmem:[%s9070_s1 + $0x90] sm:$0xff]   ;;  %v5595_v53 = vld [vmem:[%s7297_s11 + $0xc4] sm:$0xf]  ;;  %v7848_v51 = vld [vmem:[%s7297_s11 + $0x28] sm:$0xf] }
  0x92   : > { %v3008_v46 = vrot.slane %v3006_v18, 4  ;;  %v3007_v42 = vsel %vm7575_vm5, %v5665_v28, %v3006_v18  ;;  %v3020_v49 = vrot.slane %v5592_v33, 5  ;;  %v5666_v52 = vrot.slane %v5650_v34, 9  ;;  %v7157_v22 = vld [vmem:[%s7297_s11 + $0x24] sm:$0xf]  ;;  %v7081_v1 = vld [vmem:[%s9070_s1 + $0x98] sm:$0xff]  }
  0x93   : > { %v5696_v45 = vcombine.low %v3000_v39, %v3003_v0  ;;  %v3015_v14 = vrot.slane %v3013_v38, 4  ;;  %v5400_v55 = vcombine.low %v7157_v22, %v7848_v51  ;;  %v7159_v57 = vld [vmem:[%s7297_s11 + $0x30] sm:$0xf]  ;;  %v7853_v58 = vld [vmem:[%s7297_s11 + $0x34] sm:$0xf]  ;;  %v5667_v24 = vrot.slane %v5651_v23, 9 }
  0x94   : > { %v3010_v43 = vsel %vm7575_vm5, %v3008_v46, %v3009_v26  ;;  %v5401_v59 = vcombine.low %v7159_v57, %v7853_v58  ;;  %v3023_v63 = vrot.slane %v5593_v20, 5  ;;  %v5652_v7 = vld [vmem:[%s7297_s11 + $0xc0] sm:$0xe]  ;;  %v3014_v60 = vsel %vm7575_vm5, %v5666_v52, %v3013_v38  ;;  %v5596_v8 = vld [vmem:[%s7297_s11 + $0xc8] sm:$0x1]  ;;  %v7084_v22 = vld [vmem:[%s7297_s11 + $0x18] sm:$0xff]  }
  0x95   : > { %6591 = vmatmul.mubr.bf16.gmra.mrb[16].mxu0 %v5694_v10  ;;  %v5697_v56 = vcombine.low %v3007_v42, %v3010_v43  ;;  %v3027_v10 = vrot.slane %v5595_v53, 5  ;;  %v3021_v13 = vsel %vm7575_vm5, %v5667_v24, %v3020_v49  ;;  %v5668_v18 = vrot.slane %v5652_v7, 9  ;;  %v7161_v26 = vld [vmem:[%s7297_s11 + $0x3c] sm:$0xf]  ;;  %v7163_v39 = vld [vmem:[%s7297_s11 + $0x48] sm:$0xf] }
  0x96   : > { %6383 = vmatmul.mubr.bf16.vlgmr.msra.gmra.mrb[0].mxu1 %v5398_v6  ;;  %6594 = vmatprep.mubr.bf16.mxu0 %v5695_v36  ;;  %v3022_v6 = vrot.slane %v3020_v49, 4  ;;  %v3030_v38 = vrot.slane %v5596_v8, 5  ;;  %v7879_v0 = vld [vmem:[%s7297_s11 + $0x4c] sm:$0xf]  ;;  %v7098_v49 = vld [vmem:[%s9070_s1 + $0xb0] sm:$0xff]   ;;  %v2380_v52 = vshrl.u32 %v7774_v11, 16 }
  0x97   : > { %6415 = vmatpush3.bf16.msra.mxu1 %v7499_v4  ;;  %6386 = vmatprep.mubr.bf16.mxu1 %v5399_v32  ;;  %v3016_v4 = vrot.slane %v5590_v30, 5  ;;  %v7086_v32 = vld [vmem:[%s9070_s1 + $0xa0] sm:$0xff]   ;;  %v3029_v46 = vrot.slane %v3027_v10, 4  ;;  %v5403_v20 = vcombine.low %v7163_v39, %v7879_v0  ;;  %v7092_v23 = vld [vmem:[%s9070_s1 + $0xa8] sm:$0xff]   ;;  %v3028_v42 = vsel %vm7575_vm5, %v5668_v18, %v3027_v10  ;;  %v7090_v18 = vld [vmem:[%s7297_s11 + $0x30] sm:$0xff]  }
  0x98   : > { %6416 = vmatprep.subr.bf16.mxu1 %v7073_v19  ;;  %v3024_v28 = vsel %vm7575_vm5, %v3022_v6, %v3023_v63  ;;  %v7874_v30 = vld [vmem:[%s7297_s11 + $0x40] sm:$0xf]  ;;  %v7907_v57 = vrot.slane %v2380_v52, 4  ;;  %v7087_v6 = vld [vmem:[%s7297_s11 + $0x24] sm:$0xff]   ;;  %v1290_v7 = vrot.slane %v7813_v61, 5  ;;  %v2386_v8 = vshll.u32 %v7777_v17, 16 }
  0x99   : > { %v5402_v34 = vcombine.low %v7161_v26, %v7874_v30  ;;  %v5699_v33 = vcombine.low %v3021_v13, %v3024_v28  ;;  %v3031_v43 = vsel %vm7575_vm5, %v3029_v46, %v3030_v38  ;;  %v1230_v63 = vld [vmem:[%s7297_s11] sm:$0xe]  ;;  %v1231_v10 = vld [vmem:[%s7297_s11 + $0xc] sm:$0xe]  ;;  %v1297_v13 = vrot.slane %v7825_v15, 5 }
  0x9a   : > { %v5700_v53 = vcombine.low %v3028_v42, %v3031_v43  ;;  %v1233_v61 = vld [vmem:[%s7297_s11 + $0x24] sm:$0xe]  ;;  %v5408_v15 = vcombine.low %v7627_v16, %v7635_v40  ;;  %v5409_v26 = vcombine.low %v7656_v2, %v7659_v3  ;;  %v5421_v17 = vrot.slane %v1230_v63, 9  ;;  %v7169_v38 = vld [vmem:[%s7297_s11 + $0x20] sm:$0x1]  ;;  %v7099_v2 = vld [vmem:[%s7297_s11 + $0x54] sm:$0xff]  }
  0x9b   : > { %6417 = vmatpush3.bf16.msra.mxu1 %v7073_v19  ;;  %v3017_v19 = vsel %vm7575_vm5, %v3015_v14, %v3016_v4  ;;  %v7896_v14 = vld [vmem:[%s7297_s11 + $0x58] sm:$0xf]  ;;  %v1299_v46 = vrot.slane %v1297_v13, 4  ;;  %v1300_v39 = vrot.slane %v7169_v38, 5  ;;  %v7170_v43 = vld [vmem:[%s7297_s11 + $0x2c] sm:$0x1] }
  0x9c   : > { %6418 = vmatprep.subr.bf16.mxu1 %v7077_v50  ;;  %v5698_v36 = vcombine.low %v3014_v60, %v3017_v19  ;;  %v7922_v60 = vld [vmem:[%s9070_s1 + $0xc0] sm:$0xff]   ;;  %v1232_v19 = vld [vmem:[%s7297_s11 + $0x18] sm:$0xe]  ;;  %v7173_v38 = vld [vmem:[%s7297_s11 + $0x50] sm:$0x1]  ;;  %v1332_v16 = vrot.slane %v7896_v14, 5 }
  0x9d   : > { %6595 = vmatmul.mubr.bf16.gmra.mrb[20].mxu0 %v5696_v45  ;;  %v7165_v45 = vld [vmem:[%s7297_s11 + $0x54] sm:$0xf]  ;;  %v8045_v40 = vld [vmem:[%s7297_s11 + $0x64] sm:$0xf] }
  0x9e   : > { %6387 = vmatmul.mubr.bf16.gmra.mrb[4].mxu1 %v5400_v55  ;;  %6598 = vmatprep.mubr.bf16.mxu0 %v5697_v56  ;;  %v5404_v4 = vcombine.low %v7165_v45, %v7896_v14  ;;  %v5405_v55 = vcombine.low %v7553_v25, %v7556_v35  ;;  %v7104_v56 = vld [vmem:[%s9070_s1 + $0xb8] sm:$0xff]   ;;  %v7168_v25 = vld [vmem:[%s7297_s11 + $0x14] sm:$0x1]  ;;  %v7102_v3 = vld [vmem:[%s7297_s11 + $0x60] sm:$0xff]  }
  0x9f   : > { %6390 = vmatprep.mubr.bf16.mxu1 %v5401_v59  ;;  %6419 = vmatpush3.bf16.msra.mxu1 %v7077_v50  ;;  %v2376_v50 = vshll.u32 %v7774_v11, 16  ;;  %v7910_v59 = vld [vmem:[%s7297_s11 + $0x8] sm:$0x1]  ;;  %v1293_v35 = vrot.slane %v7168_v25, 5 }
  0xa0   : > { %6420 = vmatprep.subr.bf16.mxu1 %v7081_v1  ;;  %v1286_v24 = vrot.slane %v7910_v59, 5 }
  0xa1   : > { %v7905_v11 = vrot.slane %v2376_v50, 5 }
  0xa3   : > { %6421 = vmatpush3.bf16.msra.mxu1 %v7081_v1  ;;  %v1283_v1 = vrot.slane %v7789_v62, 5  ;;  %v5406_v62 = vcombine.low %v7571_v5, %v7583_v21  ;;  %v5422_v21 = vrot.slane %v1231_v10, 9  ;;  %v5781_v10 = vld [vmem:[%s7297_s11 + $0x18] sm:$0xf] }
  0xa4   : > { %6422 = vmatprep.subr.bf16.mxu1 %v7086_v32 }
  0xa5   : > { %6599 = vmatmul.mubr.bf16.gmra.mrb[24].mxu0 %v5698_v36  ;;  %v5407_v36 = vcombine.low %v7594_v47, %v7605_v54  ;;  %v1285_v5 = vrot.slane %v1283_v1, 4  ;;  %v7094_v47 = vld [vmem:[%s9070_s1 + $0x1c8] sm:$0xff]   ;;  %v5423_v54 = vrot.slane %v1232_v19, 9  ;;  %v7965_v59 = vsel %vm7575_vm5, %v5421_v17, %v1283_v1  ;;  %v5782_v19 = vld [vmem:[%s7297_s11 + $0x1c] sm:$0xf] }
  0xa6   : > { %6391 = vmatmul.mubr.bf16.gmra.mrb[8].mxu1 %v5402_v34  ;;  %6602 = vmatprep.mubr.bf16.mxu0 %v5699_v33  ;;  %v1311_v34 = vrot.slane %v7853_v58, 5  ;;  %v1292_v33 = vrot.slane %v1290_v7, 4  ;;  %v5424_v58 = vrot.slane %v1233_v61, 9  ;;  %v1325_v1 = vrot.slane %v7879_v0, 5  ;;  %v7096_v0 = vld [vmem:[%s7297_s11 + $0x48] sm:$0xff]  }
  0xa7   : > { %6394 = vmatprep.mubr.bf16.mxu1 %v5403_v20  ;;  %6423 = vmatpush3.bf16.msra.mxu1 %v7086_v32  ;;  %v1304_v32 = vrot.slane %v7848_v51, 5  ;;  %v1234_v51 = vld [vmem:[%s7297_s11 + $0x30] sm:$0xe]  ;;  %v5410_v20 = vcombine.low %v7677_v31, %v7686_v48  ;;  %v7973_v25 = vsel %vm7575_vm5, %v1285_v5, %v1286_v24  ;;  %v7981_v63 = vsel %vm7575_vm5, %v5423_v54, %v1297_v13  ;;  %v1236_v13 = vld [vmem:[%s7297_s11 + $0x48] sm:$0xe] }
  0xa8   : > { %6424 = vmatprep.subr.bf16.mxu1 %v7092_v23  ;;  %v5425_v50 = vrot.slane %v1234_v51, 9  ;;  %v1313_v52 = vrot.slane %v1311_v34, 4  ;;  %v3790_v5 = vshrl.u32 %v5781_v10, 16  ;;  %v3803_v51 = vshrl.u32 %v5782_v19, 16  ;;  %v7105_v48 = vld [vmem:[%s7297_s11 + $0x6c] sm:$0xff]  }
  0xa9   : > { %v1306_v42 = vrot.slane %v1304_v32, 4  ;;  %v7993_v24 = vsel %vm7575_vm5, %v5424_v58, %v1304_v32  ;;  %v7172_v32 = vld [vmem:[%s7297_s11 + $0x44] sm:$0x1]  ;;  %v5427_v54 = vrot.slane %v1236_v13, 9  ;;  %v5785_v13 = vld [vmem:[%s7297_s11 + $0x28] sm:$0xf] }
  0xaa   : > { %v8003_v61 = vsel %vm7575_vm5, %v5425_v50, %v1311_v34  ;;  %v1321_v17 = vrot.slane %v7172_v32, 5  ;;  %v5783_v50 = vld [vmem:[%s7297_s11 + $0x20] sm:$0x1]  ;;  %v1238_v32 = vld [vmem:[%s7297_s11 + $0x60] sm:$0xe] }
  0xab   : > { %6425 = vmatpush3.bf16.msra.mxu1 %v7092_v23  ;;  %v5411_v23 = vcombine.low %v7711_v27, %v7714_v29 }
  0xac   : > { %6426 = vmatprep.subr.bf16.mxu1 %v7098_v49 }
  0xad   : > { %6603 = vmatmul.mubr.bf16.gmra.mrb[28].mxu0 %v5700_v53  ;;  %v7171_v53 = vld [vmem:[%s7297_s11 + $0x38] sm:$0x1] }
  0xae   : > { %6395 = vmatmul.mubr.bf16.gmra.mrb[12].mxu1 %v5404_v4  ;;  %6622 = vmatprep.mubr.bf16.mxu0 %v7084_v22  ;;  %v1314_v45 = vrot.slane %v7171_v53, 5  ;;  %v1235_v4 = vld [vmem:[%s7297_s11 + $0x3c] sm:$0xe]  ;;  %v1318_v22 = vrot.slane %v7874_v30, 5  ;;  %v7969_v30 = vsel %vm7575_vm5, %v5422_v21, %v1290_v7  ;;  %v3793_v21 = vshll.u32 %v5781_v10, 16  ;;  %v7110_v53 = vld [vmem:[%s9070_s1 + $0x1e0] sm:$0xff]  }
  0xaf   : > { %6398 = vmatprep.mubr.bf16.mxu1 %v5405_v55  ;;  %6427 = vmatpush3.bf16.msra.mxu1 %v7098_v49  ;;  %v1307_v49 = vrot.slane %v7170_v43, 5  ;;  %v7956_v55 = vrot.slane %v2386_v8, 5  ;;  %v7093_v7 = vld [vmem:[%s7297_s11 + $0x3c] sm:$0xff]   ;;  %v7989_v8 = vsel %vm7575_vm5, %v1299_v46, %v1300_v39  ;;  %v1327_v46 = vrot.slane %v1325_v1, 4  ;;  %v5787_v43 = vld [vmem:[%s7297_s11 + $0x30] sm:$0xf] }
  0xb0   : > { %6428 = vmatprep.subr.bf16.mxu1 %v7104_v56  ;;  %v1328_v39 = vrot.slane %v7173_v38, 5  ;;  %v3792_v10 = vrot.slane %v3790_v5, 4 }
  0xb1   : > { %9091 = vst [vmem:[#allocation2_spill] sm:$0xff] %v7956_v55 }
  0xb3   : > { %6429 = vmatpush3.bf16.msra.mxu1 %v7104_v56  ;;  %v7100_v56 = vld [vmem:[%s9070_s1 + $0x1d0] sm:$0xff]  }
  0xb4   : > { %6462 = vmatprep.subr.bf16.mxu1 %v7922_v60 }
  0xb5   : > { %6623 = vmatmul.mubr.bf16.vlgmr.msra.gmra.mrb[0].mxu0 %v7087_v6  ;;  %v7977_v6 = vsel %vm7575_vm5, %v1292_v33, %v1293_v35  ;;  %v7997_v35 = vsel %vm7575_vm5, %v1306_v42, %v1307_v49  ;;  %v3799_v33 = vshll.u32 %v5782_v19, 16  ;;  %v3795_v19 = vrot.slane %v3793_v21, 5  ;;  %v1239_v21 = vld [vmem:[%s7297_s11 + $0x6c] sm:$0xe] }
  0xb6   : > { %6399 = vmatmul.mubr.bf16.gmra.mrb[16].mxu1 %v5406_v62  ;;  %6655 = vmatpush3.bf16.msra.mxu0 %v7761_v44  ;;  %v5426_v62 = vrot.slane %v1235_v4, 9  ;;  %v5430_v58 = vrot.slane %v1239_v21, 9 }
  0xb7   : > { %6402 = vmatprep.mubr.bf16.mxu1 %v5407_v36  ;;  %6626 = vmatprep.mubr.bf16.mxu0 %v7090_v18  ;;  %v8007_v36 = vsel %vm7575_vm5, %v1313_v52, %v1314_v45  ;;  %v1320_v18 = vrot.slane %v1318_v22, 4  ;;  %v5784_v52 = vld [vmem:[%s7297_s11 + $0x24] sm:$0xf]  ;;  %v3827_v45 = vshrl.u32 %v5785_v13, 16 }
  0xb8   : > { %6656 = vmatprep.subr.bf16.mxu0 %v7094_v47  ;;  %v8024_v49 = vsel %vm7575_vm5, %v5426_v62, %v1318_v22  ;;  %v8041_v22 = vld [vmem:[%s7297_s11 + $0x54] sm:$0xe]  ;;  %v3805_v62 = vrot.slane %v3803_v51, 4  ;;  %v3814_v38 = vshrl.u32 %v5784_v52, 16  ;;  %v3817_v28 = vshll.u32 %v5784_v52, 16 }
  0xb9   : > { %v8038_v4 = vsel %vm7575_vm5, %v1320_v18, %v1321_v17  ;;  %v3809_v17 = vshll.u32 %v5783_v50, 16  ;;  %v5428_v5 = vrot.slane %v8041_v22, 9  ;;  %v7114_v50 = vld [vmem:[%s9070_s1 + $0x1e8] sm:$0xff]   ;;  %v1334_v52 = vrot.slane %v1332_v16, 4 }
  0xba   : > { %6657 = vmatpush3.bf16.msra.mxu0 %v7094_v47  ;;  %v7106_v47 = vld [vmem:[%s9070_s1 + $0x1d8] sm:$0xff]   ;;  %v3796_v22 = vor.u32 %v3795_v19, %v3792_v10  ;;  %v3816_v34 = vrot.slane %v3814_v38, 4  ;;  %v3819_v44 = vrot.slane %v3817_v28, 5  ;;  %v7178_v10 = vld [vmem:[%s7297_s11 + $0x74] sm:$0x1]  ;;  %v3829_v28 = vrot.slane %v3827_v45, 4 }
  0xbb   : > { %6658 = vmatprep.subr.bf16.mxu0 %v7100_v56  ;;  %v8079_v42 = vrot.slane %v3809_v17, 5  ;;  %v1349_v19 = vrot.slane %v7178_v10, 5  ;;  %v3838_v38 = vshrl.u32 %v5787_v43, 16  ;;  %v8104_v27 = vsel %vm7575_vm5, %v5428_v5, %v1332_v16 }
  0xbc   : > { %v3797_v21 = vrot.slane %v3796_v22, 4 }
  0xbd   : > { %6627 = vmatmul.mubr.bf16.gmra.mrb[4].mxu0 %v7093_v7  ;;  %v8051_v7 = vrot.slane %v3799_v33, 5  ;;  %v7176_v33 = vld [vmem:[%s7297_s11 + $0x70] sm:$0xf] }
  0xbe   : > { %6403 = vmatmul.mubr.bf16.gmra.mrb[20].mxu1 %v5408_v15  ;;  %6630 = vmatprep.mubr.bf16.mxu0 %v7096_v0  ;;  %v1339_v15 = vrot.slane %v8045_v40, 5  ;;  %v7175_v0 = vld [vmem:[%s7297_s11 + $0x5c] sm:$0x1]  ;;  %v1346_v51 = vrot.slane %v7176_v33, 5 }
  0xbf   : > { %6406 = vmatprep.mubr.bf16.mxu1 %v5409_v26  ;;  %6659 = vmatpush3.bf16.msra.mxu0 %v7100_v56  ;;  %v1335_v18 = vrot.slane %v7175_v0, 5  ;;  %v8060_v26 = vsel %vm7575_vm5, %v5427_v54, %v1325_v1  ;;  %v8064_v56 = vsel %vm7575_vm5, %v1327_v46, %v1328_v39  ;;  %v7177_v1 = vld [vmem:[%s7297_s11 + $0x68] sm:$0x1]  ;;  %v3823_v0 = vshll.u32 %v5785_v13, 16  ;;  %v7122_v40 = vld [vmem:[%s9070_s1 + $0x1f8] sm:$0xff]  }
  0xc0   : > { %6660 = vmatprep.subr.bf16.mxu0 %v7106_v47  ;;  %v1342_v54 = vrot.slane %v7177_v1, 5  ;;  %v5429_v46 = vrot.slane %v1238_v32, 9  ;;  %v1341_v39 = vrot.slane %v1339_v15, 4  ;;  %v3806_v33 = vor.u32 %v3805_v62, %v8051_v7  ;;  %v5788_v1 = vld [vmem:[%s7297_s11 + $0x34] sm:$0xf] }
  0xc1   : > { %v1348_v32 = vrot.slane %v1346_v51, 4  ;;  %v5786_v62 = vld [vmem:[%s7297_s11 + $0x2c] sm:$0x1]  ;;  %v8091_v17 = vrot.slane %v3823_v0, 5  ;;  %v3847_v13 = vshll.u32 %v5788_v1, 16  ;;  %v3851_v31 = vshrl.u32 %v5788_v1, 16 }
  0xc2   : > { %v3807_v10 = vrot.slane %v3806_v33, 4  ;;  %v8108_v29 = vsel %vm7575_vm5, %v1334_v52, %v1335_v18  ;;  %v8115_v45 = vsel %vm7575_vm5, %v5429_v46, %v1339_v15  ;;  %v8119_v14 = vsel %vm7575_vm5, %v1341_v39, %v1342_v54  ;;  %v1240_v18 = vld [vmem:[%s7297_s11 + $0x78] sm:$0xe] }
  0xc3   : > { %6661 = vmatpush3.bf16.msra.mxu0 %v7106_v47  ;;  %v8123_v16 = vsel %vm7575_vm5, %v5430_v58, %v1346_v51  ;;  %v8133_v15 = vsel %vm7575_vm5, %v1348_v32, %v1349_v19  ;;  %v3830_v5 = vor.u32 %v3829_v28, %v8091_v17  ;;  %v3840_v52 = vrot.slane %v3838_v38, 4  ;;  %v5790_v58 = vld [vmem:[%s7297_s11 + $0x3c] sm:$0xf]  ;;  %v5791_v51 = vld [vmem:[%s7297_s11 + $0x40] sm:$0xf] }
  0xc4   : > { %6662 = vmatprep.subr.bf16.mxu0 %v7110_v53  ;;  %v3802_v0 = vsel %vm7329_vm2, %v3797_v21, %v8051_v7  ;;  %v3812_v46 = vsel %vm7329_vm2, %v3807_v10, %v8079_v42  ;;  %v8144_v39 = vrot.slane %v3847_v13, 5  ;;  %v3853_v22 = vrot.slane %v3851_v31, 4  ;;  %v7180_v19 = vld [vmem:[%s7297_s11 + $0x80] sm:$0x1]  ;;  %v8303_v47 = vld [vmem:[%s7297_s11 + $0x68] sm:$0x1] }
  0xc5   : > { %6631 = vmatmul.mubr.bf16.gmra.mrb[8].mxu0 %v7099_v2  ;;  %v3841_v2 = vshll.u32 %v5787_v43, 16  ;;  %v3833_v43 = vshll.u32 %v5786_v62, 16  ;;  %v5431_v32 = vrot.slane %v1240_v18, 9  ;;  %v1241_v62 = vld [vmem:[%s7297_s11 + $0x84] sm:$0xe]  ;;  %v3862_v28 = vshrl.u32 %v5790_v58, 16 }
  0xc6   : > { %6407 = vmatmul.mubr.bf16.gmra.mrb[24].mxu1 %v5410_v20  ;;  %6634 = vmatprep.mubr.bf16.mxu0 %v7102_v3  ;;  %v7118_v20 = vld [vmem:[%s9070_s1 + $0x1f0] sm:$0xff]   ;;  %v7179_v3 = vld [vmem:[%s7297_s11 + $0x7c] sm:$0xf]  ;;  %v3865_v7 = vshll.u32 %v5790_v58, 16  ;;  %v3871_v38 = vshll.u32 %v5791_v51, 16  ;;  %v9092_v42 = vcombine.low %v7734_v41, %v7739_v12  ;;  %v8155_v13 = vrot.slane %v3830_v5, 4 }
  0xc7   : > { %6410 = vmatprep.mubr.bf16.mxu1 %v5411_v23  ;;  %6663 = vmatpush3.bf16.msra.mxu0 %v7110_v53  ;;  %v3820_v23 = vor.u32 %v3819_v44, %v3816_v34  ;;  %v7107_v53 = vld [vmem:[%s7297_s11 + $0x78] sm:$0xff]   ;;  %v1353_v44 = vrot.slane %v7179_v3, 5  ;;  %v3843_v54 = vrot.slane %v3841_v2, 5  ;;  %v8148_v1 = vrot.slane %v3833_v43, 5  ;;  %v8160_v21 = vld [vmem:[%s9070_s1 + $0x200] sm:$0xff]   ;;  %9100 = vst [vmem:[#allocation5_spill] sm:$0xff] %v8303_v47 }
  0xc8   : > { %6664 = vmatprep.subr.bf16.mxu0 %v7114_v50  ;;  %v5789_v34 = vld [vmem:[%s7297_s11 + $0x38] sm:$0x1]  ;;  %v3875_v2 = vshrl.u32 %v5791_v51, 16  ;;  %v7109_v43 = vld [vmem:[%s7297_s11 + $0x84] sm:$0xff]   ;;  %v3854_v12 = vor.u32 %v3853_v22, %v8144_v39  ;;  %v3867_v58 = vrot.slane %v3865_v7, 5  ;;  %v8182_v51 = vrot.slane %v3871_v38, 5 }
  0xc9   : > { %v8146_v33 = vrot.slane %v3820_v23, 4  ;;  %v1355_v10 = vrot.slane %v1353_v44, 4  ;;  %v3844_v31 = vor.u32 %v3843_v54, %v3840_v52  ;;  %v9093_v23 = vcombine.low %v7965_v59, %v7973_v25  ;;  %v7181_v18 = vld [vmem:[%s7297_s11 + $0x88] sm:$0xf]  ;;  %v5792_v5 = vld [vmem:[%s7297_s11 + $0x44] sm:$0x1] }
  0xca   : > { %v1360_v3 = vrot.slane %v7181_v18, 5  ;;  %v8173_v59 = vcombine.low %v3802_v0, %v3812_v46  ;;  %v5793_v52 = vld [vmem:[%s7297_s11 + $0x48] sm:$0xf]  ;;  %v3864_v54 = vrot.slane %v3862_v28, 4  ;;  %v3877_v22 = vrot.slane %v3875_v2, 4 }
  0xcb   : > { %6665 = vmatpush3.bf16.msra.mxu0 %v7114_v50  ;;  %v1356_v50 = vrot.slane %v7180_v19, 5  ;;  %v7111_v19 = vld [vmem:[%s7297_s11 + $0x90] sm:$0xff]   ;;  %v3826_v0 = vsel %vm7329_vm2, %v8146_v33, %v8091_v17  ;;  %v3845_v46 = vrot.slane %v3844_v31, 4  ;;  %v3836_v28 = vsel %vm7329_vm2, %v8155_v13, %v8148_v1  ;;  %v8204_v33 = vld [vmem:[%s7297_s11 + $0x58] sm:$0xf]  ;;  %v7112_v31 = vld [vmem:[%s9070_s1 + $0xc8] sm:$0xff]  }
  0xcc   : > { %6666 = vmatprep.subr.bf16.mxu0 %v7118_v20  ;;  %v3855_v38 = vrot.slane %v3854_v12, 4  ;;  %v1362_v2 = vrot.slane %v1360_v3, 4  ;;  %v5796_v17 = vld [vmem:[%s7297_s11 + $0x54] sm:$0xf]  ;;  %v3881_v1 = vshll.u32 %v5792_v5, 16  ;;  %v3886_v13 = vshrl.u32 %v5793_v52, 16 }
  0xcd   : > { %6635 = vmatmul.mubr.bf16.gmra.mrb[12].mxu0 %v7105_v48  ;;  %v3857_v48 = vshll.u32 %v5789_v34, 16  ;;  %v8200_v7 = vsel %vm7575_vm5, %v1355_v10, %v1356_v50  ;;  %v3889_v50 = vshll.u32 %v5793_v52, 16  ;;  %v3868_v10 = vor.u32 %v3867_v58, %v3864_v54  ;;  %v7113_v54 = vld [vmem:[%s7297_s11 + $0x9c] sm:$0xff]   ;;  %v7187_v41 = vld [vmem:[%s7297_s11 + $0xac] sm:$0xf] }
  0xce   : > { %6411 = vmatmul.mubr.bf16.gmra.mrb[28].mxu1 %v9092_v42  ;;  %6638 = vmatprep.mubr.bf16.mxu0 %v7107_v53  ;;  %v5432_v53 = vrot.slane %v1241_v62, 9  ;;  %v7182_v42 = vld [vmem:[%s7297_s11 + $0x8c] sm:$0x1]  ;;  %v3919_v5 = vshll.u32 %v8204_v33, 16  ;;  %v9095_v52 = vcombine.low %v7981_v63, %v7989_v8  ;;  %v8240_v63 = vld [vmem:[%s7297_s11 + $0x50] sm:$0x1] }
  0xcf   : > { %6430 = vmatprep.mubr.bf16.mxu1 %v9093_v23  ;;  %6667 = vmatpush3.bf16.msra.mxu0 %v7118_v20  ;;  %v8179_v20 = vsel %vm7575_vm5, %v5431_v32, %v1353_v44  ;;  %v3859_v62 = vrot.slane %v3857_v48, 5  ;;  %v1363_v23 = vrot.slane %v7182_v42, 5  ;;  %v1242_v44 = vld [vmem:[%s7297_s11 + $0x90] sm:$0xe]  ;;  %v8192_v32 = vld [vmem:[%s7297_s11 + $0x4c] sm:$0xf]  ;;  %v3878_v48 = vor.u32 %v3877_v22, %v8182_v51 }
  0xd0   : > { %6668 = vmatprep.subr.bf16.mxu0 %v7122_v40  ;;  %v3895_v12 = vshll.u32 %v8192_v32, 16  ;;  %v3899_v18 = vshrl.u32 %v8192_v32, 16  ;;  %v9094_v42 = vcombine.low %v7969_v30, %v7977_v6  ;;  %v7116_v30 = vld [vmem:[%s9070_s1 + $0xd0] sm:$0xff]   ;;  %v3850_v6 = vsel %vm7329_vm2, %v3845_v46, %v8144_v39  ;;  %v7115_v8 = vld [vmem:[%s7297_s11 + $0xa8] sm:$0xff]   ;;  %v8247_v39 = vld [vmem:[%s7297_s11 + $0x5c] sm:$0x1] }
  0xd1   : > { %v3860_v58 = vsel %vm7329_vm2, %v3855_v38, %v3859_v62  ;;  %v5433_v22 = vrot.slane %v1242_v44, 9  ;;  %v3891_v25 = vrot.slane %v3889_v50, 5  ;;  %9096 = vst [vmem:[#allocation3_spill] sm:$0xff] %v8247_v39  ;;  %v3869_v46 = vrot.slane %v3868_v10, 4 }
  0xd2   : > { %v3879_v62 = vrot.slane %v3878_v48, 4  ;;  %v8249_v38 = vrot.slane %v3895_v12, 5  ;;  %v8251_v34 = vrot.slane %v3919_v5, 5  ;;  %v8256_v50 = vcombine.low %v3826_v0, %v3836_v28  ;;  %v5799_v28 = vld [vmem:[%s7297_s11 + $0x60] sm:$0xf] }
  0xd3   : > { %6669 = vmatpush3.bf16.msra.mxu0 %v7122_v40  ;;  %v8212_v40 = vsel %vm7575_vm5, %v5432_v53, %v1360_v3  ;;  %v3910_v53 = vshrl.u32 %v5796_v17, 16  ;;  %v3913_v3 = vshll.u32 %v5796_v17, 16  ;;  %v7183_v17 = vld [vmem:[%s7297_s11 + $0x94] sm:$0xf]  ;;  %v8260_v48 = vcombine.low %v3850_v6, %v3860_v58 }
  0xd4   : > { %6702 = vmatprep.subr.bf16.mxu0 %v8160_v21  ;;  %v3905_v0 = vshll.u32 %v8240_v63, 16  ;;  %v3874_v6 = vsel %vm7329_vm2, %v3869_v46, %v8182_v51  ;;  %v9099_v46 = vcombine.low %v8003_v61, %v8007_v36 }
  0xd5   : > { %6639 = vmatmul.mubr.bf16.gmra.mrb[16].mxu0 %v7109_v43  ;;  %v3923_v43 = vshrl.u32 %v8204_v33, 16  ;;  %v3912_v44 = vrot.slane %v3910_v53, 4  ;;  %v7184_v53 = vld [vmem:[%s7297_s11 + $0x98] sm:$0x1] }
  0xd6   : > { %6431 = vmatmul.mubr.bf16.vlgmr.msra.gmra.mrb[0].mxu1 %v9094_v42  ;;  %6642 = vmatprep.mubr.bf16.mxu0 %v7111_v19  ;;  %v8243_v19 = vrot.slane %v3881_v1, 5  ;;  %v1367_v42 = vrot.slane %v7183_v17, 5  ;;  %v7185_v17 = vld [vmem:[%s7297_s11 + $0xa0] sm:$0xf]  ;;  %v3907_v36 = vrot.slane %v3905_v0, 5 }
  0xd7   : > { %6463 = vmatpush3.bf16.msra.mxu1 %v7922_v60  ;;  %6434 = vmatprep.mubr.bf16.mxu1 %v9095_v52  ;;  %v8237_v60 = vsel %vm7575_vm5, %v1362_v2, %v1363_v23  ;;  %v3888_v52 = vrot.slane %v3886_v13, 4  ;;  %v3901_v23 = vrot.slane %v3899_v18, 4  ;;  %v3915_v2 = vrot.slane %v3913_v3, 5  ;;  %v7120_v13 = vld [vmem:[%s9070_s1 + $0xd8] sm:$0xff]  }
  0xd8   : > { %6464 = vmatprep.subr.bf16.mxu1 %v7112_v31  ;;  %v3925_v1 = vrot.slane %v3923_v43, 4  ;;  %v1243_v18 = vld [vmem:[%s7297_s11 + $0x9c] sm:$0xe]  ;;  %v1370_v3 = vrot.slane %v7184_v53, 5  ;;  %v8273_v43 = vld [vmem:[%s7297_s11 + $0x64] sm:$0xf] }
  0xd9   : > { %v3892_v5 = vor.u32 %v3891_v25, %v3888_v52  ;;  %9097 = vst [vmem:[#allocation4_spill] sm:$0xff] %v8273_v43  ;;  %v3902_v58 = vor.u32 %v3901_v23, %v8249_v38  ;;  %v1374_v12 = vrot.slane %v7185_v17, 5  ;;  %v9098_v25 = vcombine.low %v7993_v24, %v7997_v35  ;;  %v7117_v23 = vld [vmem:[%s7297_s11 + $0xb4] sm:$0xff]   ;;  %v7123_v24 = vld [vmem:[%s9070_s1 + $0xe0] sm:$0xff]   ;;  %v5802_v17 = vld [vmem:[%s7297_s11 + $0x6c] sm:$0xf] }
  0xda   : > { %v1369_v52 = vrot.slane %v1367_v42, 4  ;;  %v3916_v53 = vor.u32 %v3915_v2, %v3912_v44  ;;  %v3926_v51 = vor.u32 %v3925_v1, %v8251_v34  ;;  %v3934_v35 = vshrl.u32 %v5799_v28, 16  ;;  %v7186_v2 = vld [vmem:[%s7297_s11 + $0xa4] sm:$0x1] }
  0xdb   : > { %6465 = vmatpush3.bf16.msra.mxu1 %v7112_v31  ;;  %v8267_v31 = vsel %vm7575_vm5, %v5433_v22, %v1367_v42  ;;  %v3929_v22 = vshll.u32 %v8247_v39, 16  ;;  %v3947_v42 = vshrl.u32 %v8273_v43, 16  ;;  %v3893_v61 = vrot.slane %v3892_v5, 4  ;;  %v8442_v39 = vld [vmem:[%s7297_s11 + $0x98] sm:$0x1] }
  0xdc   : > { %6466 = vmatprep.subr.bf16.mxu1 %v7116_v30  ;;  %v5434_v44 = vrot.slane %v1243_v18, 9  ;;  %v1377_v1 = vrot.slane %v7186_v2, 5  ;;  %v3917_v5 = vrot.slane %v3916_v53, 4  ;;  %v3927_v18 = vrot.slane %v3926_v51, 4  ;;  %9113 = vst [vmem:[#allocation14_spill] sm:$0xff] %v8442_v39 }
  0xdd   : > { %6643 = vmatmul.mubr.bf16.gmra.mrb[20].mxu0 %v7113_v54  ;;  %v3884_v54 = vsel %vm7329_vm2, %v3879_v62, %v8243_v19  ;;  %v3943_v19 = vshll.u32 %v8273_v43, 16  ;;  %v7119_v62 = vld [vmem:[%s7297_s11 + $0xc0] sm:$0xff]   ;;  %v3931_v10 = vrot.slane %v3929_v22, 5  ;;  %v8309_v43 = vsel %vm7575_vm5, %v1369_v52, %v1370_v3 }
  0xde   : > { %6435 = vmatmul.mubr.bf16.gmra.mrb[4].mxu1 %v9098_v25  ;;  %6646 = vmatprep.mubr.bf16.mxu0 %v7115_v8  ;;  %v3937_v8 = vshll.u32 %v5799_v28, 16  ;;  %v3903_v25 = vrot.slane %v3902_v58, 4  ;;  %v1381_v28 = vrot.slane %v7187_v41, 5  ;;  %v8305_v55 = vcombine.low %v3874_v6, %v3884_v54  ;;  %v7125_v41 = vld [vmem:[%s9070_s1 + $0xe8] sm:$0xff]  }
  0xdf   : > { %6438 = vmatprep.mubr.bf16.mxu1 %v9099_v46  ;;  %6467 = vmatpush3.bf16.msra.mxu1 %v7116_v30  ;;  %v1244_v30 = vld [vmem:[%s7297_s11 + $0xa8] sm:$0xe]  ;;  %v1376_v46 = vrot.slane %v1374_v12, 4  ;;  %v3936_v0 = vrot.slane %v3934_v35, 4  ;;  %v8311_v58 = vrot.slane %v3943_v19, 5  ;;  %v3949_v22 = vrot.slane %v3947_v42, 4 }
  0xe0   : > { %6468 = vmatprep.subr.bf16.mxu1 %v7120_v13  ;;  %v3939_v2 = vrot.slane %v3937_v8, 5  ;;  %v3898_v3 = vsel %vm7329_vm2, %v3893_v61, %v8249_v38  ;;  %v8321_v6 = vsel %vm7575_vm5, %v5434_v44, %v1374_v12  ;;  %v3958_v54 = vshrl.u32 %v5802_v17, 16  ;;  %v7188_v38 = vld [vmem:[%s7297_s11 + $0xb0] sm:$0x1]  ;;  %v1245_v19 = vld [vmem:[%s7297_s11 + $0xb4] sm:$0xe] }
  0xe1   : > { %v3961_v52 = vshll.u32 %v5802_v17, 16  ;;  %v3908_v53 = vsel %vm7329_vm2, %v3903_v25, %v3907_v36  ;;  %v8330_v51 = vsel %vm7575_vm5, %v1376_v46, %v1377_v1  ;;  %v5435_v35 = vrot.slane %v1244_v30, 9  ;;  %v8352_v30 = vld [vmem:[%s7297_s11 + $0x74] sm:$0x1]  ;;  %v7189_v25 = vld [vmem:[%s7297_s11 + $0xb8] sm:$0xf] }
  0xe2   : > { %v1384_v8 = vrot.slane %v7188_v38, 5  ;;  %v9102_v12 = vcombine.low %v8024_v49, %v8038_v4  ;;  %v3922_v42 = vsel %vm7329_vm2, %v3917_v5, %v8251_v34  ;;  %v3932_v61 = vsel %vm7329_vm2, %v3927_v18, %v3931_v10  ;;  %v7121_v4 = vld [vmem:[%s7297_s11 + $0xcc] sm:$0xff]   ;;  %9104 = vst [vmem:[#allocation7_spill] sm:$0xff] %v8352_v30  ;;  %v5808_v38 = vld [vmem:[%s7297_s11 + $0x84] sm:$0xf] }
  0xe3   : > { %6469 = vmatpush3.bf16.msra.mxu1 %v7120_v13  ;;  %v8324_v13 = vld [vmem:[%s7297_s11 + $0x70] sm:$0xf]  ;;  %v1383_v36 = vrot.slane %v1381_v28, 4  ;;  %v3953_v44 = vshll.u32 %v8303_v47, 16  ;;  %v9103_v49 = vcombine.low %v8060_v26, %v8064_v56  ;;  %v3950_v1 = vor.u32 %v3949_v22, %v8311_v58  ;;  %v8369_v22 = vld [vmem:[%s7297_s11 + $0x7c] sm:$0xf] }
  0xe4   : > { %6470 = vmatprep.subr.bf16.mxu1 %v7123_v24  ;;  %9101 = vst [vmem:[#allocation6_spill] sm:$0xff] %v8324_v13  ;;  %v3967_v34 = vshll.u32 %v8324_v13, 16  ;;  %v3971_v10 = vshrl.u32 %v8324_v13, 16  ;;  %v5436_v17 = vrot.slane %v1245_v19, 9  ;;  %v1388_v46 = vrot.slane %v7189_v25, 5  ;;  %9105 = vst [vmem:[#allocation8_spill] sm:$0xff] %v8369_v22 }
  0xe5   : > { %6647 = vmatmul.mubr.bf16.gmra.mrb[24].mxu0 %v7117_v23  ;;  %v7127_v23 = vld [vmem:[%s9070_s1 + $0xf0] sm:$0xff]   ;;  %v3960_v26 = vrot.slane %v3958_v54, 4  ;;  %v3963_v56 = vrot.slane %v3961_v52, 5  ;;  %v8360_v18 = vcombine.low %v3898_v3, %v3908_v53  ;;  %v8372_v19 = vcombine.low %v3922_v42, %v3932_v61  ;;  %v7190_v3 = vld [vmem:[%s7297_s11 + $0xbc] sm:$0x1] }
  0xe6   : > { %6439 = vmatmul.mubr.bf16.gmra.mrb[8].mxu1 %v9102_v12  ;;  %6650 = vmatprep.mubr.bf16.mxu0 %v7119_v62  ;;  %v3940_v62 = vor.u32 %v3939_v2, %v3936_v0  ;;  %v8366_v2 = vsel %vm7575_vm5, %v5435_v35, %v1381_v28  ;;  %v8376_v54 = vsel %vm7575_vm5, %v1383_v36, %v1384_v8  ;;  %v8378_v52 = vrot.slane %v3953_v44, 5  ;;  %v7129_v12 = vld [vmem:[%s9070_s1 + $0xf8] sm:$0xff]   ;;  %v8385_v28 = vld [vmem:[%s7297_s11 + $0x88] sm:$0xf] }
  0xe7   : > { %6442 = vmatprep.mubr.bf16.mxu1 %v9103_v49  ;;  %6471 = vmatpush3.bf16.msra.mxu1 %v7123_v24  ;;  %v5805_v24 = vld [vmem:[%s7297_s11 + $0x78] sm:$0xf]  ;;  %v1391_v53 = vrot.slane %v7190_v3, 5  ;;  %9106 = vst [vmem:[#allocation9_spill] sm:$0xff] %v8385_v28  ;;  %v8389_v42 = vrot.slane %v3950_v1, 4  ;;  %v8391_v61 = vrot.slane %v3967_v34, 5  ;;  %v8395_v36 = vsel %vm7575_vm5, %v5436_v17, %v1388_v46 }
  0xe8   : > { %6472 = vmatprep.subr.bf16.mxu1 %v7125_v41  ;;  %v8387_v35 = vrot.slane %v3940_v62, 4  ;;  %v3973_v8 = vrot.slane %v3971_v10, 4  ;;  %v1390_v44 = vrot.slane %v1388_v46, 4  ;;  %v3964_v49 = vor.u32 %v3963_v56, %v3960_v26  ;;  %v5811_v3 = vld [vmem:[%s7297_s11 + $0x90] sm:$0xf] }
  0xe9   : > { %v3977_v25 = vshll.u32 %v8352_v30, 16  ;;  %v3985_v0 = vshll.u32 %v5805_v24, 16  ;;  %v3991_v62 = vshll.u32 %v8369_v22, 16  ;;  %v3995_v1 = vshrl.u32 %v8369_v22, 16  ;;  %v8402_v34 = vld [vmem:[%s7297_s11 + $0x94] sm:$0xf] }
  0xea   : > { %9107 = vst [vmem:[#allocation10_spill] sm:$0xff] %v8402_v34  ;;  %v9108_v10 = vcombine.low %v8104_v27, %v8108_v29  ;;  %v4006_v17 = vshrl.u32 %v5808_v38, 16  ;;  %v4009_v46 = vshll.u32 %v5808_v38, 16  ;;  %v4019_v26 = vshrl.u32 %v8385_v28, 16  ;;  %v5814_v38 = vld [vmem:[%s7297_s11 + $0x9c] sm:$0xf] }
  0xeb   : > { %6473 = vmatpush3.bf16.msra.mxu1 %v7125_v41  ;;  %v3982_v41 = vshrl.u32 %v5805_v24, 16  ;;  %v9109_v56 = vcombine.low %v8115_v45, %v8119_v14  ;;  %v3974_v29 = vor.u32 %v3973_v8, %v8391_v61  ;;  %v4033_v24 = vshll.u32 %v5811_v3, 16  ;;  %v8424_v45 = vld [vmem:[%s7297_s11 + $0x80] sm:$0x1] }
  0xec   : > { %6474 = vmatprep.subr.bf16.mxu1 %v7127_v23  ;;  %v8421_v5 = vrot.slane %v3977_v25, 5  ;;  %9110 = vst [vmem:[#allocation11_spill] sm:$0xff] %v8424_v45  ;;  %v4039_v14 = vshll.u32 %v8402_v34, 16  ;;  %v3987_v27 = vrot.slane %v3985_v0, 5  ;;  %v3997_v8 = vrot.slane %v3995_v1, 4 }
  0xed   : > { %6651 = vmatmul.mubr.bf16.gmra.mrb[28].mxu0 %v7121_v4  ;;  %v4015_v4 = vshll.u32 %v8385_v28, 16  ;;  %v8428_v28 = vrot.slane %v3991_v62, 5  ;;  %v8434_v22 = vld [vmem:[%s7297_s11 + $0xa0] sm:$0xf]  ;;  %v4008_v25 = vrot.slane %v4006_v17, 4  ;;  %v4011_v30 = vrot.slane %v4009_v46, 5 }
  0xee   : > { %6443 = vmatmul.mubr.bf16.gmra.mrb[12].mxu1 %v9108_v10  ;;  %6670 = vmatprep.mubr.bf16.mxu0 %v8173_v59  ;;  %v4030_v59 = vshrl.u32 %v5811_v3, 16  ;;  %v8419_v10 = vrot.slane %v3964_v49, 4  ;;  %v8431_v3 = vld [vmem:[%s7297_s11 + $0x8c] sm:$0x1]  ;;  %9112 = vst [vmem:[#allocation13_spill] sm:$0xff] %v8434_v22  ;;  %v4021_v47 = vrot.slane %v4019_v26, 4  ;;  %v8451_v62 = vsel %vm7575_vm5, %v1390_v44, %v1391_v53 }
  0xef   : > { %6446 = vmatprep.mubr.bf16.mxu1 %v9109_v56  ;;  %6475 = vmatpush3.bf16.msra.mxu1 %v7127_v23  ;;  %v4043_v23 = vshrl.u32 %v8402_v34, 16  ;;  %v3984_v56 = vrot.slane %v3982_v41, 4  ;;  %9111 = vst [vmem:[#allocation12_spill] sm:$0xff] %v8431_v3  ;;  %v7126_v49 = vld [vmem:[%s9070_s1 + $0x208] sm:$0xff]   ;;  %v8439_v13 = vrot.slane %v4015_v4, 5  ;;  %v4035_v34 = vrot.slane %v4033_v24, 5 }
  0xf0   : > { %6476 = vmatprep.subr.bf16.mxu1 %v7129_v12  ;;  %v5817_v41 = vld [vmem:[%s7297_s11 + $0xa8] sm:$0xf]  ;;  %v4032_v1 = vrot.slane %v4030_v59, 4  ;;  %v8456_v17 = vld [vmem:[%s9070_s1 + $0x100] sm:$0xff]   ;;  %v8459_v46 = vrot.slane %v4039_v14, 5  ;;  %v4054_v26 = vshrl.u32 %v5814_v38, 16  ;;  %v9115_v24 = vcombine.low %v8123_v16, %v8133_v15 }
  0xf1   : > { %9114 = vst [vmem:[#allocation15_spill] sm:$0xff] %v8456_v17  ;;  %v4045_v4 = vrot.slane %v4043_v23, 4  ;;  %v4057_v0 = vshll.u32 %v5814_v38, 16  ;;  %v8462_v53 = vrot.slane %v3974_v29, 4  ;;  %v4063_v44 = vshll.u32 %v8434_v22, 16  ;;  %v7128_v16 = vld [vmem:[%s9070_s1 + $0x210] sm:$0xff]  }
  0xf2   : > { %v4067_v59 = vshrl.u32 %v8434_v22, 16  ;;  %v3988_v14 = vor.u32 %v3987_v27, %v3984_v56  ;;  %v3998_v38 = vor.u32 %v3997_v8, %v8428_v28  ;;  %v4012_v23 = vor.u32 %v4011_v30, %v4008_v25  ;;  %v8474_v29 = vld [vmem:[%s7297_s11 + $0xac] sm:$0xf]  ;;  %v8487_v25 = vld [vmem:[%s7297_s11 + $0xa4] sm:$0x1] }
  0xf3   : > { %6477 = vmatpush3.bf16.msra.mxu1 %v7129_v12  ;;  %v4001_v12 = vshll.u32 %v8424_v45, 16  ;;  %9116 = vst [vmem:[#allocation16_spill] sm:$0xff] %v8474_v29  ;;  %v4022_v15 = vor.u32 %v4021_v47, %v8439_v13  ;;  %v4078_v27 = vshrl.u32 %v5817_v41, 16  ;;  %v4081_v30 = vshll.u32 %v5817_v41, 16 }
  0xf4   : > { %6750 = vmatprep.subr.bf16.mxu1 %v8456_v17  ;;  %v9117_v17 = vcombine.low %v8179_v20, %v8200_v7  ;;  %v4036_v56 = vor.u32 %v4035_v34, %v4032_v1  ;;  %v4046_v8 = vor.u32 %v4045_v4, %v8459_v46  ;;  %v4056_v20 = vrot.slane %v4054_v26, 4 }
  0xf5   : > { %6671 = vmatmul.mubr.bf16.vlgmr.msra.gmra.mrb[0].mxu0 %v8256_v50  ;;  %v4025_v50 = vshll.u32 %v8431_v3, 16  ;;  %v4059_v7 = vrot.slane %v4057_v0, 5  ;;  %v4091_v22 = vshrl.u32 %v8474_v29, 16  ;;  %v3989_v47 = vrot.slane %v3988_v14, 4  ;;  %v7130_v0 = vld [vmem:[%s9070_s1 + $0x218] sm:$0xff]  }
  0xf6   : > { %6447 = vmatmul.mubr.bf16.gmra.mrb[16].mxu1 %v9115_v24  ;;  %6703 = vmatpush3.bf16.msra.mxu0 %v8160_v21  ;;  %v4049_v21 = vshll.u32 %v8442_v39, 16  ;;  %v4087_v24 = vshll.u32 %v8474_v29, 16  ;;  %v3999_v39 = vrot.slane %v3998_v38, 4  ;;  %v4003_v3 = vrot.slane %v4001_v12, 5 }
  0xf7   : > { %6450 = vmatprep.mubr.bf16.mxu1 %v9117_v17  ;;  %6674 = vmatprep.mubr.bf16.mxu0 %v8260_v48  ;;  %v8489_v17 = vrot.slane %v4063_v44, 5  ;;  %v4069_v48 = vrot.slane %v4067_v59, 4  ;;  %v4027_v41 = vrot.slane %v4025_v50, 5  ;;  %v4013_v34 = vrot.slane %v4012_v23, 4 }
  0xf8   : > { %6704 = vmatprep.subr.bf16.mxu0 %v7126_v49  ;;  %v4023_v1 = vrot.slane %v4022_v15, 4  ;;  %v4080_v4 = vrot.slane %v4078_v27, 4  ;;  %v4083_v45 = vrot.slane %v4081_v30, 5  ;;  %v4037_v26 = vrot.slane %v4036_v56, 4  ;;  %v8555_v27 = vld [vmem:[%s7297_s11 + $0xbc] sm:$0x1] }
  0xf9   : > { %v4051_v44 = vrot.slane %v4049_v21, 5  ;;  %v4060_v59 = vor.u32 %v4059_v7, %v4056_v20  ;;  %v4073_v29 = vshll.u32 %v8487_v25, 16  ;;  %v4070_v12 = vor.u32 %v4069_v48, %v8489_v17  ;;  %v8522_v21 = vld [vmem:[%s7297_s11 + $0xb0] sm:$0x1] }
  0xfa   : > { %6705 = vmatpush3.bf16.msra.mxu0 %v7126_v49  ;;  %v4047_v49 = vrot.slane %v4046_v8, 4  ;;  %v8499_v14 = vrot.slane %v4087_v24, 5  ;;  %v4093_v38 = vrot.slane %v4091_v22, 4  ;;  %v9118_v23 = vor.u32 %v7907_v57, %v7905_v11 }
  0xfb   : > { %6706 = vmatprep.subr.bf16.mxu0 %v7128_v16  ;;  %v9119_v15 = vcombine.low %v8212_v40, %v8237_v60  ;;  %v3980_v22 = vsel %vm7329_vm2, %v8462_v53, %v8421_v5  ;;  %v3994_v57 = vsel %vm7329_vm2, %v3989_v47, %v8428_v28  ;;  %v9120_v40 = vcombine.low %v8267_v31, %v8309_v43  ;;  %v7133_v31 = vld [vmem:[%s9070_s1 + $0x220] sm:$0xff]  }
  0xfc   : > { %v8504_v50 = vrot.slane %v9118_v23, 4  ;;  %v4004_v60 = vsel %vm7329_vm2, %v3999_v39, %v4003_v3  ;;  %v4084_v5 = vor.u32 %v4083_v45, %v4080_v4  ;;  %v4028_v28 = vsel %vm7329_vm2, %v4023_v1, %v4027_v41  ;;  %v5873_v41 = vld [vmem:[%s7297_s11 + $0x48] sm:$0xe] }
  0xfd   : > { %6675 = vmatmul.mubr.bf16.gmra.mrb[4].mxu0 %v8305_v55  ;;  %v3970_v55 = vsel %vm7329_vm2, %v8419_v10, %v8391_v61  ;;  %v5820_v61 = vld [vmem:[%s7297_s11 + $0xb4] sm:$0xf]  ;;  %v8534_v10 = vld [vmem:[%s7297_s11 + $0xb8] sm:$0xf]  ;;  %v4042_v39 = vsel %vm7329_vm2, %v4037_v26, %v8459_v46  ;;  %v8544_v43 = vrot.slane %v4060_v59, 4  ;;  %v8546_v3 = vrot.slane %v4073_v29, 5 }
  0xfe   : > { %6451 = vmatmul.mubr.bf16.gmra.mrb[20].mxu1 %v9119_v15  ;;  %6678 = vmatprep.mubr.bf16.mxu0 %v8360_v18  ;;  %v4018_v18 = vsel %vm7329_vm2, %v4013_v34, %v8439_v13  ;;  %v4052_v13 = vsel %vm7329_vm2, %v4047_v49, %v4051_v44  ;;  %v8550_v45 = vrot.slane %v4070_v12, 4  ;;  %v4094_v53 = vor.u32 %v4093_v38, %v8499_v14  ;;  %v5874_v26 = vld [vmem:[%s7297_s11 + $0x54] sm:$0xe] }
  0xff   : > { %6454 = vmatprep.mubr.bf16.mxu1 %v9120_v40  ;;  %6707 = vmatpush3.bf16.msra.mxu0 %v7128_v16  ;;  %v4097_v16 = vshll.u32 %v8522_v21, 16  ;;  %v9121_v46 = vsel %vm7329_vm2, %v8389_v42, %v8378_v52  ;;  %v9122_v29 = vsel %vm7329_vm2, %v8387_v35, %v8311_v58  ;;  %v4102_v56 = vshrl.u32 %v5820_v61, 16 }
 0x100   : > { %6708 = vmatprep.subr.bf16.mxu0 %v7130_v0  ;;  %v5851_v30 = vcombine.low %v9122_v29, %v9121_v46  ;;  %v4105_v8 = vshll.u32 %v5820_v61, 16  ;;  %v4111_v20 = vshll.u32 %v8534_v10, 16  ;;  %v5467_v7 = vcombine.low %v8366_v2, %v8376_v54  ;;  %v7136_v2 = vld [vmem:[%s9070_s1 + $0x228] sm:$0xff]   ;;  %v5823_v54 = vld [vmem:[%s7297_s11 + $0xc0] sm:$0xf]  ;;  %v9126_v29 = vld [vmem:[#allocation5_spill] sm:$0xff] }
 0x101   : > { %v5468_v48 = vcombine.low %v8395_v36, %v8451_v62  ;;  %v5852_v24 = vcombine.low %v3970_v55, %v3980_v22  ;;  %v8572_v52 = vrot.slane %v4084_v5, 4  ;;  %v5853_v42 = vcombine.low %v3994_v57, %v4004_v60 }
 0x102   : > { %v8574_v58 = vcombine.low %v4018_v18, %v4028_v28  ;;  %v8576_v35 = vcombine.low %v4042_v39, %v4052_v13  ;;  %v4066_v47 = vsel %vm7329_vm2, %v8544_v43, %v8489_v17  ;;  %v4076_v34 = vsel %vm7329_vm2, %v8550_v45, %v8546_v3  ;;  %v5876_v28 = vld [vmem:[%s7297_s11 + $0x6c] sm:$0xe] }
 0x103   : > { %6709 = vmatpush3.bf16.msra.mxu0 %v7130_v0  ;;  %v8592_v1 = vrot.slane %v4094_v53, 4  ;;  %v8594_v4 = vrot.slane %v4097_v16, 5  ;;  %v4115_v0 = vshrl.u32 %v8534_v10, 16  ;;  %v9123_v44 = vcombine.low %v8321_v6, %v8330_v51  ;;  %v7139_v6 = vld [vmem:[%s9070_s1 + $0x230] sm:$0xff]   ;;  %v8616_v51 = vld [vmem:[%s7297_s11 + $0xc4] sm:$0xf] }
 0x104   : > { %6710 = vmatprep.subr.bf16.mxu0 %v7133_v31  ;;  %v8601_v59 = vrot.slane %v4102_v56, 4  ;;  %v8605_v49 = vrot.slane %v4111_v20, 5  ;;  %v4121_v12 = vshll.u32 %v8555_v27, 16  ;;  %v4090_v38 = vsel %vm7329_vm2, %v8572_v52, %v8499_v14  ;;  %v5875_v14 = vld [vmem:[%s7297_s11 + $0x60] sm:$0xe]  ;;  %v9124_v39 = vld [vmem:[#allocation3_spill] sm:$0xff] }
 0x105   : > { %6679 = vmatmul.mubr.bf16.gmra.mrb[8].mxu0 %v8372_v19  ;;  %v8603_v19 = vrot.slane %v4105_v8, 5  ;;  %v4126_v23 = vshrl.u32 %v5823_v54, 16  ;;  %v5889_v15 = vrot.slane %v5873_v41, 9  ;;  %v4589_v55 = vrot.slane %v8192_v32, 5  ;;  %v7131_v13 = vld [vmem:[%s7297_s11 + $0xc] sm:$0xff]   ;;  %v7142_v56 = vld [vmem:[%s9070_s1 + $0x238] sm:$0xff]  }
 0x106   : > { %6455 = vmatmul.mubr.bf16.gmra.mrb[24].mxu1 %v9123_v44  ;;  %6682 = vmatprep.mubr.bf16.mxu0 %v5851_v30  ;;  %v4129_v22 = vshll.u32 %v5823_v54, 16  ;;  %v4592_v57 = vrot.slane %v8240_v63, 5  ;;  %v5890_v40 = vrot.slane %v5874_v26, 9  ;;  %v4596_v60 = vrot.slane %v8204_v33, 5  ;;  %v9125_v16 = vld [vmem:[#allocation4_spill] sm:$0xff]  ;;  %v9127_v52 = vld [vmem:[#allocation6_spill] sm:$0xff] }
 0x107   : > { %6458 = vmatprep.mubr.bf16.mxu1 %v5467_v7  ;;  %6711 = vmatpush3.bf16.msra.mxu0 %v7133_v31  ;;  %v4100_v18 = vsel %vm7329_vm2, %v8592_v1, %v8594_v4  ;;  %v8626_v5 = vrot.slane %v4115_v0, 4  ;;  %v8630_v61 = vsel %vm7575_vm5, %v5889_v15, %v4589_v55  ;;  %v4591_v32 = vrot.slane %v4589_v55, 4  ;;  %v9128_v4 = vld [vmem:[#allocation7_spill] sm:$0xff] }
 0x108   : > { %6712 = vmatprep.subr.bf16.mxu0 %v7136_v2  ;;  %v4135_v31 = vshll.u32 %v8616_v51, 16  ;;  %v8636_v63 = vsel %vm7575_vm5, %v5890_v40, %v4596_v60  ;;  %v4598_v33 = vrot.slane %v4596_v60, 4  ;;  %v4599_v3 = vrot.slane %v9124_v39, 5  ;;  %v8667_v26 = vld [vmem:[%s7297_s11 + $0xc8] sm:$0x1]  ;;  %v7132_v40 = vld [vmem:[%s7297_s11 + $0x18] sm:$0xff]  }
 0x109   : > { %v8642_v45 = vsel %vm7575_vm5, %v4591_v32, %v4592_v57  ;;  %v5891_v53 = vrot.slane %v5875_v14, 9  ;;  %v4603_v46 = vrot.slane %v9125_v16, 5  ;;  %v4606_v30 = vrot.slane %v9126_v29, 5  ;;  %v7134_v39 = vld [vmem:[%s7297_s11 + $0x24] sm:$0xff]  }
 0x10a   : > { %v5921_v8 = vcombine.low %v8630_v61, %v8642_v45  ;;  %v8653_v20 = vsel %vm7575_vm5, %v4598_v33, %v4599_v3  ;;  %v5892_v7 = vrot.slane %v5876_v28, 9  ;;  %v4613_v0 = vrot.slane %v9128_v4, 5  ;;  %v9130_v28 = vld [vmem:[#allocation11_spill] sm:$0xff]  ;;  %v5582_v61 = vld [vmem:[%s7297_s11 + $0x90] sm:$0xf] }
 0x10b   : > { %6713 = vmatpush3.bf16.msra.mxu0 %v7136_v2  ;;  %v4610_v2 = vrot.slane %v9127_v52, 5  ;;  %v5922_v54 = vcombine.low %v8636_v63, %v8653_v20  ;;  %v8660_v41 = vsel %vm7575_vm5, %v5891_v53, %v4603_v46  ;;  %v4605_v1 = vrot.slane %v4603_v46, 4  ;;  %v9131_v53 = vld [vmem:[#allocation2_spill] sm:$0xff]  ;;  %v7148_v45 = vld [vmem:[%s7297_s11 + $0xa8] sm:$0xff]  }
 0x10c   : > { %6714 = vmatprep.subr.bf16.mxu0 %v7139_v6  ;;  %v8669_v44 = vrot.slane %v4126_v23, 4  ;;  %v8682_v36 = vcombine.low %v4066_v47, %v4076_v34  ;;  %v4108_v62 = vor.u32 %v8603_v19, %v8601_v59  ;;  %v5877_v23 = vld [vmem:[%s7297_s11 + $0x78] sm:$0xe]  ;;  %v8694_v57 = vrot.slane %v4121_v12, 5  ;;  %v5826_v12 = vld [vmem:[%s7297_s11 + $0xcc] sm:$0xf] }
 0x10d   : > { %6683 = vmatmul.mubr.bf16.gmra.mrb[12].mxu0 %v5852_v24  ;;  %v8671_v24 = vrot.slane %v4129_v22, 5  ;;  %v8675_v15 = vsel %vm7575_vm5, %v5892_v7, %v4610_v2  ;;  %v4612_v55 = vrot.slane %v4610_v2, 4  ;;  %v8692_v22 = vcombine.low %v4090_v38, %v4100_v18  ;;  %v5576_v47 = vld [vmem:[%s7297_s11 + $0x78] sm:$0xf]  ;;  %v9129_v18 = vld [vmem:[#allocation8_spill] sm:$0xff] }
 0x10e   : > { %6459 = vmatmul.mubr.bf16.gmra.mrb[28].mxu1 %v5468_v48  ;;  %6686 = vmatprep.mubr.bf16.mxu0 %v5853_v42  ;;  %v4139_v48 = vshrl.u32 %v8616_v51, 16  ;;  %v8689_v42 = vsel %vm7575_vm5, %v4605_v1, %v4606_v30  ;;  %v4118_v34 = vor.u32 %v8626_v5, %v8605_v49  ;;  %v8705_v59 = vrot.slane %v4135_v31, 5  ;;  %v8719_v31 = vld [vmem:[%s7297_s11 + $0xd0] sm:$0xf]  ;;  %v9132_v1 = vld [vmem:[#allocation9_spill] sm:$0xff] }
 0x10f   : > { %6478 = vmatprep.mubr.bf16.mxu1 %v7131_v13  ;;  %6715 = vmatpush3.bf16.msra.mxu0 %v7139_v6  ;;  %v5923_v17 = vcombine.low %v8660_v41, %v8689_v42  ;;  %v8700_v43 = vsel %vm7575_vm5, %v4612_v55, %v4613_v0  ;;  %v4145_v19 = vshll.u32 %v8667_v26, 16  ;;  %v5878_v6 = vld [vmem:[%s7297_s11 + $0x84] sm:$0xe]  ;;  %v4132_v60 = vor.u32 %v8671_v24, %v8669_v44  ;;  %v9133_v24 = vld [vmem:[#allocation12_spill] sm:$0xff]  ;;  %v7212_v63 = vld [vmem:[%s7297_s11 + $0x8c] sm:$0x1] }
 0x110   : > { %6716 = vmatprep.subr.bf16.mxu0 %v7142_v56  ;;  %v5924_v38 = vcombine.low %v8675_v15, %v8700_v43  ;;  %v5893_v14 = vrot.slane %v5877_v23, 9  ;;  %v4617_v32 = vrot.slane %v9129_v18, 5  ;;  %v4620_v33 = vrot.slane %v9130_v28, 5 }
 0x111   : > { %v4141_v5 = vrot.slane %v4139_v48, 4  ;;  %v2367_v3 = vshrl.u32 %v5576_v47, 16  ;;  %v2370_v13 = vshll.u32 %v5576_v47, 16  ;;  %v2389_v16 = vsel %vm7329_vm2, %v8504_v50, %v9131_v53 }
 0x112   : > { %v4150_v46 = vshrl.u32 %v5826_v12, 16  ;;  %v8727_v29 = vsel %vm7575_vm5, %v5893_v14, %v4617_v32  ;;  %v4619_v30 = vrot.slane %v4617_v32, 4  ;;  %v5894_v7 = vrot.slane %v5878_v6, 9  ;;  %v7192_v6 = vld [vmem:[%s9070_s1 + $0x108] sm:$0xff]  }
 0x113   : > { %6717 = vmatpush3.bf16.msra.mxu0 %v7142_v56  ;;  %v4153_v52 = vshll.u32 %v5826_v12, 16  ;;  %v2369_v2 = vrot.slane %v2367_v3, 4  ;;  %v2372_v56 = vrot.slane %v2370_v13, 5  ;;  %v4624_v4 = vrot.slane %v9132_v1, 5  ;;  %v5879_v12 = vld [vmem:[%s7297_s11 + $0x90] sm:$0xe] }
 0x114   : > { %v4159_v50 = vshll.u32 %v8719_v31, 16  ;;  %v4163_v0 = vshrl.u32 %v8719_v31, 16  ;;  %v8736_v44 = vsel %vm7575_vm5, %v4619_v30, %v4620_v33  ;;  %v4627_v55 = vrot.slane %v9133_v24, 5  ;;  %v7135_v3 = vld [vmem:[%s7297_s11 + $0x30] sm:$0xff]  }
 0x115   : > { %6687 = vmatmul.mubr.bf16.gmra.mrb[16].mxu0 %v8574_v58  ;;  %v9134_v58 = vld [vmem:[#allocation15_spill] sm:$0xff]  ;;  %v4142_v48 = vor.u32 %v4141_v5, %v8705_v59  ;;  %v2373_v23 = vor.u32 %v2372_v56, %v2369_v2  ;;  %v4626_v47 = vrot.slane %v4624_v4, 4  ;;  %v4119_v14 = vrot.slane %v4118_v34, 4  ;;  %v8757_v13 = vld [vmem:[%s7297_s11 + $0xd4] sm:$0x1]  ;;  %v9135_v2 = vld [vmem:[#allocation10_spill] sm:$0xff] }
 0x116   : > { %6479 = vmatmul.mubr.bf16.vlgmr.msra.gmra.mrb[0].mxu1 %v7132_v40  ;;  %6690 = vmatprep.mubr.bf16.mxu0 %v8576_v35  ;;  %v5925_v35 = vcombine.low %v8727_v29, %v8736_v44  ;;  %v4109_v40 = vrot.slane %v4108_v62, 4  ;;  %v4147_v18 = vrot.slane %v4145_v19, 5  ;;  %v8749_v32 = vsel %vm7575_vm5, %v5894_v7, %v4624_v4  ;;  %v7137_v19 = vld [vmem:[%s7297_s11 + $0x3c] sm:$0xff]   ;;  %v7193_v1 = vld [vmem:[%s9070_s1 + $0x110] sm:$0xff]  }
 0x117   : > { %6758 = vmatpush3.bf16.msra.mxu1 %v9134_v58  ;;  %6482 = vmatprep.mubr.bf16.mxu1 %v7134_v39  ;;  %v4152_v28 = vrot.slane %v4150_v46, 4  ;;  %v4155_v33 = vrot.slane %v4153_v52, 5  ;;  %v2374_v39 = vrot.slane %v2373_v23, 4  ;;  %v8753_v5 = vsel %vm7575_vm5, %v4626_v47, %v4627_v55  ;;  %v7194_v47 = vld [vmem:[%s7297_s11 + $0x1c] sm:$0xf] }
 0x118   : > { %6751 = vmatprep.subr.bf16.mxu1 %v7192_v6  ;;  %v8759_v53 = vrot.slane %v4159_v50, 5  ;;  %v4165_v30 = vrot.slane %v4163_v0, 4  ;;  %v5926_v62 = vcombine.low %v8749_v32, %v8753_v5  ;;  %v5895_v34 = vrot.slane %v5879_v12, 9 }
 0x119   : > { %v4133_v7 = vrot.slane %v4132_v60, 4  ;;  %v4143_v46 = vrot.slane %v4142_v48, 4  ;;  %v2379_v52 = vsel %vm7329_vm2, %v2374_v39, %v7905_v11  ;;  %v4631_v56 = vrot.slane %v9135_v2, 5  ;;  %v9136_v11 = vld [vmem:[#allocation14_spill] sm:$0xff]  ;;  %v7138_v39 = vld [vmem:[%s7297_s11 + $0x48] sm:$0xff]  }
 0x11a   : > { %v4114_v4 = vsel %vm7329_vm2, %v4109_v40, %v8605_v49  ;;  %v4124_v60 = vsel %vm7329_vm2, %v4119_v14, %v8694_v57  ;;  %v8777_v50 = vcombine.low %v2379_v52, %v2389_v16  ;;  %v4634_v0 = vrot.slane %v9136_v11, 5  ;;  %v5869_v57 = vld [vmem:[%s7297_s11 + $0x18] sm:$0xe]  ;;  %v5880_v16 = vld [vmem:[%s7297_s11 + $0x9c] sm:$0xe] }
 0x11b   : > { %6759 = vmatpush3.bf16.msra.mxu1 %v7192_v6  ;;  %v4156_v24 = vor.u32 %v4155_v33, %v4152_v28  ;;  %v4169_v55 = vshll.u32 %v8757_v13, 16  ;;  %v8784_v58 = vsel %vm7575_vm5, %v5895_v34, %v4631_v56  ;;  %v4633_v48 = vrot.slane %v4631_v56, 4  ;;  %v7195_v40 = vld [vmem:[%s9070_s1 + $0x118] sm:$0xff]   ;;  %v7196_v2 = vld [vmem:[%s7297_s11 + $0x20] sm:$0x1] }
 0x11c   : > { %6752 = vmatprep.subr.bf16.mxu1 %v7193_v1  ;;  %v4166_v49 = vor.u32 %v4165_v30, %v8759_v53  ;;  %v4148_v23 = vsel %vm7329_vm2, %v4143_v46, %v4147_v18  ;;  %v4561_v12 = vrot.slane %v7194_v47, 5  ;;  %v5858_v6 = vcombine.low %v4114_v4, %v4124_v60  ;;  %v9137_v34 = vld [vmem:[#allocation13_spill] sm:$0xff]  ;;  %v5881_v11 = vld [vmem:[%s7297_s11 + $0xa8] sm:$0xe] }
 0x11d   : > { %6691 = vmatmul.mubr.bf16.gmra.mrb[20].mxu0 %v8682_v36  ;;  %v4138_v36 = vsel %vm7329_vm2, %v4133_v7, %v8705_v59  ;;  %v4157_v14 = vrot.slane %v4156_v24, 4  ;;  %v4171_v28 = vrot.slane %v4169_v55, 5  ;;  %v5885_v18 = vrot.slane %v5869_v57, 9  ;;  %v7140_v46 = vld [vmem:[%s7297_s11 + $0x54] sm:$0xff]   ;;  %v5870_v55 = vld [vmem:[%s7297_s11 + $0x24] sm:$0xe] }
 0x11e   : > { %6483 = vmatmul.mubr.bf16.gmra.mrb[4].mxu1 %v7135_v3  ;;  %6694 = vmatprep.mubr.bf16.mxu0 %v8692_v22  ;;  %v8798_v22 = vsel %vm7575_vm5, %v4633_v48, %v4634_v0  ;;  %v5896_v33 = vrot.slane %v5880_v16, 9  ;;  %v5859_v3 = vcombine.low %v4138_v36, %v4148_v23  ;;  %v4167_v30 = vrot.slane %v4166_v49, 4  ;;  %v7198_v48 = vld [vmem:[%s7297_s11 + $0x28] sm:$0xf]  ;;  %v7199_v36 = vld [vmem:[%s7297_s11 + $0x34] sm:$0xf] }
 0x11f   : > { %6486 = vmatprep.mubr.bf16.mxu1 %v7137_v19  ;;  %6760 = vmatpush3.bf16.msra.mxu1 %v7193_v1  ;;  %v5927_v59 = vcombine.low %v8784_v58, %v8798_v22  ;;  %v4638_v19 = vrot.slane %v9137_v34, 5  ;;  %v4641_v7 = vrot.slane %v8487_v25, 5  ;;  %v4563_v52 = vrot.slane %v4561_v12, 4  ;;  %v7197_v1 = vld [vmem:[%s9070_s1 + $0x120] sm:$0xff]  }
 0x120   : > { %6753 = vmatprep.subr.bf16.mxu1 %v7195_v40  ;;  %v4564_v56 = vrot.slane %v7196_v2, 5  ;;  %v4562_v25 = vsel %vm7575_vm5, %v5885_v18, %v4561_v12  ;;  %v4162_v0 = vsel %vm7329_vm2, %v4157_v14, %v8759_v53  ;;  %v4172_v24 = vsel %vm7329_vm2, %v4167_v30, %v4171_v28  ;;  %v5871_v12 = vld [vmem:[%s7297_s11 + $0x30] sm:$0xe]  ;;  %v7141_v30 = vld [vmem:[%s7297_s11 + $0x60] sm:$0xff]  }
 0x121   : > { %v8815_v4 = vsel %vm7575_vm5, %v5896_v33, %v4638_v19  ;;  %v4640_v60 = vrot.slane %v4638_v19, 4  ;;  %v4568_v49 = vrot.slane %v7198_v48, 5  ;;  %v4575_v23 = vrot.slane %v7199_v36, 5  ;;  %v7201_v33 = vld [vmem:[%s7297_s11 + $0x2c] sm:$0x1] }
 0x122   : > { %v4565_v16 = vsel %vm7575_vm5, %v4563_v52, %v4564_v56  ;;  %v5897_v47 = vrot.slane %v5881_v11, 9  ;;  %v5860_v28 = vcombine.low %v4162_v0, %v4172_v24  ;;  %v5886_v18 = vrot.slane %v5870_v55, 9  ;;  %v7143_v52 = vld [vmem:[%s7297_s11 + $0x6c] sm:$0xff]   ;;  %v5882_v11 = vld [vmem:[%s7297_s11 + $0xb4] sm:$0xe] }
 0x123   : > { %6761 = vmatpush3.bf16.msra.mxu1 %v7195_v40  ;;  %v8829_v57 = vsel %vm7575_vm5, %v4640_v60, %v4641_v7  ;;  %v9138_v40 = vld [vmem:[#allocation16_spill] sm:$0xff]  ;;  %v5917_v34 = vcombine.low %v4562_v25, %v4565_v16  ;;  %v4570_v19 = vrot.slane %v4568_v49, 4  ;;  %v5887_v2 = vrot.slane %v5871_v12, 9  ;;  %v5872_v0 = vld [vmem:[%s7297_s11 + $0x3c] sm:$0xe] }
 0x124   : > { %6754 = vmatprep.subr.bf16.mxu1 %v7197_v1  ;;  %v5928_v53 = vcombine.low %v8815_v4, %v8829_v57  ;;  %v4645_v14 = vrot.slane %v9138_v40, 5  ;;  %v4577_v56 = vrot.slane %v4575_v23, 4  ;;  %v7203_v24 = vld [vmem:[%s7297_s11 + $0x40] sm:$0xf]  ;;  %v4569_v48 = vsel %vm7575_vm5, %v5886_v18, %v4568_v49  ;;  %v7205_v18 = vld [vmem:[%s7297_s11 + $0x44] sm:$0x1] }
 0x125   : > { %6695 = vmatmul.mubr.bf16.gmra.mrb[24].mxu0 %v5858_v6  ;;  %v7200_v6 = vld [vmem:[%s9070_s1 + $0x128] sm:$0xff]   ;;  %v4582_v55 = vrot.slane %v7203_v24, 5  ;;  %v4652_v12 = vrot.slane %v8534_v10, 5  ;;  %v4576_v49 = vsel %vm7575_vm5, %v5887_v2, %v4575_v23  ;;  %v7206_v10 = vld [vmem:[%s9070_s1 + $0x138] sm:$0xff]   ;;  %v5883_v23 = vld [vmem:[%s7297_s11 + $0xc0] sm:$0xe] }
 0x126   : > { %6487 = vmatmul.mubr.bf16.gmra.mrb[8].mxu1 %v7138_v39  ;;  %6698 = vmatprep.mubr.bf16.mxu0 %v5859_v3  ;;  %v4571_v39 = vrot.slane %v7201_v33, 5  ;;  %v4648_v3 = vrot.slane %v8522_v21, 5  ;;  %v8846_v7 = vsel %vm7575_vm5, %v5897_v47, %v4645_v14  ;;  %v7204_v21 = vld [vmem:[%s9070_s1 + $0x130] sm:$0xff]   ;;  %v5898_v47 = vrot.slane %v5882_v11, 9 }
 0x127   : > { %6490 = vmatprep.mubr.bf16.mxu1 %v7140_v46  ;;  %6762 = vmatpush3.bf16.msra.mxu1 %v7197_v1  ;;  %v4647_v46 = vrot.slane %v4645_v14, 4  ;;  %v7202_v1 = vld [vmem:[%s7297_s11 + $0x38] sm:$0x1]  ;;  %v5888_v14 = vrot.slane %v5872_v0, 9  ;;  %v4585_v33 = vrot.slane %v7205_v18, 5  ;;  %v4659_v11 = vrot.slane %v8616_v51, 5 }
 0x128   : > { %6755 = vmatprep.subr.bf16.mxu1 %v7200_v6  ;;  %v4578_v60 = vrot.slane %v7202_v1, 5  ;;  %v4572_v36 = vsel %vm7575_vm5, %v4570_v19, %v4571_v39  ;;  %v4654_v39 = vrot.slane %v4652_v12, 4  ;;  %v5573_v19 = vld [vmem:[%s7297_s11 + $0x6c] sm:$0xf]  ;;  %v7146_v18 = vld [vmem:[%s7297_s11 + $0x90] sm:$0xff]   ;;  %v2410_v20 = vshll.u32 %v7212_v63, 16 }
 0x129   : > { %v8858_v25 = vsel %vm7575_vm5, %v4647_v46, %v4648_v3  ;;  %v5918_v3 = vcombine.low %v4569_v48, %v4572_v36  ;;  %v4583_v1 = vsel %vm7575_vm5, %v5888_v14, %v4582_v55  ;;  %v2343_v0 = vshrl.u32 %v5573_v19, 16  ;;  %v5884_v51 = vld [vmem:[%s7297_s11 + $0xcc] sm:$0xe] }
 0x12a   : > { %v5929_v16 = vcombine.low %v8846_v7, %v8858_v25  ;;  %v4579_v40 = vsel %vm7575_vm5, %v4577_v56, %v4578_v60  ;;  %v5899_v56 = vrot.slane %v5883_v23, 9  ;;  %v2346_v24 = vshll.u32 %v5573_v19, 16 }
 0x12b   : > { %6763 = vmatpush3.bf16.msra.mxu1 %v7200_v6  ;;  %v4655_v6 = vrot.slane %v8555_v27, 5  ;;  %v8878_v27 = vsel %vm7575_vm5, %v5898_v47, %v4652_v12  ;;  %v4662_v36 = vrot.slane %v8667_v26, 5  ;;  %v4661_v12 = vrot.slane %v4659_v11, 4 }
 0x12c   : > { %6756 = vmatprep.subr.bf16.mxu1 %v7204_v21  ;;  %v2348_v26 = vrot.slane %v2346_v24, 5  ;;  %v4669_v23 = vrot.slane %v8757_v13, 5 }
 0x12d   : > { %6699 = vmatmul.mubr.bf16.gmra.mrb[28].mxu0 %v5860_v28  ;;  %v4584_v28 = vrot.slane %v4582_v55, 4  ;;  %v8885_v46 = vsel %vm7575_vm5, %v4654_v39, %v4655_v6  ;;  %v8899_v55 = vsel %vm7575_vm5, %v5899_v56, %v4659_v11  ;;  %v4666_v39 = vrot.slane %v8719_v31, 5  ;;  %v7208_v56 = vld [vmem:[%s7297_s11 + $0x74] sm:$0x1] }
 0x12e   : > { %6491 = vmatmul.mubr.bf16.gmra.mrb[12].mxu1 %v7141_v30  ;;  %6718 = vmatprep.mubr.bf16.mxu0 %v5917_v34  ;;  %v7144_v30 = vld [vmem:[%s7297_s11 + $0x78] sm:$0xff]   ;;  %v5919_v34 = vcombine.low %v4576_v49, %v4579_v40  ;;  %v5930_v2 = vcombine.low %v8878_v27, %v8885_v46  ;;  %v8904_v49 = vsel %vm7575_vm5, %v4661_v12, %v4662_v36  ;;  %v2345_v40 = vrot.slane %v2343_v0, 4  ;;  %v7209_v0 = vld [vmem:[%s7297_s11 + $0x88] sm:$0xf] }
 0x12f   : > { %6494 = vmatprep.mubr.bf16.mxu1 %v7143_v52  ;;  %6764 = vmatpush3.bf16.msra.mxu1 %v7204_v21  ;;  %v7145_v52 = vld [vmem:[%s7297_s11 + $0x84] sm:$0xff]   ;;  %v4586_v60 = vsel %vm7575_vm5, %v4584_v28, %v4585_v33  ;;  %v7207_v21 = vld [vmem:[%s7297_s11 + $0x70] sm:$0xf]  ;;  %v5931_v28 = vcombine.low %v8899_v55, %v8904_v49  ;;  %v4668_v19 = vrot.slane %v4666_v39, 4  ;;  %v2400_v24 = vshll.u32 %v7209_v0, 16 }
 0x130   : > { %6757 = vmatprep.subr.bf16.mxu1 %v7206_v10  ;;  %v2352_v48 = vshll.u32 %v7207_v21, 16  ;;  %v2356_v47 = vshrl.u32 %v7207_v21, 16  ;;  %v5920_v6 = vcombine.low %v4583_v1, %v4586_v60  ;;  %v2362_v1 = vshll.u32 %v7208_v56, 16 }
 0x131   : > { %v8926_v11 = vsel %vm7575_vm5, %v4668_v19, %v4669_v23  ;;  %v2404_v21 = vshrl.u32 %v7209_v0, 16  ;;  %v7211_v19 = vld [vmem:[%s7297_s11 + $0xa0] sm:$0xf] }
 0x132   : > { %v8906_v14 = vrot.slane %v2352_v48, 5  ;;  %v2358_v33 = vrot.slane %v2356_v47, 4  ;;  %v2452_v56 = vshrl.u32 %v7211_v19, 16 }
 0x133   : > { %6765 = vmatpush3.bf16.msra.mxu1 %v7206_v10  ;;  %v5900_v10 = vrot.slane %v5884_v51, 9 }
 0x134   : > { %v2359_v31 = vor.u32 %v2358_v33, %v8906_v14  ;;  %v2418_v33 = vshll.u32 %v5582_v61, 16 }
 0x135   : > { %6719 = vmatmul.mubr.bf16.vlgmr.msra.gmra.mrb[0].mxu0 %v5918_v3  ;;  %v7147_v3 = vld [vmem:[%s7297_s11 + $0x9c] sm:$0xff]  }
 0x136   : > { %6495 = vmatmul.mubr.bf16.gmra.mrb[16].mxu1 %v7144_v30  ;;  %6722 = vmatprep.mubr.bf16.mxu0 %v5919_v34  ;;  %v5579_v30 = vld [vmem:[%s7297_s11 + $0x84] sm:$0xf]  ;;  %v8917_v34 = vsel %vm7575_vm5, %v5900_v10, %v4666_v39  ;;  %v2360_v47 = vrot.slane %v2359_v31, 4  ;;  %v7210_v10 = vld [vmem:[%s7297_s11 + $0x94] sm:$0xf]  ;;  %v2420_v0 = vrot.slane %v2418_v33, 5 }
 0x137   : > { %6498 = vmatprep.mubr.bf16.mxu1 %v7145_v52  ;;  %v2349_v52 = vor.u32 %v2348_v26, %v2345_v40  ;;  %v2391_v13 = vshrl.u32 %v5579_v30, 16  ;;  %v2394_v60 = vshll.u32 %v5579_v30, 16  ;;  %v5932_v48 = vcombine.low %v8917_v34, %v8926_v11 }
 0x138   : > { %v8935_v40 = vrot.slane %v2400_v24, 5  ;;  %v2406_v26 = vrot.slane %v2404_v21, 4  ;;  %v2424_v39 = vshll.u32 %v7210_v10, 16  ;;  %v2428_v23 = vshrl.u32 %v7210_v10, 16  ;;  %v7214_v10 = vld [vmem:[%s7297_s11 + $0xa4] sm:$0x1] }
 0x139   : > { %v2350_v36 = vrot.slane %v2349_v52, 4  ;;  %v2393_v12 = vrot.slane %v2391_v13, 4  ;;  %v2396_v51 = vrot.slane %v2394_v60, 5  ;;  %v2448_v52 = vshll.u32 %v7211_v19, 16  ;;  %v7215_v19 = vld [vmem:[%s7297_s11 + $0xac] sm:$0xf] }
 0x13a   : > { %v2407_v13 = vor.u32 %v2406_v26, %v8935_v40  ;;  %v8952_v41 = vrot.slane %v2424_v39, 5  ;;  %v2430_v42 = vrot.slane %v2428_v23, 4  ;;  %v2454_v21 = vrot.slane %v2452_v56, 4  ;;  %v5591_v23 = vld [vmem:[%s7297_s11 + $0xb4] sm:$0xf] }
 0x13b   : > { %v2458_v39 = vshll.u32 %v7214_v10, 16  ;;  %v2476_v15 = vshrl.u32 %v7215_v19, 16  ;;  %v2490_v63 = vshll.u32 %v5591_v23, 16 }
 0x13c   : > { %v2431_v26 = vor.u32 %v2430_v42, %v8952_v41 }
 0x13d   : > { %6723 = vmatmul.mubr.bf16.gmra.mrb[4].mxu0 %v5920_v6  ;;  %v5585_v6 = vld [vmem:[%s7297_s11 + $0x9c] sm:$0xf] }
 0x13e   : > { %6499 = vmatmul.mubr.bf16.gmra.mrb[20].mxu1 %v7146_v18  ;;  %6726 = vmatprep.mubr.bf16.mxu0 %v5921_v8  ;;  %v2364_v8 = vrot.slane %v2362_v1, 5  ;;  %v2415_v18 = vshrl.u32 %v5582_v61, 16  ;;  %v2442_v30 = vshll.u32 %v5585_v6, 16  ;;  %v2355_v1 = vsel %vm7329_vm2, %v2350_v36, %v8906_v14  ;;  %v7150_v61 = vld [vmem:[%s7297_s11 + $0xc0] sm:$0xff]  }
 0x13f   : > { %6502 = vmatprep.mubr.bf16.mxu1 %v7147_v3  ;;  %v2439_v3 = vshrl.u32 %v5585_v6, 16  ;;  %v8954_v14 = vrot.slane %v2448_v52, 5  ;;  %v2472_v52 = vshll.u32 %v7215_v19, 16 }
 0x140   : > { %v2365_v31 = vsel %vm7329_vm2, %v2360_v47, %v2364_v8  ;;  %v2417_v60 = vrot.slane %v2415_v18, 4  ;;  %v2444_v24 = vrot.slane %v2442_v30, 5  ;;  %v2412_v8 = vrot.slane %v2410_v20, 5  ;;  %v7216_v20 = vld [vmem:[%s7297_s11 + $0xb8] sm:$0xf] }
 0x141   : > { %v2408_v47 = vrot.slane %v2407_v13, 4  ;;  %v2455_v33 = vor.u32 %v2454_v21, %v8954_v14  ;;  %v2496_v29 = vshll.u32 %v7216_v20, 16  ;;  %v2500_v44 = vshrl.u32 %v7216_v20, 16 }
 0x143   : > { %v2456_v13 = vrot.slane %v2455_v33, 4 }
 0x145   : > { %6727 = vmatmul.mubr.bf16.gmra.mrb[8].mxu0 %v5922_v54  ;;  %v2397_v54 = vor.u32 %v2396_v51, %v2393_v12  ;;  %v2421_v12 = vor.u32 %v2420_v0, %v2417_v60  ;;  %v7213_v51 = vld [vmem:[%s7297_s11 + $0x98] sm:$0x1]  ;;  %v2460_v60 = vrot.slane %v2458_v39, 5 }
 0x146   : > { %6503 = vmatmul.mubr.bf16.gmra.mrb[24].mxu1 %v7148_v45  ;;  %6730 = vmatprep.mubr.bf16.mxu0 %v5923_v17  ;;  %v2441_v17 = vrot.slane %v2439_v3, 4  ;;  %v5621_v45 = vcombine.low %v2355_v1, %v2365_v31  ;;  %v2434_v6 = vshll.u32 %v7213_v51, 16  ;;  %v2487_v31 = vshrl.u32 %v5591_v23, 16 }
 0x147   : > { %6506 = vmatprep.mubr.bf16.mxu1 %v7149_v9  ;;  %v2398_v36 = vrot.slane %v2397_v54, 4  ;;  %v5588_v9 = vld [vmem:[%s7297_s11 + $0xa8] sm:$0xf]  ;;  %v2422_v56 = vrot.slane %v2421_v12, 4  ;;  %v2461_v32 = vsel %vm7329_vm2, %v2456_v13, %v2460_v60 }
 0x148   : > { %v2445_v18 = vor.u32 %v2444_v24, %v2441_v17  ;;  %v2463_v3 = vshrl.u32 %v5588_v9, 16  ;;  %v2466_v30 = vshll.u32 %v5588_v9, 16  ;;  %v2436_v1 = vrot.slane %v2434_v6, 5 }
 0x149   : > { %v2403_v43 = vsel %vm7329_vm2, %v2398_v36, %v8935_v40  ;;  %v2474_v17 = vrot.slane %v2472_v52, 5  ;;  %v2478_v24 = vrot.slane %v2476_v15, 4  ;;  %v2489_v21 = vrot.slane %v2487_v31, 4  ;;  %v5594_v36 = vld [vmem:[%s7297_s11 + $0xc0] sm:$0xf] }
 0x14a   : > { %v2446_v54 = vrot.slane %v2445_v18, 4  ;;  %v2465_v0 = vrot.slane %v2463_v3, 4  ;;  %v2468_v42 = vrot.slane %v2466_v30, 5  ;;  %v2511_v9 = vshrl.u32 %v5594_v36, 16  ;;  %v7218_v18 = vld [vmem:[%s7297_s11 + $0xc4] sm:$0xf] }
 0x14b   : > { %v2520_v33 = vshll.u32 %v7218_v18, 16 }
 0x14c   : > { %v2451_v51 = vsel %vm7329_vm2, %v2446_v54, %v8954_v14  ;;  %v2469_v5 = vor.u32 %v2468_v42, %v2465_v0  ;;  %v2524_v14 = vshrl.u32 %v7218_v18, 16  ;;  %v2513_v19 = vrot.slane %v2511_v9, 4 }
 0x14d   : > { %6731 = vmatmul.mubr.bf16.gmra.mrb[12].mxu0 %v5924_v38  ;;  %v2413_v38 = vsel %vm7329_vm2, %v2408_v47, %v2412_v8  ;;  %v2502_v8 = vrot.slane %v2500_v44, 4  ;;  %v2427_v47 = vsel %vm7329_vm2, %v2422_v56, %v8952_v41  ;;  %v7217_v41 = vld [vmem:[%s7297_s11 + $0xb0] sm:$0x1]  ;;  %v5625_v58 = vcombine.low %v2451_v51, %v2461_v32  ;;  %v7220_v44 = vld [vmem:[%s7297_s11 + $0xc8] sm:$0x1] }
 0x14e   : > { %6507 = vmatmul.mubr.bf16.gmra.mrb[28].mxu1 %v7150_v61  ;;  %6734 = vmatprep.mubr.bf16.mxu0 %v5925_v35  ;;  %v2432_v35 = vrot.slane %v2431_v26, 4  ;;  %v5623_v40 = vcombine.low %v2403_v43, %v2413_v38  ;;  %v2492_v61 = vrot.slane %v2490_v63, 5  ;;  %v2482_v6 = vshll.u32 %v7217_v41, 16 }
 0x14f   : > { %6542 = vmatprep.mubr.bf16.mxu1 %v5621_v45  ;;  %v2498_v45 = vrot.slane %v2496_v29, 5  ;;  %v2514_v26 = vshll.u32 %v5594_v36, 16  ;;  %v2470_v22 = vrot.slane %v2469_v5, 4  ;;  %v2522_v15 = vrot.slane %v2520_v33, 5 }
 0x150   : > { %v2437_v12 = vsel %vm7329_vm2, %v2432_v35, %v2436_v1  ;;  %v2493_v10 = vor.u32 %v2492_v61, %v2489_v21  ;;  %v2484_v30 = vrot.slane %v2482_v6, 5  ;;  %v2526_v43 = vrot.slane %v2524_v14, 4 }
 0x151   : > { %v2503_v39 = vor.u32 %v2502_v8, %v2498_v45  ;;  %v5624_v3 = vcombine.low %v2427_v47, %v2437_v12  ;;  %v2516_v52 = vrot.slane %v2514_v26, 5  ;;  %v2475_v31 = vsel %vm7329_vm2, %v2470_v22, %v2474_v17 }
 0x152   : > { %v2494_v38 = vrot.slane %v2493_v10, 4  ;;  %v2527_v29 = vor.u32 %v2526_v43, %v2522_v15  ;;  %v2530_v35 = vshll.u32 %v7220_v44, 16 }
 0x153   : > { %v2504_v56 = vrot.slane %v2503_v39, 4  ;;  %v2517_v20 = vor.u32 %v2516_v52, %v2513_v19 }
 0x154   : > { %v2499_v4 = vsel %vm7329_vm2, %v2494_v38, %v2498_v45  ;;  %v2532_v54 = vrot.slane %v2530_v35, 5 }
 0x155   : > { %6735 = vmatmul.mubr.bf16.gmra.mrb[16].mxu0 %v5926_v62  ;;  %v2479_v62 = vor.u32 %v2478_v24, %v2474_v17  ;;  %v2518_v25 = vrot.slane %v2517_v20, 4 }
 0x156   : > { %6543 = vmatmul.mubr.bf16.vlgmr.msra.gmra.mrb[16].mxu1 %v8777_v50  ;;  %6738 = vmatprep.mubr.bf16.mxu0 %v5927_v59  ;;  %v7219_v50 = vld [vmem:[%s7297_s11 + $0xbc] sm:$0x1]  ;;  %s5354_s11 = sshll.u32 %s7255_s13, 5 }
 0x157   : > { %6546 = vmatprep.mubr.bf16.mxu1 %v5623_v40  ;;  %v2506_v23 = vshll.u32 %v7219_v50, 16  ;;  %v2480_v59 = vrot.slane %v2479_v62, 4  ;;  %v2523_v13 = vsel %vm7329_vm2, %v2518_v25, %v2522_v15  ;;  %p174_p4 = scmp.lt.s32.totalorder %s5354_s11, 63 }
 0x159   : > { %v2508_v1 = vrot.slane %v2506_v23, 5  ;;  %v2485_v63 = vsel %vm7329_vm2, %v2480_v59, %v2484_v30  ;;  %s9140_s11 = smov (!%p174_p4, %s5354_s11), 63 }
 0x15a   : > { %s5355_s16 = sshll.u32 %s9140_s11, 2 }
 0x15b   : > { %v2509_v57 = vsel %vm7329_vm2, %v2504_v56, %v2508_v1  ;;  %s9039_s18 = scalar_lea.vmem %s9071_s2, %s5355_s16 }
 0x15c   : > { %v5627_v7 = vcombine.low %v2499_v4, %v2509_v57 }
 0x15d   : > { %6739 = vmatmul.mubr.bf16.gmra.mrb[20].mxu0 %v5928_v53  ;;  %v5626_v53 = vcombine.low %v2475_v31, %v2485_v63 }
 0x15e   : > { %6547 = vmatmul.mubr.bf16.gmra.mrb[20].mxu1 %v5624_v3  ;;  %6742 = vmatprep.mubr.bf16.mxu0 %v5929_v16  ;;  %v2528_v16 = vrot.slane %v2527_v29, 4 }
 0x15f   : > { %6550 = vmatprep.mubr.bf16.mxu1 %v5625_v58 }
 0x160   : > { %v2533_v60 = vsel %vm7329_vm2, %v2528_v16, %v2532_v54 }
 0x161   : > { %v5628_v0 = vcombine.low %v2523_v13, %v2533_v60 }
 0x165   : > { %6743 = vmatmul.mubr.bf16.gmra.mrb[24].mxu0 %v5930_v2 }
 0x166   : > { %6551 = vmatmul.mubr.bf16.gmra.mrb[24].mxu1 %v5626_v53  ;;  %6746 = vmatprep.mubr.bf16.mxu0 %v5931_v28 }
 0x167   : > { %6554 = vmatprep.mubr.bf16.mxu1 %v5627_v7 }
 0x16d   : > { %6747 = vmatmul.mubr.bf16.gmra.mrb[28].mxu0 %v5932_v48 }
 0x16e   : > { %6555 = vmatmul.mubr.bf16.gmra.mrb[28].mxu1 %v5628_v0 }
 0x1e9   : > { %v6480_v27 = vpop.f32.mrb[0].mxu1 }
 0x1ea   : > { %v1943_v46 = vpop.f32.mrb[1].mxu1 }
 0x1eb   : > { %v6481_v2 = vpop.f32.mrb[2].mxu1 }
 0x1ec   : > { %v1946_v42 = vpop.f32.mrb[3].mxu1 }
 0x1f1   : > { %v6484_v55 = vpop.f32.mrb[4].mxu1 }
 0x1f2   : > { %v1959_v49 = vpop.f32.mrb[5].mxu1 }
 0x1f3   : > { %v6485_v28 = vpop.f32.mrb[6].mxu1 }
 0x1f4   : > { %v1962_v17 = vpop.f32.mrb[7].mxu1 }
 0x1f9   : > { %v6488_v24 = vpop.f32.mrb[8].mxu1 }
 0x1fa   : > { %v1975_v40 = vpop.f32.mrb[9].mxu1 }
 0x1fb   : > { %v6489_v21 = vpop.f32.mrb[10].mxu1 }
 0x1fc   : > { %v9025_v37 = vpop.f32.mrb[11].mxu1 }
 0x201   : > { %v9028_v61 = vpop.f32.mrb[12].mxu1 }
 0x202   : > { %v9030_v34 = vpop.f32.mrb[13].mxu1 }
 0x203   : > { %v9032_v11 = vpop.f32.mrb[14].mxu1 }
 0x204   : > { %v9034_v48 = vpop.f32.mrb[15].mxu1 }
 0x208   : > { %v6720_v45 = vpop.f32.mrb[0].mxu0 }
 0x209   : > { %v6766_v8 = vadd.f32 %v6720_v45, %v6480_v27  ;;  %v4834_v36 = vpop.f32.mrb[1].mxu0 }
 0x20a   : > { %v6767_v47 = vadd.f32 %v4834_v36, %v1943_v46  ;;  %v6721_v12 = vpop.f32.mrb[2].mxu0 }
 0x20b   : > { %v6768_v51 = vadd.f32 %v6721_v12, %v6481_v2  ;;  %v4837_v32 = vpop.f32.mrb[3].mxu0  ;;  %v5193_v18 = vmul.f32 %v6766_v8, %v6766_v8 }
 0x20c   : > { %v6769_v5 = vadd.f32 %v4837_v32, %v1946_v42  ;;  %v5191_v41 = vmul.f32 %v6767_v47, %v6767_v47 }
 0x20d   : > { %v6015_v62 = vpack.c.bf16 %v6768_v51, %v6766_v8  ;;  %v5194_v23 = vmul.f32 %v6768_v51, %v6768_v51 }
 0x20e   : > { %v6010_v6 = vpack.c.bf16 %v6769_v5, %v6767_v47  ;;  %v5153_v9 = vadd.f32 %v6769_v5, %v6767_v47  ;;  %v5192_v26 = vmul.f32 %v6769_v5, %v6769_v5 }
 0x20f   : > { %6087 = vst [vmem:[%s9039_s18 + $0x8] sm:$0xff] %v6015_v62  }
 0x210   : > { %6011 = vst [vmem:[%s9039_s18] sm:$0xff] %v6010_v6   ;;  %v5154_v33 = vadd.f32 %v6766_v8, %v5153_v9  ;;  %v5223_v14 = vadd.f32 %v5192_v26, %v5191_v41  ;;  %v6724_v10 = vpop.f32.mrb[4].mxu0 }
 0x211   : > { %v6770_v39 = vadd.f32 %v6724_v10, %v6484_v55  ;;  %v4850_v50 = vpop.f32.mrb[5].mxu0 }
 0x212   : > { %v5224_v3 = vadd.f32 %v5223_v14, %v5193_v18  ;;  %v6771_v58 = vadd.f32 %v4850_v50, %v1959_v49  ;;  %v5155_v22 = vadd.f32 %v6768_v51, %v5154_v33  ;;  %v6725_v59 = vpop.f32.mrb[6].mxu0 }
 0x213   : > { %v6772_v30 = vadd.f32 %v6725_v59, %v6485_v28  ;;  %v4853_v19 = vpop.f32.mrb[7].mxu0  ;;  %v5197_v29 = vmul.f32 %v6770_v39, %v6770_v39 }
 0x214   : > { %v5156_v52 = vadd.f32 %v6771_v58, %v5155_v22  ;;  %v5195_v15 = vmul.f32 %v6771_v58, %v6771_v58  ;;  %v5225_v43 = vadd.f32 %v5224_v3, %v5194_v23  ;;  %v6773_v38 = vadd.f32 %v4853_v19, %v1962_v17 }
 0x215   : > { %v6025_v56 = vpack.c.bf16 %v6772_v30, %v6770_v39  ;;  %v5198_v7 = vmul.f32 %v6772_v30, %v6772_v30 }
 0x216   : > { %v5226_v1 = vadd.f32 %v5225_v43, %v5195_v15  ;;  %v6020_v31 = vpack.c.bf16 %v6773_v38, %v6771_v58  ;;  %v5157_v63 = vadd.f32 %v6773_v38, %v5156_v52  ;;  %v5196_v20 = vmul.f32 %v6773_v38, %v6773_v38 }
 0x217   : > { %6089 = vst [vmem:[%s9039_s18 + $0x18] sm:$0xff] %v6025_v56  }
 0x218   : > { %6088 = vst [vmem:[%s9039_s18 + $0x10] sm:$0xff] %v6020_v31   ;;  %v5158_v44 = vadd.f32 %v6770_v39, %v5157_v63  ;;  %v5227_v35 = vadd.f32 %v5226_v1, %v5196_v20  ;;  %v6728_v4 = vpop.f32.mrb[8].mxu0 }
 0x219   : > { %v6774_v57 = vadd.f32 %v6728_v4, %v6488_v24  ;;  %v4866_v53 = vpop.f32.mrb[9].mxu0 }
 0x21a   : > { %v5228_v25 = vadd.f32 %v5227_v35, %v5197_v29  ;;  %v6775_v16 = vadd.f32 %v4866_v53, %v1975_v40  ;;  %v5159_v54 = vadd.f32 %v6772_v30, %v5158_v44  ;;  %v6729_v13 = vpop.f32.mrb[10].mxu0 }
 0x21b   : > { %v6776_v60 = vadd.f32 %v6729_v13, %v6489_v21  ;;  %v4869_v0 = vpop.f32.mrb[11].mxu0  ;;  %v5201_v45 = vmul.f32 %v6774_v57, %v6774_v57 }
 0x21c   : > { %v5160_v27 = vadd.f32 %v6775_v16, %v5159_v54  ;;  %v5199_v46 = vmul.f32 %v6775_v16, %v6775_v16  ;;  %v5229_v2 = vadd.f32 %v5228_v25, %v5198_v7  ;;  %v6777_v42 = vadd.f32 %v4869_v0, %v9025_v37 }
 0x21d   : > { %v6035_v55 = vpack.c.bf16 %v6776_v60, %v6774_v57  ;;  %v5202_v12 = vmul.f32 %v6776_v60, %v6776_v60 }
 0x21e   : > { %v5230_v49 = vadd.f32 %v5229_v2, %v5199_v46  ;;  %v6030_v28 = vpack.c.bf16 %v6777_v42, %v6775_v16  ;;  %v5161_v17 = vadd.f32 %v6777_v42, %v5160_v27  ;;  %v5200_v24 = vmul.f32 %v6777_v42, %v6777_v42 }
 0x21f   : > { %6091 = vst [vmem:[%s9039_s18 + $0x28] sm:$0xff] %v6035_v55  }
 0x220   : > { %6090 = vst [vmem:[%s9039_s18 + $0x20] sm:$0xff] %v6030_v28   ;;  %v5162_v8 = vadd.f32 %v6774_v57, %v5161_v17  ;;  %v5231_v40 = vadd.f32 %v5230_v49, %v5200_v24  ;;  %v6732_v36 = vpop.f32.mrb[12].mxu0 }
 0x221   : > { %v6778_v47 = vadd.f32 %v6732_v36, %v9028_v61  ;;  %v4882_v21 = vpop.f32.mrb[13].mxu0 }
 0x222   : > { %v5232_v51 = vadd.f32 %v5231_v40, %v5201_v45  ;;  %v6779_v32 = vadd.f32 %v4882_v21, %v9030_v34  ;;  %v5163_v37 = vadd.f32 %v6776_v60, %v5162_v8  ;;  %v6733_v5 = vpop.f32.mrb[14].mxu0 }
 0x223   : > { %v6780_v62 = vadd.f32 %v6733_v5, %v9032_v11  ;;  %v4885_v41 = vpop.f32.mrb[15].mxu0  ;;  %v5205_v50 = vmul.f32 %v6778_v47, %v6778_v47 }
 0x224   : > { %v5164_v6 = vadd.f32 %v6779_v32, %v5163_v37  ;;  %v5203_v9 = vmul.f32 %v6779_v32, %v6779_v32  ;;  %v5233_v26 = vadd.f32 %v5232_v51, %v5202_v12  ;;  %v6781_v18 = vadd.f32 %v4885_v41, %v9034_v48 }
 0x225   : > { %v6045_v33 = vpack.c.bf16 %v6780_v62, %v6778_v47  ;;  %v5206_v11 = vmul.f32 %v6780_v62, %v6780_v62 }
 0x226   : > { %v5234_v14 = vadd.f32 %v5233_v26, %v5203_v9  ;;  %v6040_v61 = vpack.c.bf16 %v6781_v18, %v6779_v32  ;;  %v5165_v10 = vadd.f32 %v6781_v18, %v5164_v6  ;;  %v5204_v39 = vmul.f32 %v6781_v18, %v6781_v18 }
 0x227   : > { %6093 = vst [vmem:[%s9039_s18 + $0x38] sm:$0xff] %v6045_v33  }
 0x228   : > { %6092 = vst [vmem:[%s9039_s18 + $0x30] sm:$0xff] %v6040_v61   ;;  %v5166_v34 = vadd.f32 %v6778_v47, %v5165_v10  ;;  %v5235_v23 = vadd.f32 %v5234_v14, %v5204_v39  ;;  %v6736_v3 = vpop.f32.mrb[16].mxu0 }
 0x229   : > { %v6544_v58 = vpop.f32.mrb[16].mxu1  ;;  %v4898_v22 = vpop.f32.mrb[17].mxu0 }
 0x22a   : > { %v5236_v59 = vadd.f32 %v5235_v23, %v5205_v50  ;;  %v6782_v30 = vadd.f32 %v6736_v3, %v6544_v58  ;;  %v2761_v19 = vpop.f32.mrb[17].mxu1  ;;  %v5167_v52 = vadd.f32 %v6780_v62, %v5166_v34  ;;  %v6737_v48 = vpop.f32.mrb[18].mxu0 }
 0x22b   : > { %v6783_v15 = vadd.f32 %v4898_v22, %v2761_v19  ;;  %v6545_v43 = vpop.f32.mrb[18].mxu1  ;;  %v4901_v38 = vpop.f32.mrb[19].mxu0 }
 0x22c   : > { %v5237_v56 = vadd.f32 %v5236_v59, %v5206_v11  ;;  %v6784_v1 = vadd.f32 %v6737_v48, %v6545_v43  ;;  %v2764_v31 = vpop.f32.mrb[19].mxu1  ;;  %v5209_v25 = vmul.f32 %v6782_v30, %v6782_v30 }
 0x22d   : > { %v5168_v63 = vadd.f32 %v6783_v15, %v5167_v52  ;;  %v5207_v20 = vmul.f32 %v6783_v15, %v6783_v15  ;;  %v6785_v29 = vadd.f32 %v4901_v38, %v2764_v31 }
 0x22e   : > { %v6055_v44 = vpack.c.bf16 %v6784_v1, %v6782_v30  ;;  %v5210_v2 = vmul.f32 %v6784_v1, %v6784_v1 }
 0x22f   : > { %v5238_v35 = vadd.f32 %v5237_v56, %v5207_v20  ;;  %v6050_v4 = vpack.c.bf16 %v6785_v29, %v6783_v15  ;;  %v5169_v57 = vadd.f32 %v6785_v29, %v5168_v63  ;;  %v5208_v53 = vmul.f32 %v6785_v29, %v6785_v29 }
 0x230   : > { %6095 = vst [vmem:[%s9039_s18 + $0x48] sm:$0xff] %v6055_v44   ;;  %v6740_v7 = vpop.f32.mrb[20].mxu0 }
 0x231   : > { %6094 = vst [vmem:[%s9039_s18 + $0x40] sm:$0xff] %v6050_v4   ;;  %v5170_v16 = vadd.f32 %v6782_v30, %v5169_v57  ;;  %v5239_v54 = vadd.f32 %v5238_v35, %v5208_v53  ;;  %v6548_v13 = vpop.f32.mrb[20].mxu1  ;;  %v4914_v60 = vpop.f32.mrb[21].mxu0 }
 0x232   : > { %v6786_v0 = vadd.f32 %v6740_v7, %v6548_v13  ;;  %v2777_v27 = vpop.f32.mrb[21].mxu1  ;;  %v6741_v46 = vpop.f32.mrb[22].mxu0 }
 0x233   : > { %v5240_v42 = vadd.f32 %v5239_v54, %v5209_v25  ;;  %v6787_v55 = vadd.f32 %v4914_v60, %v2777_v27  ;;  %v5171_v49 = vadd.f32 %v6784_v1, %v5170_v16  ;;  %v6549_v28 = vpop.f32.mrb[22].mxu1  ;;  %v4917_v17 = vpop.f32.mrb[23].mxu0 }
 0x234   : > { %v6788_v24 = vadd.f32 %v6741_v46, %v6549_v28  ;;  %v2780_v45 = vpop.f32.mrb[23].mxu1  ;;  %v5213_v62 = vmul.f32 %v6786_v0, %v6786_v0 }
 0x235   : > { %v5172_v8 = vadd.f32 %v6787_v55, %v5171_v49  ;;  %v5211_v40 = vmul.f32 %v6787_v55, %v6787_v55  ;;  %v5241_v36 = vadd.f32 %v5240_v42, %v5210_v2  ;;  %v6789_v47 = vadd.f32 %v4917_v17, %v2780_v45 }
 0x236   : > { %v6065_v21 = vpack.c.bf16 %v6788_v24, %v6786_v0  ;;  %v5214_v61 = vmul.f32 %v6788_v24, %v6788_v24 }
 0x237   : > { %v5242_v12 = vadd.f32 %v5241_v36, %v5211_v40  ;;  %v6060_v51 = vpack.c.bf16 %v6789_v47, %v6787_v55  ;;  %v5173_v32 = vadd.f32 %v6789_v47, %v5172_v8  ;;  %v5212_v37 = vmul.f32 %v6789_v47, %v6789_v47 }
 0x238   : > { %6097 = vst [vmem:[%s9039_s18 + $0x58] sm:$0xff] %v6065_v21   ;;  %v6744_v5 = vpop.f32.mrb[24].mxu0 }
 0x239   : > { %6096 = vst [vmem:[%s9039_s18 + $0x50] sm:$0xff] %v6060_v51   ;;  %v5174_v41 = vadd.f32 %v6786_v0, %v5173_v32  ;;  %v5243_v6 = vadd.f32 %v5242_v12, %v5212_v37  ;;  %v6552_v9 = vpop.f32.mrb[24].mxu1  ;;  %v4930_v26 = vpop.f32.mrb[25].mxu0 }
 0x23a   : > { %v6790_v18 = vadd.f32 %v6744_v5, %v6552_v9  ;;  %v2793_v33 = vpop.f32.mrb[25].mxu1  ;;  %v6745_v14 = vpop.f32.mrb[26].mxu0 }
 0x23b   : > { %v5244_v10 = vadd.f32 %v5243_v6, %v5213_v62  ;;  %v6791_v39 = vadd.f32 %v4930_v26, %v2793_v33  ;;  %v5175_v50 = vadd.f32 %v6788_v24, %v5174_v41  ;;  %v6553_v34 = vpop.f32.mrb[26].mxu1  ;;  %v4933_v23 = vpop.f32.mrb[27].mxu0 }
 0x23c   : > { %v6792_v3 = vadd.f32 %v6745_v14, %v6553_v34  ;;  %v2796_v58 = vpop.f32.mrb[27].mxu1  ;;  %v5217_v56 = vmul.f32 %v6790_v18, %v6790_v18 }
 0x23d   : > { %v5176_v22 = vadd.f32 %v6791_v39, %v5175_v50  ;;  %v5215_v11 = vmul.f32 %v6791_v39, %v6791_v39  ;;  %v5245_v59 = vadd.f32 %v5244_v10, %v5214_v61  ;;  %v6793_v30 = vadd.f32 %v4933_v23, %v2796_v58 }
 0x23e   : > { %v6075_v19 = vpack.c.bf16 %v6792_v3, %v6790_v18  ;;  %v5218_v4 = vmul.f32 %v6792_v3, %v6792_v3 }
 0x23f   : > { %v5246_v52 = vadd.f32 %v5245_v59, %v5215_v11  ;;  %v6070_v48 = vpack.c.bf16 %v6793_v30, %v6791_v39  ;;  %v5177_v15 = vadd.f32 %v6793_v30, %v5176_v22  ;;  %v5216_v43 = vmul.f32 %v6793_v30, %v6793_v30 }
 0x240   : > { %6099 = vst [vmem:[%s9039_s18 + $0x68] sm:$0xff] %v6075_v19   ;;  %v6748_v38 = vpop.f32.mrb[28].mxu0 }
 0x241   : > { %6098 = vst [vmem:[%s9039_s18 + $0x60] sm:$0xff] %v6070_v48   ;;  %v5178_v1 = vadd.f32 %v6790_v18, %v5177_v15  ;;  %v5247_v31 = vadd.f32 %v5246_v52, %v5216_v43  ;;  %v6556_v63 = vpop.f32.mrb[28].mxu1  ;;  %v4946_v20 = vpop.f32.mrb[29].mxu0 }
 0x242   : > { %v6794_v29 = vadd.f32 %v6748_v38, %v6556_v63  ;;  %v2809_v44 = vpop.f32.mrb[29].mxu1  ;;  %v6749_v35 = vpop.f32.mrb[30].mxu0 }
 0x243   : > { %v5248_v57 = vadd.f32 %v5247_v31, %v5217_v56  ;;  %v6795_v53 = vadd.f32 %v4946_v20, %v2809_v44  ;;  %v5179_v7 = vadd.f32 %v6792_v3, %v5178_v1  ;;  %v6557_v25 = vpop.f32.mrb[30].mxu1  ;;  %v4949_v16 = vpop.f32.mrb[31].mxu0 }
 0x244   : > { %v6796_v54 = vadd.f32 %v6749_v35, %v6557_v25  ;;  %v2812_v13 = vpop.f32.mrb[31].mxu1  ;;  %v5221_v17 = vmul.f32 %v6794_v29, %v6794_v29 }
 0x245   : > { %v5180_v60 = vadd.f32 %v6795_v53, %v5179_v7  ;;  %v5219_v0 = vmul.f32 %v6795_v53, %v6795_v53  ;;  %v5249_v27 = vadd.f32 %v5248_v57, %v5218_v4  ;;  %v6797_v46 = vadd.f32 %v4949_v16, %v2812_v13 }
 0x246   : > { %v6085_v2 = vpack.c.bf16 %v6796_v54, %v6794_v29  ;;  %v5222_v8 = vmul.f32 %v6796_v54, %v6796_v54 }
 0x247   : > { %v5250_v42 = vadd.f32 %v5249_v27, %v5219_v0  ;;  %v6080_v55 = vpack.c.bf16 %v6797_v46, %v6795_v53  ;;  %v5181_v49 = vadd.f32 %v6797_v46, %v5180_v60  ;;  %v5220_v28 = vmul.f32 %v6797_v46, %v6797_v46 }
 0x248   : > { %6101 = vst [vmem:[%s9039_s18 + $0x78] sm:$0xff] %v6085_v2  }
 0x249   : > { %6100 = vst [vmem:[%s9039_s18 + $0x70] sm:$0xff] %v6080_v55   ;;  %v5182_v24 = vadd.f32 %v6794_v29, %v5181_v49  ;;  %v5251_v45 = vadd.f32 %v5250_v42, %v5220_v28 }
 0x24b   : > { %v5183_v40 = vadd.f32 %v6796_v54, %v5182_v24  ;;  %v5252_v36 = vadd.f32 %v5251_v45, %v5221_v17 }
 0x24d   : > { %v5184_v47 = vrot.slane %v5183_v40, 4  ;;  %v5253_v21 = vadd.f32 %v5252_v36, %v5222_v8 }
 0x24f   : > { %v5185_v12 = vadd.f32 %v5184_v47, %v5183_v40  ;;  %v5254_v51 = vrot.slane %v5253_v21, 4 }
 0x251   : > { %v5186_v32 = vrot.slane %v5185_v12, 2  ;;  %v5255_v37 = vadd.f32 %v5254_v51, %v5253_v21 }
 0x253   : > { %v5187_v5 = vadd.f32 %v5186_v32, %v5185_v12  ;;  %v5256_v62 = vrot.slane %v5255_v37, 2 }
 0x255   : > { %v5188_v41 = vrot.slane %v5187_v5, 1  ;;  %v5257_v6 = vadd.f32 %v5256_v62, %v5255_v37 }
 0x257   : > { %v5189_v9 = vadd.f32 %v5188_v41, %v5187_v5  ;;  %v5258_v26 = vrot.slane %v5257_v6, 1 }
 0x259   : > { %5190 = vst [vmem:[%s182_s22] sm:$0x1] %v5189_v9  ;;  %v5259_v18 = vadd.f32 %v5258_v26, %v5257_v6 }
 0x25b   : > { %5260 = vst [vmem:[%s182_s22 + $0x1] sm:$0x1] %v5259_v18 }
 0x25c PF: > { %s14_s12 = sadd.s32 1, %s7227_s12  }
 0x25d   : > { %p11_p5 = scmp.ge.s32.totalorder %s14_s12, 4  }
 0x25f   :  { %13 = sbr.rel (!%p11_p5) target bundleno = 1 (0x1), region = 80 }

</bundles_post_ra>
